<compile_context>
chip_gen: v6e
topology: v6e:2x2x1
jax: 0.10.0
libtpu: 0.0.40
codegen_flags: <defaults>
</compile_context>

<pallas_src>
import functools

import jax
import jax.numpy as jnp
from jax import lax
from jax.experimental import pallas as pl
from jax.experimental.pallas import tpu as pltpu


def _bilstm_layer_kernel(x_ref, wf_ref, wb_ref, bf_ref, bb_ref,
                         out_ref, hnb_ref, cnb_ref,
                         hf_sc, cf_sc, hb_sc, cb_sc,
                         *, hidden_dim, seq_len):
    """One bidirectional LSTM layer over the whole sequence.

    x_ref   : (S, B, IN)   time-major layer input (VMEM resident)
    wf/wb   : (IN+H, 4H)   fused [[W_ih];[W_hh]] per direction, bf16
    bf/bb   : (1, 4H)      fused b_ih + b_hh per direction, f32
    out_ref : (S, B, 2H)   [forward | backward] hidden states
    hnb/cnb : (B, H)       final backward-direction h / c
    """
    H = hidden_dim
    S = seq_len

    # Zero initial states (PyTorch default).
    hf_sc[...] = jnp.zeros_like(hf_sc)
    cf_sc[...] = jnp.zeros_like(cf_sc)
    hb_sc[...] = jnp.zeros_like(hb_sc)
    cb_sc[...] = jnp.zeros_like(cb_sc)

    # Weights / biases loaded once, stay in vregs/VMEM for the whole sequence.
    wf = wf_ref[...]            # (IN+H, 4H) bf16
    wb = wb_ref[...]
    bf = bf_ref[...]            # (1, 4H) f32
    bb = bb_ref[...]

    def cell(gates, c_prev):
        # PyTorch gate order: i, f, g, o.
        i_g = jax.nn.sigmoid(gates[:, 0 * H:1 * H])
        f_g = jax.nn.sigmoid(gates[:, 1 * H:2 * H])
        g_g = jnp.tanh(gates[:, 2 * H:3 * H])
        o_g = jax.nn.sigmoid(gates[:, 3 * H:4 * H])
        c_new = f_g * c_prev + i_g * g_g
        h_new = o_g * jnp.tanh(c_new)
        return h_new, c_new

    def step(t, carry):
        x_f = x_ref[t]                 # (B, IN) forward input at time t
        x_b = x_ref[S - 1 - t]         # (B, IN) backward input (reversed time)

        # Fused gate matmul operand: [x_t, h_{t-1}] -> (B, IN+H), bf16 for MXU.
        zf = jnp.concatenate([x_f, hf_sc[...]], axis=-1).astype(jnp.bfloat16)
        zb = jnp.concatenate([x_b, hb_sc[...]], axis=-1).astype(jnp.bfloat16)

        # Issue both directions' matmuls back-to-back (MXU of one direction
        # overlaps the EUP-heavy cell update of the other), accumulate in f32.
        gf = jnp.dot(zf, wf, preferred_element_type=jnp.float32) + bf
        gb = jnp.dot(zb, wb, preferred_element_type=jnp.float32) + bb

        h_f, c_f = cell(gf, cf_sc[...])
        h_b, c_b = cell(gb, cb_sc[...])
        hf_sc[...] = h_f
        cf_sc[...] = c_f
        hb_sc[...] = h_b
        cb_sc[...] = c_b

        # Write straight into the (S, B, 2H) output block (no wrapper concat).
        out_ref[t, :, 0:H] = h_f.astype(out_ref.dtype)
        out_ref[S - 1 - t, :, H:2 * H] = h_b.astype(out_ref.dtype)
        return carry

    # Short fixed trip-count -> unroll for LLO scheduler visibility.
    lax.fori_loop(0, S, step, 0, unroll=(S <= 32))

    # Final backward-direction states written once, after the recurrence.
    hnb_ref[...] = hb_sc[...].astype(hnb_ref.dtype)
    cnb_ref[...] = cb_sc[...].astype(cnb_ref.dtype)


def bilstm_layer(x, w_f, w_b, b_f, b_b, *, hidden_dim):
    """One bidirectional LSTM layer.  x: (S, B, IN) time-major (B padded to 8x).

    Returns (out (S,B,2H), h_n_backward (B,H), c_n_backward (B,H))."""
    S, B, IN = x.shape
    H = hidden_dim
    H4 = 4 * H
    ZIN = IN + H

    # TODO(synk): for long sequences / production H, chunk S across a grid axis
    # (carry h/c in scratch across "arbitrary" steps) and re-budget VMEM for
    # v7x's 64 MiB (bf16 weights + single-buffered constants) via
    # pltpu.CompilerParams(vmem_limit_bytes=...).
    # TODO(synk): on v7x the two directions could run on the two TensorCores
    # (leading grid axis of size 2 marked "parallel" / pl.core_map) instead of
    # being interleaved on one core.
    kernel = functools.partial(_bilstm_layer_kernel, hidden_dim=H, seq_len=S)

    out, h_nb, c_nb = pl.pallas_call(
        kernel,
        out_shape=(jax.ShapeDtypeStruct((S, B, 2 * H), x.dtype),
                   jax.ShapeDtypeStruct((B, H), x.dtype),
                   jax.ShapeDtypeStruct((B, H), x.dtype)),
        grid_spec=pltpu.PrefetchScalarGridSpec(
            num_scalar_prefetch=0,
            grid=(1,),
            in_specs=[pl.BlockSpec((S, B, IN), lambda i: (0, 0, 0)),
                      pl.BlockSpec((ZIN, H4), lambda i: (0, 0)),
                      pl.BlockSpec((ZIN, H4), lambda i: (0, 0)),
                      pl.BlockSpec((1, H4), lambda i: (0, 0)),
                      pl.BlockSpec((1, H4), lambda i: (0, 0))],
            out_specs=(pl.BlockSpec((S, B, 2 * H), lambda i: (0, 0, 0)),
                       pl.BlockSpec((B, H), lambda i: (0, 0)),
                       pl.BlockSpec((B, H), lambda i: (0, 0))),
            scratch_shapes=[pltpu.VMEM((B, H), jnp.float32)] * 4),
        compiler_params=pltpu.CompilerParams(
            dimension_semantics=("arbitrary",)),
    )(x, w_f, w_b, b_f, b_b)
    return out, h_nb, c_nb


def encoder_lstm_forward(src, params, *, num_layers, hidden_dim):
    """src: (B, S) int32 token ids.  Returns (outputs, hidden, cell) exactly
    like Encoder_LSTM.forward in eval mode."""
    B, S = src.shape
    # Embedding lookup (gather) + dropout (identity in eval) — glue in JAX.
    # TODO(synk): fold the gather into the layer-0 kernel via scalar-prefetched
    # token ids + a pl.Element row-gather BlockSpec to skip the HBM transpose.
    emb = jnp.take(params["embedding"], src, axis=0)          # (B, S, E)
    x = jnp.transpose(emb, (1, 0, 2))                          # (S, B, E)

    # Pad batch to a sublane multiple so the (B, 4H) matmuls / vreg stores are
    # not mostly padding; padded rows are dropped at the end.
    Bp = max(8, ((B + 7) // 8) * 8)
    if Bp != B:
        x = jnp.pad(x, ((0, 0), (0, Bp - B), (0, 0)))

    back_h, back_c = [], []
    for layer in range(num_layers):
        p = params["lstm"][layer]
        x, h_b, c_b = bilstm_layer(x, p["w_f"], p["w_b"], p["b_f"], p["b_b"],
                                   hidden_dim=hidden_dim)
        back_h.append(h_b)
        back_c.append(c_b)

    outputs = x[:, :B, :]                                      # (S, B, 2H)
    # PyTorch: hidden.view(L, 2, B, H)[:, -1]  -> backward direction per layer
    hidden = jnp.stack(back_h, axis=0)[:, :B, :]               # (L, B, H)
    cell = jnp.stack(back_c, axis=0)[:, :B, :]                 # (L, B, H)
    return outputs, hidden, cell


def init_params(key, *, input_dim, emb_dim, hidden_dim, num_layers):
    """Deterministic synthetic parameters, fused Pallas-friendly layout."""
    k = 1.0 / jnp.sqrt(hidden_dim)
    keys = jax.random.split(key, 1 + num_layers * 2 * 4)
    ki = iter(keys)

    emb_table = jax.random.normal(next(ki), (input_dim, emb_dim), jnp.float32)

    def uni(kk, shape):
        return jax.random.uniform(kk, shape, jnp.float32, -k, k)

    lstm = []
    for layer in range(num_layers):
        in_dim = emb_dim if layer == 0 else 2 * hidden_dim
        layer_p = {}
        for tag in ("f", "b"):
            w_ih = uni(next(ki), (4 * hidden_dim, in_dim))      # PyTorch (4H, in)
            w_hh = uni(next(ki), (4 * hidden_dim, hidden_dim))  # PyTorch (4H, H)
            b_ih = uni(next(ki), (4 * hidden_dim,))
            b_hh = uni(next(ki), (4 * hidden_dim,))
            # Fused layout for z = [x, h] @ W:   W = [[W_ih^T], [W_hh^T]]
            w = jnp.concatenate([w_ih.T, w_hh.T], axis=0)       # (in+H, 4H)
            layer_p["w_" + tag] = w.astype(jnp.bfloat16)        # MXU-native
            layer_p["b_" + tag] = (b_ih + b_hh)[None, :]        # (1, 4H) f32
        lstm.append(layer_p)

    return {"embedding": emb_table, "lstm": lstm}


if __name__ == "__main__":
    # Small shapes consistent with the module.
    INPUT_DIM = 50      # vocab size of pretrain_emb
    EMB_DIM = 16
    HIDDEN_DIM = 32
    NUM_LAYERS = 2
    BATCH = 2
    SEQ = 8

    key = jax.random.PRNGKey(0)
    k_param, k_src = jax.random.split(key)
    params = init_params(k_param, input_dim=INPUT_DIM, emb_dim=EMB_DIM,
                         hidden_dim=HIDDEN_DIM, num_layers=NUM_LAYERS)
    src = jax.random.randint(k_src, (BATCH, SEQ), 0, INPUT_DIM, jnp.int32)

    fwd = jax.jit(functools.partial(encoder_lstm_forward,
                                    num_layers=NUM_LAYERS,
                                    hidden_dim=HIDDEN_DIM))
    outputs, hidden, cell = fwd(src, params)
    jax.block_until_ready((outputs, hidden, cell))

    assert outputs.shape == (SEQ, BATCH, 2 * HIDDEN_DIM)
    assert hidden.shape == (NUM_LAYERS, BATCH, HIDDEN_DIM)
    assert cell.shape == (NUM_LAYERS, BATCH, HIDDEN_DIM)
    assert bool(jnp.all(jnp.isfinite(outputs)))
    assert bool(jnp.all(jnp.isfinite(hidden)))
    assert bool(jnp.all(jnp.isfinite(cell)))
    print("KERNEL_OK")
</pallas_src>

<mosaic_0001>
module attributes {stable_mosaic.version = 11 : i64} {
  func.func @_bilstm_layer_kernel(%arg0: i32, %arg1: memref<8x8x64xf32, #tpu.memory_space<vmem>>, %arg2: memref<96x128xbf16, #tpu.memory_space<vmem>>, %arg3: memref<96x128xbf16, #tpu.memory_space<vmem>>, %arg4: memref<1x128xf32, #tpu.memory_space<vmem>>, %arg5: memref<1x128xf32, #tpu.memory_space<vmem>>, %arg6: memref<8x8x64xf32, #tpu.memory_space<vmem>>, %arg7: memref<8x32xf32, #tpu.memory_space<vmem>>, %arg8: memref<8x32xf32, #tpu.memory_space<vmem>>, %arg9: memref<8x32xf32, #tpu.memory_space<vmem>>, %arg10: memref<8x32xf32, #tpu.memory_space<vmem>>, %arg11: memref<8x32xf32, #tpu.memory_space<vmem>>, %arg12: memref<8x32xf32, #tpu.memory_space<vmem>>) attributes {dimension_semantics = [#tpu.dimension_semantics<arbitrary>], iteration_bounds = array<i64: 1>, scalar_prefetch = 0 : i64, scratch_operands = 4 : i64, tpu.core_type = #tpu.core_type<tc>, window_params = [{pipeline_mode = #tpu.pipeline_mode<synchronous>, transform_indices = @transform_0, window_bounds = array<i64: 8, 8, 64>}, {pipeline_mode = #tpu.pipeline_mode<synchronous>, transform_indices = @transform_1, window_bounds = array<i64: 96, 128>}, {pipeline_mode = #tpu.pipeline_mode<synchronous>, transform_indices = @transform_2, window_bounds = array<i64: 96, 128>}, {pipeline_mode = #tpu.pipeline_mode<synchronous>, transform_indices = @transform_3, window_bounds = array<i64: 1, 128>}, {pipeline_mode = #tpu.pipeline_mode<synchronous>, transform_indices = @transform_4, window_bounds = array<i64: 1, 128>}, {pipeline_mode = #tpu.pipeline_mode<synchronous>, transform_indices = @transform_5, window_bounds = array<i64: 8, 8, 64>}, {pipeline_mode = #tpu.pipeline_mode<synchronous>, transform_indices = @transform_6, window_bounds = array<i64: 8, 32>}, {pipeline_mode = #tpu.pipeline_mode<synchronous>, transform_indices = @transform_7, window_bounds = array<i64: 8, 32>}]} {
    %cst = arith.constant 0.000000e+00 : f32
    %0 = vector.broadcast %cst : f32 to vector<8x32xf32>
    %c0 = arith.constant 0 : index
    %c0_0 = arith.constant 0 : index
    %1 = vector.load %arg9[%c0, %c0_0] : memref<8x32xf32, #tpu.memory_space<vmem>>, vector<8x32xf32>
    tpu.vector_store %arg9[%c0, %c0_0], %0 {strides = array<i32>} : memref<8x32xf32, #tpu.memory_space<vmem>>, vector<8x32xf32>,
    %cst_1 = arith.constant 0.000000e+00 : f32
    %2 = vector.broadcast %cst_1 : f32 to vector<8x32xf32>
    %c0_2 = arith.constant 0 : index
    %c0_3 = arith.constant 0 : index
    %3 = vector.load %arg10[%c0_2, %c0_3] : memref<8x32xf32, #tpu.memory_space<vmem>>, vector<8x32xf32>
    tpu.vector_store %arg10[%c0_2, %c0_3], %2 {strides = array<i32>} : memref<8x32xf32, #tpu.memory_space<vmem>>, vector<8x32xf32>,
    %cst_4 = arith.constant 0.000000e+00 : f32
    %4 = vector.broadcast %cst_4 : f32 to vector<8x32xf32>
    %c0_5 = arith.constant 0 : index
    %c0_6 = arith.constant 0 : index
    %5 = vector.load %arg11[%c0_5, %c0_6] : memref<8x32xf32, #tpu.memory_space<vmem>>, vector<8x32xf32>
    tpu.vector_store %arg11[%c0_5, %c0_6], %4 {strides = array<i32>} : memref<8x32xf32, #tpu.memory_space<vmem>>, vector<8x32xf32>,
    %cst_7 = arith.constant 0.000000e+00 : f32
    %6 = vector.broadcast %cst_7 : f32 to vector<8x32xf32>
    %c0_8 = arith.constant 0 : index
    %c0_9 = arith.constant 0 : index
    %7 = vector.load %arg12[%c0_8, %c0_9] : memref<8x32xf32, #tpu.memory_space<vmem>>, vector<8x32xf32>
    tpu.vector_store %arg12[%c0_8, %c0_9], %6 {strides = array<i32>} : memref<8x32xf32, #tpu.memory_space<vmem>>, vector<8x32xf32>,
    %c0_10 = arith.constant 0 : index
    %c0_11 = arith.constant 0 : index
    %8 = vector.load %arg2[%c0_10, %c0_11] : memref<96x128xbf16, #tpu.memory_space<vmem>>, vector<96x128xbf16>
    %c0_12 = arith.constant 0 : index
    %c0_13 = arith.constant 0 : index
    %9 = vector.load %arg3[%c0_12, %c0_13] : memref<96x128xbf16, #tpu.memory_space<vmem>>, vector<96x128xbf16>
    %c0_14 = arith.constant 0 : index
    %c0_15 = arith.constant 0 : index
    %10 = vector.load %arg4[%c0_14, %c0_15] : memref<1x128xf32, #tpu.memory_space<vmem>>, vector<1x128xf32>
    %c0_16 = arith.constant 0 : index
    %c0_17 = arith.constant 0 : index
    %11 = vector.load %arg5[%c0_16, %c0_17] : memref<1x128xf32, #tpu.memory_space<vmem>>, vector<1x128xf32>
    %c0_i32 = arith.constant 0 : i32
    %12 = arith.index_cast %c0_i32 : i32 to index
    %c0_18 = arith.constant 0 : index
    %c0_19 = arith.constant 0 : index
    %13 = vector.load %arg1[%12, %c0_18, %c0_19] : memref<8x8x64xf32, #tpu.memory_space<vmem>>, vector<1x8x64xf32>
    %14 = vector.shape_cast %13 : vector<1x8x64xf32> to vector<8x64xf32>
    %c7_i32 = arith.constant 7 : i32
    %15 = arith.subi %c7_i32, %c0_i32 : i32
    %16 = arith.index_cast %15 : i32 to index
    %c0_20 = arith.constant 0 : index
    %c0_21 = arith.constant 0 : index
    %17 = vector.load %arg1[%16, %c0_20, %c0_21] : memref<8x8x64xf32, #tpu.memory_space<vmem>>, vector<1x8x64xf32>
    %18 = vector.shape_cast %17 : vector<1x8x64xf32> to vector<8x64xf32>
    %c0_22 = arith.constant 0 : index
    %c0_23 = arith.constant 0 : index
    %19 = vector.load %arg9[%c0_22, %c0_23] : memref<8x32xf32, #tpu.memory_space<vmem>>, vector<8x32xf32>
    %20 = tpu.concatenate %14, %19 in 1 : vector<8x64xf32>, vector<8x32xf32> -> vector<8x96xf32>
    %21 = arith.truncf %20 : vector<8x96xf32> to vector<8x96xbf16>
    %c0_24 = arith.constant 0 : index
    %c0_25 = arith.constant 0 : index
    %22 = vector.load %arg11[%c0_24, %c0_25] : memref<8x32xf32, #tpu.memory_space<vmem>>, vector<8x32xf32>
    %23 = tpu.concatenate %18, %22 in 1 : vector<8x64xf32>, vector<8x32xf32> -> vector<8x96xf32>
    %24 = arith.truncf %23 : vector<8x96xf32> to vector<8x96xbf16>
    %cst_26 = arith.constant dense<0.000000e+00> : vector<8x128xf32>
    %25 = tpu.matmul %21, %8, %cst_26 {dimension_numbers = #tpu.dot_dimension_numbers<[1], [0], [0], [1], [0, 0, 1, 1], [], []>} : vector<8x96xbf16>, vector<96x128xbf16>, vector<8x128xf32> -> vector<8x128xf32>
    %26 = vector.broadcast %10 : vector<1x128xf32> to vector<8x128xf32>
    %27 = arith.addf %25, %26 : vector<8x128xf32>
    %cst_27 = arith.constant dense<0.000000e+00> : vector<8x128xf32>
    %28 = tpu.matmul %24, %9, %cst_27 {dimension_numbers = #tpu.dot_dimension_numbers<[1], [0], [0], [1], [0, 0, 1, 1], [], []>} : vector<8x96xbf16>, vector<96x128xbf16>, vector<8x128xf32> -> vector<8x128xf32>
    %29 = vector.broadcast %11 : vector<1x128xf32> to vector<8x128xf32>
    %30 = arith.addf %28, %29 : vector<8x128xf32>
    %c0_28 = arith.constant 0 : index
    %c0_29 = arith.constant 0 : index
    %31 = vector.load %arg10[%c0_28, %c0_29] : memref<8x32xf32, #tpu.memory_space<vmem>>, vector<8x32xf32>
    %32 = vector.extract_strided_slice %27 {offsets = [0, 0], sizes = [8, 32], strides = [1, 1]} : vector<8x128xf32> to vector<8x32xf32>
    %33 = arith.negf %32 : vector<8x32xf32>
    %34 = math.exp %33 : vector<8x32xf32>
    %cst_30 = arith.constant 1.000000e+00 : f32
    %35 = vector.broadcast %cst_30 : f32 to vector<8x32xf32>
    %36 = arith.addf %35, %34 : vector<8x32xf32>
    %37 = arith.divf %35, %36 : vector<8x32xf32>
    %38 = vector.extract_strided_slice %27 {offsets = [0, 32], sizes = [8, 32], strides = [1, 1]} : vector<8x128xf32> to vector<8x32xf32>
    %39 = arith.negf %38 : vector<8x32xf32>
    %40 = math.exp %39 : vector<8x32xf32>
    %cst_31 = arith.constant 1.000000e+00 : f32
    %41 = vector.broadcast %cst_31 : f32 to vector<8x32xf32>
    %42 = arith.addf %41, %40 : vector<8x32xf32>
    %43 = arith.divf %41, %42 : vector<8x32xf32>
    %44 = vector.extract_strided_slice %27 {offsets = [0, 64], sizes = [8, 32], strides = [1, 1]} : vector<8x128xf32> to vector<8x32xf32>
    %45 = math.tanh %44 : vector<8x32xf32>
    %46 = vector.extract_strided_slice %27 {offsets = [0, 96], sizes = [8, 32], strides = [1, 1]} : vector<8x128xf32> to vector<8x32xf32>
    %47 = arith.negf %46 : vector<8x32xf32>
    %48 = math.exp %47 : vector<8x32xf32>
    %cst_32 = arith.constant 1.000000e+00 : f32
    %49 = vector.broadcast %cst_32 : f32 to vector<8x32xf32>
    %50 = arith.addf %49, %48 : vector<8x32xf32>
    %51 = arith.divf %49, %50 : vector<8x32xf32>
    %52 = arith.mulf %43, %31 : vector<8x32xf32>
    %53 = arith.mulf %37, %45 : vector<8x32xf32>
    %54 = arith.addf %52, %53 : vector<8x32xf32>
    %55 = math.tanh %54 : vector<8x32xf32>
    %56 = arith.mulf %51, %55 : vector<8x32xf32>
    %c0_33 = arith.constant 0 : index
    %c0_34 = arith.constant 0 : index
    %57 = vector.load %arg12[%c0_33, %c0_34] : memref<8x32xf32, #tpu.memory_space<vmem>>, vector<8x32xf32>
    %58 = vector.extract_strided_slice %30 {offsets = [0, 0], sizes = [8, 32], strides = [1, 1]} : vector<8x128xf32> to vector<8x32xf32>
    %59 = arith.negf %58 : vector<8x32xf32>
    %60 = math.exp %59 : vector<8x32xf32>
    %cst_35 = arith.constant 1.000000e+00 : f32
    %61 = vector.broadcast %cst_35 : f32 to vector<8x32xf32>
    %62 = arith.addf %61, %60 : vector<8x32xf32>
    %63 = arith.divf %61, %62 : vector<8x32xf32>
    %64 = vector.extract_strided_slice %30 {offsets = [0, 32], sizes = [8, 32], strides = [1, 1]} : vector<8x128xf32> to vector<8x32xf32>
    %65 = arith.negf %64 : vector<8x32xf32>
    %66 = math.exp %65 : vector<8x32xf32>
    %cst_36 = arith.constant 1.000000e+00 : f32
    %67 = vector.broadcast %cst_36 : f32 to vector<8x32xf32>
    %68 = arith.addf %67, %66 : vector<8x32xf32>
    %69 = arith.divf %67, %68 : vector<8x32xf32>
    %70 = vector.extract_strided_slice %30 {offsets = [0, 64], sizes = [8, 32], strides = [1, 1]} : vector<8x128xf32> to vector<8x32xf32>
    %71 = math.tanh %70 : vector<8x32xf32>
    %72 = vector.extract_strided_slice %30 {offsets = [0, 96], sizes = [8, 32], strides = [1, 1]} : vector<8x128xf32> to vector<8x32xf32>
    %73 = arith.negf %72 : vector<8x32xf32>
    %74 = math.exp %73 : vector<8x32xf32>
    %cst_37 = arith.constant 1.000000e+00 : f32
    %75 = vector.broadcast %cst_37 : f32 to vector<8x32xf32>
    %76 = arith.addf %75, %74 : vector<8x32xf32>
    %77 = arith.divf %75, %76 : vector<8x32xf32>
    %78 = arith.mulf %69, %57 : vector<8x32xf32>
    %79 = arith.mulf %63, %71 : vector<8x32xf32>
    %80 = arith.addf %78, %79 : vector<8x32xf32>
    %81 = math.tanh %80 : vector<8x32xf32>
    %82 = arith.mulf %77, %81 : vector<8x32xf32>
    %c0_38 = arith.constant 0 : index
    %c0_39 = arith.constant 0 : index
    %83 = vector.load %arg9[%c0_38, %c0_39] : memref<8x32xf32, #tpu.memory_space<vmem>>, vector<8x32xf32>
    tpu.vector_store %arg9[%c0_38, %c0_39], %56 {strides = array<i32>} : memref<8x32xf32, #tpu.memory_space<vmem>>, vector<8x32xf32>,
    %c0_40 = arith.constant 0 : index
    %c0_41 = arith.constant 0 : index
    %84 = vector.load %arg10[%c0_40, %c0_41] : memref<8x32xf32, #tpu.memory_space<vmem>>, vector<8x32xf32>
    tpu.vector_store %arg10[%c0_40, %c0_41], %54 {strides = array<i32>} : memref<8x32xf32, #tpu.memory_space<vmem>>, vector<8x32xf32>,
    %c0_42 = arith.constant 0 : index
    %c0_43 = arith.constant 0 : index
    %85 = vector.load %arg11[%c0_42, %c0_43] : memref<8x32xf32, #tpu.memory_space<vmem>>, vector<8x32xf32>
    tpu.vector_store %arg11[%c0_42, %c0_43], %82 {strides = array<i32>} : memref<8x32xf32, #tpu.memory_space<vmem>>, vector<8x32xf32>,
    %c0_44 = arith.constant 0 : index
    %c0_45 = arith.constant 0 : index
    %86 = vector.load %arg12[%c0_44, %c0_45] : memref<8x32xf32, #tpu.memory_space<vmem>>, vector<8x32xf32>
    tpu.vector_store %arg12[%c0_44, %c0_45], %80 {strides = array<i32>} : memref<8x32xf32, #tpu.memory_space<vmem>>, vector<8x32xf32>,
    %87 = arith.index_cast %c0_i32 : i32 to index
    %c0_46 = arith.constant 0 : index
    %c0_47 = arith.constant 0 : index
    %88 = vector.load %arg6[%87, %c0_46, %c0_47] : memref<8x8x64xf32, #tpu.memory_space<vmem>>, vector<1x8x32xf32>
    %89 = vector.shape_cast %88 : vector<1x8x32xf32> to vector<8x32xf32>
    %90 = vector.shape_cast %56 : vector<8x32xf32> to vector<1x8x32xf32>
    tpu.vector_store %arg6[%87, %c0_46, %c0_47], %90 {strides = array<i32>} : memref<8x8x64xf32, #tpu.memory_space<vmem>>, vector<1x8x32xf32>,
    %c7_i32_48 = arith.constant 7 : i32
    %91 = arith.subi %c7_i32_48, %c0_i32 : i32
    %92 = arith.index_cast %91 : i32 to index
    %c0_49 = arith.constant 0 : index
    %c32 = arith.constant 32 : index
    %93 = vector.load %arg6[%92, %c0_49, %c32] : memref<8x8x64xf32, #tpu.memory_space<vmem>>, vector<1x8x32xf32>
    %94 = vector.shape_cast %93 : vector<1x8x32xf32> to vector<8x32xf32>
    %95 = vector.shape_cast %82 : vector<8x32xf32> to vector<1x8x32xf32>
    tpu.vector_store %arg6[%92, %c0_49, %c32], %95 {strides = array<i32>} : memref<8x8x64xf32, #tpu.memory_space<vmem>>, vector<1x8x32xf32>,
    %c1_i32 = arith.constant 1 : i32
    %96 = arith.index_cast %c1_i32 : i32 to index
    %c0_50 = arith.constant 0 : index
    %c0_51 = arith.constant 0 : index
    %97 = vector.load %arg1[%96, %c0_50, %c0_51] : memref<8x8x64xf32, #tpu.memory_space<vmem>>, vector<1x8x64xf32>
    %98 = vector.shape_cast %97 : vector<1x8x64xf32> to vector<8x64xf32>
    %c7_i32_52 = arith.constant 7 : i32
    %99 = arith.subi %c7_i32_52, %c1_i32 : i32
    %100 = arith.index_cast %99 : i32 to index
    %c0_53 = arith.constant 0 : index
    %c0_54 = arith.constant 0 : index
    %101 = vector.load %arg1[%100, %c0_53, %c0_54] : memref<8x8x64xf32, #tpu.memory_space<vmem>>, vector<1x8x64xf32>
    %102 = vector.shape_cast %101 : vector<1x8x64xf32> to vector<8x64xf32>
    %c0_55 = arith.constant 0 : index
    %c0_56 = arith.constant 0 : index
    %103 = vector.load %arg9[%c0_55, %c0_56] : memref<8x32xf32, #tpu.memory_space<vmem>>, vector<8x32xf32>
    %104 = tpu.concatenate %98, %103 in 1 : vector<8x64xf32>, vector<8x32xf32> -> vector<8x96xf32>
    %105 = arith.truncf %104 : vector<8x96xf32> to vector<8x96xbf16>
    %c0_57 = arith.constant 0 : index
    %c0_58 = arith.constant 0 : index
    %106 = vector.load %arg11[%c0_57, %c0_58] : memref<8x32xf32, #tpu.memory_space<vmem>>, vector<8x32xf32>
    %107 = tpu.concatenate %102, %106 in 1 : vector<8x64xf32>, vector<8x32xf32> -> vector<8x96xf32>
    %108 = arith.truncf %107 : vector<8x96xf32> to vector<8x96xbf16>
    %cst_59 = arith.constant dense<0.000000e+00> : vector<8x128xf32>
    %109 = tpu.matmul %105, %8, %cst_59 {dimension_numbers = #tpu.dot_dimension_numbers<[1], [0], [0], [1], [0, 0, 1, 1], [], []>} : vector<8x96xbf16>, vector<96x128xbf16>, vector<8x128xf32> -> vector<8x128xf32>
    %110 = vector.broadcast %10 : vector<1x128xf32> to vector<8x128xf32>
    %111 = arith.addf %109, %110 : vector<8x128xf32>
    %cst_60 = arith.constant dense<0.000000e+00> : vector<8x128xf32>
    %112 = tpu.matmul %108, %9, %cst_60 {dimension_numbers = #tpu.dot_dimension_numbers<[1], [0], [0], [1], [0, 0, 1, 1], [], []>} : vector<8x96xbf16>, vector<96x128xbf16>, vector<8x128xf32> -> vector<8x128xf32>
    %113 = vector.broadcast %11 : vector<1x128xf32> to vector<8x128xf32>
    %114 = arith.addf %112, %113 : vector<8x128xf32>
    %c0_61 = arith.constant 0 : index
    %c0_62 = arith.constant 0 : index
    %115 = vector.load %arg10[%c0_61, %c0_62] : memref<8x32xf32, #tpu.memory_space<vmem>>, vector<8x32xf32>
    %116 = vector.extract_strided_slice %111 {offsets = [0, 0], sizes = [8, 32], strides = [1, 1]} : vector<8x128xf32> to vector<8x32xf32>
    %117 = arith.negf %116 : vector<8x32xf32>
    %118 = math.exp %117 : vector<8x32xf32>
    %cst_63 = arith.constant 1.000000e+00 : f32
    %119 = vector.broadcast %cst_63 : f32 to vector<8x32xf32>
    %120 = arith.addf %119, %118 : vector<8x32xf32>
    %121 = arith.divf %119, %120 : vector<8x32xf32>
    %122 = vector.extract_strided_slice %111 {offsets = [0, 32], sizes = [8, 32], strides = [1, 1]} : vector<8x128xf32> to vector<8x32xf32>
    %123 = arith.negf %122 : vector<8x32xf32>
    %124 = math.exp %123 : vector<8x32xf32>
    %cst_64 = arith.constant 1.000000e+00 : f32
    %125 = vector.broadcast %cst_64 : f32 to vector<8x32xf32>
    %126 = arith.addf %125, %124 : vector<8x32xf32>
    %127 = arith.divf %125, %126 : vector<8x32xf32>
    %128 = vector.extract_strided_slice %111 {offsets = [0, 64], sizes = [8, 32], strides = [1, 1]} : vector<8x128xf32> to vector<8x32xf32>
    %129 = math.tanh %128 : vector<8x32xf32>
    %130 = vector.extract_strided_slice %111 {offsets = [0, 96], sizes = [8, 32], strides = [1, 1]} : vector<8x128xf32> to vector<8x32xf32>
    %131 = arith.negf %130 : vector<8x32xf32>
    %132 = math.exp %131 : vector<8x32xf32>
    %cst_65 = arith.constant 1.000000e+00 : f32
    %133 = vector.broadcast %cst_65 : f32 to vector<8x32xf32>
    %134 = arith.addf %133, %132 : vector<8x32xf32>
    %135 = arith.divf %133, %134 : vector<8x32xf32>
    %136 = arith.mulf %127, %115 : vector<8x32xf32>
    %137 = arith.mulf %121, %129 : vector<8x32xf32>
    %138 = arith.addf %136, %137 : vector<8x32xf32>
    %139 = math.tanh %138 : vector<8x32xf32>
    %140 = arith.mulf %135, %139 : vector<8x32xf32>
    %c0_66 = arith.constant 0 : index
    %c0_67 = arith.constant 0 : index
    %141 = vector.load %arg12[%c0_66, %c0_67] : memref<8x32xf32, #tpu.memory_space<vmem>>, vector<8x32xf32>
    %142 = vector.extract_strided_slice %114 {offsets = [0, 0], sizes = [8, 32], strides = [1, 1]} : vector<8x128xf32> to vector<8x32xf32>
    %143 = arith.negf %142 : vector<8x32xf32>
    %144 = math.exp %143 : vector<8x32xf32>
    %cst_68 = arith.constant 1.000000e+00 : f32
    %145 = vector.broadcast %cst_68 : f32 to vector<8x32xf32>
    %146 = arith.addf %145, %144 : vector<8x32xf32>
    %147 = arith.divf %145, %146 : vector<8x32xf32>
    %148 = vector.extract_strided_slice %114 {offsets = [0, 32], sizes = [8, 32], strides = [1, 1]} : vector<8x128xf32> to vector<8x32xf32>
    %149 = arith.negf %148 : vector<8x32xf32>
    %150 = math.exp %149 : vector<8x32xf32>
    %cst_69 = arith.constant 1.000000e+00 : f32
    %151 = vector.broadcast %cst_69 : f32 to vector<8x32xf32>
    %152 = arith.addf %151, %150 : vector<8x32xf32>
    %153 = arith.divf %151, %152 : vector<8x32xf32>
    %154 = vector.extract_strided_slice %114 {offsets = [0, 64], sizes = [8, 32], strides = [1, 1]} : vector<8x128xf32> to vector<8x32xf32>
    %155 = math.tanh %154 : vector<8x32xf32>
    %156 = vector.extract_strided_slice %114 {offsets = [0, 96], sizes = [8, 32], strides = [1, 1]} : vector<8x128xf32> to vector<8x32xf32>
    %157 = arith.negf %156 : vector<8x32xf32>
    %158 = math.exp %157 : vector<8x32xf32>
    %cst_70 = arith.constant 1.000000e+00 : f32
    %159 = vector.broadcast %cst_70 : f32 to vector<8x32xf32>
    %160 = arith.addf %159, %158 : vector<8x32xf32>
    %161 = arith.divf %159, %160 : vector<8x32xf32>
    %162 = arith.mulf %153, %141 : vector<8x32xf32>
    %163 = arith.mulf %147, %155 : vector<8x32xf32>
    %164 = arith.addf %162, %163 : vector<8x32xf32>
    %165 = math.tanh %164 : vector<8x32xf32>
    %166 = arith.mulf %161, %165 : vector<8x32xf32>
    %c0_71 = arith.constant 0 : index
    %c0_72 = arith.constant 0 : index
    %167 = vector.load %arg9[%c0_71, %c0_72] : memref<8x32xf32, #tpu.memory_space<vmem>>, vector<8x32xf32>
    tpu.vector_store %arg9[%c0_71, %c0_72], %140 {strides = array<i32>} : memref<8x32xf32, #tpu.memory_space<vmem>>, vector<8x32xf32>,
    %c0_73 = arith.constant 0 : index
    %c0_74 = arith.constant 0 : index
    %168 = vector.load %arg10[%c0_73, %c0_74] : memref<8x32xf32, #tpu.memory_space<vmem>>, vector<8x32xf32>
    tpu.vector_store %arg10[%c0_73, %c0_74], %138 {strides = array<i32>} : memref<8x32xf32, #tpu.memory_space<vmem>>, vector<8x32xf32>,
    %c0_75 = arith.constant 0 : index
    %c0_76 = arith.constant 0 : index
    %169 = vector.load %arg11[%c0_75, %c0_76] : memref<8x32xf32, #tpu.memory_space<vmem>>, vector<8x32xf32>
    tpu.vector_store %arg11[%c0_75, %c0_76], %166 {strides = array<i32>} : memref<8x32xf32, #tpu.memory_space<vmem>>, vector<8x32xf32>,
    %c0_77 = arith.constant 0 : index
    %c0_78 = arith.constant 0 : index
    %170 = vector.load %arg12[%c0_77, %c0_78] : memref<8x32xf32, #tpu.memory_space<vmem>>, vector<8x32xf32>
    tpu.vector_store %arg12[%c0_77, %c0_78], %164 {strides = array<i32>} : memref<8x32xf32, #tpu.memory_space<vmem>>, vector<8x32xf32>,
    %171 = arith.index_cast %c1_i32 : i32 to index
    %c0_79 = arith.constant 0 : index
    %c0_80 = arith.constant 0 : index
    %172 = vector.load %arg6[%171, %c0_79, %c0_80] : memref<8x8x64xf32, #tpu.memory_space<vmem>>, vector<1x8x32xf32>
    %173 = vector.shape_cast %172 : vector<1x8x32xf32> to vector<8x32xf32>
    %174 = vector.shape_cast %140 : vector<8x32xf32> to vector<1x8x32xf32>
    tpu.vector_store %arg6[%171, %c0_79, %c0_80], %174 {strides = array<i32>} : memref<8x8x64xf32, #tpu.memory_space<vmem>>, vector<1x8x32xf32>,
    %c7_i32_81 = arith.constant 7 : i32
    %175 = arith.subi %c7_i32_81, %c1_i32 : i32
    %176 = arith.index_cast %175 : i32 to index
    %c0_82 = arith.constant 0 : index
    %c32_83 = arith.constant 32 : index
    %177 = vector.load %arg6[%176, %c0_82, %c32_83] : memref<8x8x64xf32, #tpu.memory_space<vmem>>, vector<1x8x32xf32>
    %178 = vector.shape_cast %177 : vector<1x8x32xf32> to vector<8x32xf32>
    %179 = vector.shape_cast %166 : vector<8x32xf32> to vector<1x8x32xf32>
    tpu.vector_store %arg6[%176, %c0_82, %c32_83], %179 {strides = array<i32>} : memref<8x8x64xf32, #tpu.memory_space<vmem>>, vector<1x8x32xf32>,
    %c2_i32 = arith.constant 2 : i32
    %180 = arith.index_cast %c2_i32 : i32 to index
    %c0_84 = arith.constant 0 : index
    %c0_85 = arith.constant 0 : index
    %181 = vector.load %arg1[%180, %c0_84, %c0_85] : memref<8x8x64xf32, #tpu.memory_space<vmem>>, vector<1x8x64xf32>
    %182 = vector.shape_cast %181 : vector<1x8x64xf32> to vector<8x64xf32>
    %c7_i32_86 = arith.constant 7 : i32
    %183 = arith.subi %c7_i32_86, %c2_i32 : i32
    %184 = arith.index_cast %183 : i32 to index
    %c0_87 = arith.constant 0 : index
    %c0_88 = arith.constant 0 : index
    %185 = vector.load %arg1[%184, %c0_87, %c0_88] : memref<8x8x64xf32, #tpu.memory_space<vmem>>, vector<1x8x64xf32>
    %186 = vector.shape_cast %185 : vector<1x8x64xf32> to vector<8x64xf32>
    %c0_89 = arith.constant 0 : index
    %c0_90 = arith.constant 0 : index
    %187 = vector.load %arg9[%c0_89, %c0_90] : memref<8x32xf32, #tpu.memory_space<vmem>>, vector<8x32xf32>
    %188 = tpu.concatenate %182, %187 in 1 : vector<8x64xf32>, vector<8x32xf32> -> vector<8x96xf32>
    %189 = arith.truncf %188 : vector<8x96xf32> to vector<8x96xbf16>
    %c0_91 = arith.constant 0 : index
    %c0_92 = arith.constant 0 : index
    %190 = vector.load %arg11[%c0_91, %c0_92] : memref<8x32xf32, #tpu.memory_space<vmem>>, vector<8x32xf32>
    %191 = tpu.concatenate %186, %190 in 1 : vector<8x64xf32>, vector<8x32xf32> -> vector<8x96xf32>
    %192 = arith.truncf %191 : vector<8x96xf32> to vector<8x96xbf16>
    %cst_93 = arith.constant dense<0.000000e+00> : vector<8x128xf32>
    %193 = tpu.matmul %189, %8, %cst_93 {dimension_numbers = #tpu.dot_dimension_numbers<[1], [0], [0], [1], [0, 0, 1, 1], [], []>} : vector<8x96xbf16>, vector<96x128xbf16>, vector<8x128xf32> -> vector<8x128xf32>
    %194 = vector.broadcast %10 : vector<1x128xf32> to vector<8x128xf32>
    %195 = arith.addf %193, %194 : vector<8x128xf32>
    %cst_94 = arith.constant dense<0.000000e+00> : vector<8x128xf32>
    %196 = tpu.matmul %192, %9, %cst_94 {dimension_numbers = #tpu.dot_dimension_numbers<[1], [0], [0], [1], [0, 0, 1, 1], [], []>} : vector<8x96xbf16>, vector<96x128xbf16>, vector<8x128xf32> -> vector<8x128xf32>
    %197 = vector.broadcast %11 : vector<1x128xf32> to vector<8x128xf32>
    %198 = arith.addf %196, %197 : vector<8x128xf32>
    %c0_95 = arith.constant 0 : index
    %c0_96 = arith.constant 0 : index
    %199 = vector.load %arg10[%c0_95, %c0_96] : memref<8x32xf32, #tpu.memory_space<vmem>>, vector<8x32xf32>
    %200 = vector.extract_strided_slice %195 {offsets = [0, 0], sizes = [8, 32], strides = [1, 1]} : vector<8x128xf32> to vector<8x32xf32>
    %201 = arith.negf %200 : vector<8x32xf32>
    %202 = math.exp %201 : vector<8x32xf32>
    %cst_97 = arith.constant 1.000000e+00 : f32
    %203 = vector.broadcast %cst_97 : f32 to vector<8x32xf32>
    %204 = arith.addf %203, %202 : vector<8x32xf32>
    %205 = arith.divf %203, %204 : vector<8x32xf32>
    %206 = vector.extract_strided_slice %195 {offsets = [0, 32], sizes = [8, 32], strides = [1, 1]} : vector<8x128xf32> to vector<8x32xf32>
    %207 = arith.negf %206 : vector<8x32xf32>
    %208 = math.exp %207 : vector<8x32xf32>
    %cst_98 = arith.constant 1.000000e+00 : f32
    %209 = vector.broadcast %cst_98 : f32 to vector<8x32xf32>
    %210 = arith.addf %209, %208 : vector<8x32xf32>
    %211 = arith.divf %209, %210 : vector<8x32xf32>
    %212 = vector.extract_strided_slice %195 {offsets = [0, 64], sizes = [8, 32], strides = [1, 1]} : vector<8x128xf32> to vector<8x32xf32>
    %213 = math.tanh %212 : vector<8x32xf32>
    %214 = vector.extract_strided_slice %195 {offsets = [0, 96], sizes = [8, 32], strides = [1, 1]} : vector<8x128xf32> to vector<8x32xf32>
    %215 = arith.negf %214 : vector<8x32xf32>
    %216 = math.exp %215 : vector<8x32xf32>
    %cst_99 = arith.constant 1.000000e+00 : f32
    %217 = vector.broadcast %cst_99 : f32 to vector<8x32xf32>
    %218 = arith.addf %217, %216 : vector<8x32xf32>
    %219 = arith.divf %217, %218 : vector<8x32xf32>
    %220 = arith.mulf %211, %199 : vector<8x32xf32>
    %221 = arith.mulf %205, %213 : vector<8x32xf32>
    %222 = arith.addf %220, %221 : vector<8x32xf32>
    %223 = math.tanh %222 : vector<8x32xf32>
    %224 = arith.mulf %219, %223 : vector<8x32xf32>
    %c0_100 = arith.constant 0 : index
    %c0_101 = arith.constant 0 : index
    %225 = vector.load %arg12[%c0_100, %c0_101] : memref<8x32xf32, #tpu.memory_space<vmem>>, vector<8x32xf32>
    %226 = vector.extract_strided_slice %198 {offsets = [0, 0], sizes = [8, 32], strides = [1, 1]} : vector<8x128xf32> to vector<8x32xf32>
    %227 = arith.negf %226 : vector<8x32xf32>
    %228 = math.exp %227 : vector<8x32xf32>
    %cst_102 = arith.constant 1.000000e+00 : f32
    %229 = vector.broadcast %cst_102 : f32 to vector<8x32xf32>
    %230 = arith.addf %229, %228 : vector<8x32xf32>
    %231 = arith.divf %229, %230 : vector<8x32xf32>
    %232 = vector.extract_strided_slice %198 {offsets = [0, 32], sizes = [8, 32], strides = [1, 1]} : vector<8x128xf32> to vector<8x32xf32>
    %233 = arith.negf %232 : vector<8x32xf32>
    %234 = math.exp %233 : vector<8x32xf32>
    %cst_103 = arith.constant 1.000000e+00 : f32
    %235 = vector.broadcast %cst_103 : f32 to vector<8x32xf32>
    %236 = arith.addf %235, %234 : vector<8x32xf32>
    %237 = arith.divf %235, %236 : vector<8x32xf32>
    %238 = vector.extract_strided_slice %198 {offsets = [0, 64], sizes = [8, 32], strides = [1, 1]} : vector<8x128xf32> to vector<8x32xf32>
    %239 = math.tanh %238 : vector<8x32xf32>
    %240 = vector.extract_strided_slice %198 {offsets = [0, 96], sizes = [8, 32], strides = [1, 1]} : vector<8x128xf32> to vector<8x32xf32>
    %241 = arith.negf %240 : vector<8x32xf32>
    %242 = math.exp %241 : vector<8x32xf32>
    %cst_104 = arith.constant 1.000000e+00 : f32
    %243 = vector.broadcast %cst_104 : f32 to vector<8x32xf32>
    %244 = arith.addf %243, %242 : vector<8x32xf32>
    %245 = arith.divf %243, %244 : vector<8x32xf32>
    %246 = arith.mulf %237, %225 : vector<8x32xf32>
    %247 = arith.mulf %231, %239 : vector<8x32xf32>
    %248 = arith.addf %246, %247 : vector<8x32xf32>
    %249 = math.tanh %248 : vector<8x32xf32>
    %250 = arith.mulf %245, %249 : vector<8x32xf32>
    %c0_105 = arith.constant 0 : index
    %c0_106 = arith.constant 0 : index
    %251 = vector.load %arg9[%c0_105, %c0_106] : memref<8x32xf32, #tpu.memory_space<vmem>>, vector<8x32xf32>
    tpu.vector_store %arg9[%c0_105, %c0_106], %224 {strides = array<i32>} : memref<8x32xf32, #tpu.memory_space<vmem>>, vector<8x32xf32>,
    %c0_107 = arith.constant 0 : index
    %c0_108 = arith.constant 0 : index
    %252 = vector.load %arg10[%c0_107, %c0_108] : memref<8x32xf32, #tpu.memory_space<vmem>>, vector<8x32xf32>
    tpu.vector_store %arg10[%c0_107, %c0_108], %222 {strides = array<i32>} : memref<8x32xf32, #tpu.memory_space<vmem>>, vector<8x32xf32>,
    %c0_109 = arith.constant 0 : index
    %c0_110 = arith.constant 0 : index
    %253 = vector.load %arg11[%c0_109, %c0_110] : memref<8x32xf32, #tpu.memory_space<vmem>>, vector<8x32xf32>
    tpu.vector_store %arg11[%c0_109, %c0_110], %250 {strides = array<i32>} : memref<8x32xf32, #tpu.memory_space<vmem>>, vector<8x32xf32>,
    %c0_111 = arith.constant 0 : index
    %c0_112 = arith.constant 0 : index
    %254 = vector.load %arg12[%c0_111, %c0_112] : memref<8x32xf32, #tpu.memory_space<vmem>>, vector<8x32xf32>
    tpu.vector_store %arg12[%c0_111, %c0_112], %248 {strides = array<i32>} : memref<8x32xf32, #tpu.memory_space<vmem>>, vector<8x32xf32>,
    %255 = arith.index_cast %c2_i32 : i32 to index
    %c0_113 = arith.constant 0 : index
    %c0_114 = arith.constant 0 : index
    %256 = vector.load %arg6[%255, %c0_113, %c0_114] : memref<8x8x64xf32, #tpu.memory_space<vmem>>, vector<1x8x32xf32>
    %257 = vector.shape_cast %256 : vector<1x8x32xf32> to vector<8x32xf32>
    %258 = vector.shape_cast %224 : vector<8x32xf32> to vector<1x8x32xf32>
    tpu.vector_store %arg6[%255, %c0_113, %c0_114], %258 {strides = array<i32>} : memref<8x8x64xf32, #tpu.memory_space<vmem>>, vector<1x8x32xf32>,
    %c7_i32_115 = arith.constant 7 : i32
    %259 = arith.subi %c7_i32_115, %c2_i32 : i32
    %260 = arith.index_cast %259 : i32 to index
    %c0_116 = arith.constant 0 : index
    %c32_117 = arith.constant 32 : index
    %261 = vector.load %arg6[%260, %c0_116, %c32_117] : memref<8x8x64xf32, #tpu.memory_space<vmem>>, vector<1x8x32xf32>
    %262 = vector.shape_cast %261 : vector<1x8x32xf32> to vector<8x32xf32>
    %263 = vector.shape_cast %250 : vector<8x32xf32> to vector<1x8x32xf32>
    tpu.vector_store %arg6[%260, %c0_116, %c32_117], %263 {strides = array<i32>} : memref<8x8x64xf32, #tpu.memory_space<vmem>>, vector<1x8x32xf32>,
    %c3_i32 = arith.constant 3 : i32
    %264 = arith.index_cast %c3_i32 : i32 to index
    %c0_118 = arith.constant 0 : index
    %c0_119 = arith.constant 0 : index
    %265 = vector.load %arg1[%264, %c0_118, %c0_119] : memref<8x8x64xf32, #tpu.memory_space<vmem>>, vector<1x8x64xf32>
    %266 = vector.shape_cast %265 : vector<1x8x64xf32> to vector<8x64xf32>
    %c7_i32_120 = arith.constant 7 : i32
    %267 = arith.subi %c7_i32_120, %c3_i32 : i32
    %268 = arith.index_cast %267 : i32 to index
    %c0_121 = arith.constant 0 : index
    %c0_122 = arith.constant 0 : index
    %269 = vector.load %arg1[%268, %c0_121, %c0_122] : memref<8x8x64xf32, #tpu.memory_space<vmem>>, vector<1x8x64xf32>
    %270 = vector.shape_cast %269 : vector<1x8x64xf32> to vector<8x64xf32>
    %c0_123 = arith.constant 0 : index
    %c0_124 = arith.constant 0 : index
    %271 = vector.load %arg9[%c0_123, %c0_124] : memref<8x32xf32, #tpu.memory_space<vmem>>, vector<8x32xf32>
    %272 = tpu.concatenate %266, %271 in 1 : vector<8x64xf32>, vector<8x32xf32> -> vector<8x96xf32>
    %273 = arith.truncf %272 : vector<8x96xf32> to vector<8x96xbf16>
    %c0_125 = arith.constant 0 : index
    %c0_126 = arith.constant 0 : index
    %274 = vector.load %arg11[%c0_125, %c0_126] : memref<8x32xf32, #tpu.memory_space<vmem>>, vector<8x32xf32>
    %275 = tpu.concatenate %270, %274 in 1 : vector<8x64xf32>, vector<8x32xf32> -> vector<8x96xf32>
    %276 = arith.truncf %275 : vector<8x96xf32> to vector<8x96xbf16>
    %cst_127 = arith.constant dense<0.000000e+00> : vector<8x128xf32>
    %277 = tpu.matmul %273, %8, %cst_127 {dimension_numbers = #tpu.dot_dimension_numbers<[1], [0], [0], [1], [0, 0, 1, 1], [], []>} : vector<8x96xbf16>, vector<96x128xbf16>, vector<8x128xf32> -> vector<8x128xf32>
    %278 = vector.broadcast %10 : vector<1x128xf32> to vector<8x128xf32>
    %279 = arith.addf %277, %278 : vector<8x128xf32>
    %cst_128 = arith.constant dense<0.000000e+00> : vector<8x128xf32>
    %280 = tpu.matmul %276, %9, %cst_128 {dimension_numbers = #tpu.dot_dimension_numbers<[1], [0], [0], [1], [0, 0, 1, 1], [], []>} : vector<8x96xbf16>, vector<96x128xbf16>, vector<8x128xf32> -> vector<8x128xf32>
    %281 = vector.broadcast %11 : vector<1x128xf32> to vector<8x128xf32>
    %282 = arith.addf %280, %281 : vector<8x128xf32>
    %c0_129 = arith.constant 0 : index
    %c0_130 = arith.constant 0 : index
    %283 = vector.load %arg10[%c0_129, %c0_130] : memref<8x32xf32, #tpu.memory_space<vmem>>, vector<8x32xf32>
    %284 = vector.extract_strided_slice %279 {offsets = [0, 0], sizes = [8, 32], strides = [1, 1]} : vector<8x128xf32> to vector<8x32xf32>
    %285 = arith.negf %284 : vector<8x32xf32>
    %286 = math.exp %285 : vector<8x32xf32>
    %cst_131 = arith.constant 1.000000e+00 : f32
    %287 = vector.broadcast %cst_131 : f32 to vector<8x32xf32>
    %288 = arith.addf %287, %286 : vector<8x32xf32>
    %289 = arith.divf %287, %288 : vector<8x32xf32>
    %290 = vector.extract_strided_slice %279 {offsets = [0, 32], sizes = [8, 32], strides = [1, 1]} : vector<8x128xf32> to vector<8x32xf32>
    %291 = arith.negf %290 : vector<8x32xf32>
    %292 = math.exp %291 : vector<8x32xf32>
    %cst_132 = arith.constant 1.000000e+00 : f32
    %293 = vector.broadcast %cst_132 : f32 to vector<8x32xf32>
    %294 = arith.addf %293, %292 : vector<8x32xf32>
    %295 = arith.divf %293, %294 : vector<8x32xf32>
    %296 = vector.extract_strided_slice %279 {offsets = [0, 64], sizes = [8, 32], strides = [1, 1]} : vector<8x128xf32> to vector<8x32xf32>
    %297 = math.tanh %296 : vector<8x32xf32>
    %298 = vector.extract_strided_slice %279 {offsets = [0, 96], sizes = [8, 32], strides = [1, 1]} : vector<8x128xf32> to vector<8x32xf32>
    %299 = arith.negf %298 : vector<8x32xf32>
    %300 = math.exp %299 : vector<8x32xf32>
    %cst_133 = arith.constant 1.000000e+00 : f32
    %301 = vector.broadcast %cst_133 : f32 to vector<8x32xf32>
    %302 = arith.addf %301, %300 : vector<8x32xf32>
    %303 = arith.divf %301, %302 : vector<8x32xf32>
    %304 = arith.mulf %295, %283 : vector<8x32xf32>
    %305 = arith.mulf %289, %297 : vector<8x32xf32>
    %306 = arith.addf %304, %305 : vector<8x32xf32>
    %307 = math.tanh %306 : vector<8x32xf32>
    %308 = arith.mulf %303, %307 : vector<8x32xf32>
    %c0_134 = arith.constant 0 : index
    %c0_135 = arith.constant 0 : index
    %309 = vector.load %arg12[%c0_134, %c0_135] : memref<8x32xf32, #tpu.memory_space<vmem>>, vector<8x32xf32>
    %310 = vector.extract_strided_slice %282 {offsets = [0, 0], sizes = [8, 32], strides = [1, 1]} : vector<8x128xf32> to vector<8x32xf32>
    %311 = arith.negf %310 : vector<8x32xf32>
    %312 = math.exp %311 : vector<8x32xf32>
    %cst_136 = arith.constant 1.000000e+00 : f32
    %313 = vector.broadcast %cst_136 : f32 to vector<8x32xf32>
    %314 = arith.addf %313, %312 : vector<8x32xf32>
    %315 = arith.divf %313, %314 : vector<8x32xf32>
    %316 = vector.extract_strided_slice %282 {offsets = [0, 32], sizes = [8, 32], strides = [1, 1]} : vector<8x128xf32> to vector<8x32xf32>
    %317 = arith.negf %316 : vector<8x32xf32>
    %318 = math.exp %317 : vector<8x32xf32>
    %cst_137 = arith.constant 1.000000e+00 : f32
    %319 = vector.broadcast %cst_137 : f32 to vector<8x32xf32>
    %320 = arith.addf %319, %318 : vector<8x32xf32>
    %321 = arith.divf %319, %320 : vector<8x32xf32>
    %322 = vector.extract_strided_slice %282 {offsets = [0, 64], sizes = [8, 32], strides = [1, 1]} : vector<8x128xf32> to vector<8x32xf32>
    %323 = math.tanh %322 : vector<8x32xf32>
    %324 = vector.extract_strided_slice %282 {offsets = [0, 96], sizes = [8, 32], strides = [1, 1]} : vector<8x128xf32> to vector<8x32xf32>
    %325 = arith.negf %324 : vector<8x32xf32>
    %326 = math.exp %325 : vector<8x32xf32>
    %cst_138 = arith.constant 1.000000e+00 : f32
    %327 = vector.broadcast %cst_138 : f32 to vector<8x32xf32>
    %328 = arith.addf %327, %326 : vector<8x32xf32>
    %329 = arith.divf %327, %328 : vector<8x32xf32>
    %330 = arith.mulf %321, %309 : vector<8x32xf32>
    %331 = arith.mulf %315, %323 : vector<8x32xf32>
    %332 = arith.addf %330, %331 : vector<8x32xf32>
    %333 = math.tanh %332 : vector<8x32xf32>
    %334 = arith.mulf %329, %333 : vector<8x32xf32>
    %c0_139 = arith.constant 0 : index
    %c0_140 = arith.constant 0 : index
    %335 = vector.load %arg9[%c0_139, %c0_140] : memref<8x32xf32, #tpu.memory_space<vmem>>, vector<8x32xf32>
    tpu.vector_store %arg9[%c0_139, %c0_140], %308 {strides = array<i32>} : memref<8x32xf32, #tpu.memory_space<vmem>>, vector<8x32xf32>,
    %c0_141 = arith.constant 0 : index
    %c0_142 = arith.constant 0 : index
    %336 = vector.load %arg10[%c0_141, %c0_142] : memref<8x32xf32, #tpu.memory_space<vmem>>, vector<8x32xf32>
    tpu.vector_store %arg10[%c0_141, %c0_142], %306 {strides = array<i32>} : memref<8x32xf32, #tpu.memory_space<vmem>>, vector<8x32xf32>,
    %c0_143 = arith.constant 0 : index
    %c0_144 = arith.constant 0 : index
    %337 = vector.load %arg11[%c0_143, %c0_144] : memref<8x32xf32, #tpu.memory_space<vmem>>, vector<8x32xf32>
    tpu.vector_store %arg11[%c0_143, %c0_144], %334 {strides = array<i32>} : memref<8x32xf32, #tpu.memory_space<vmem>>, vector<8x32xf32>,
    %c0_145 = arith.constant 0 : index
    %c0_146 = arith.constant 0 : index
    %338 = vector.load %arg12[%c0_145, %c0_146] : memref<8x32xf32, #tpu.memory_space<vmem>>, vector<8x32xf32>
    tpu.vector_store %arg12[%c0_145, %c0_146], %332 {strides = array<i32>} : memref<8x32xf32, #tpu.memory_space<vmem>>, vector<8x32xf32>,
    %339 = arith.index_cast %c3_i32 : i32 to index
    %c0_147 = arith.constant 0 : index
    %c0_148 = arith.constant 0 : index
    %340 = vector.load %arg6[%339, %c0_147, %c0_148] : memref<8x8x64xf32, #tpu.memory_space<vmem>>, vector<1x8x32xf32>
    %341 = vector.shape_cast %340 : vector<1x8x32xf32> to vector<8x32xf32>
    %342 = vector.shape_cast %308 : vector<8x32xf32> to vector<1x8x32xf32>
    tpu.vector_store %arg6[%339, %c0_147, %c0_148], %342 {strides = array<i32>} : memref<8x8x64xf32, #tpu.memory_space<vmem>>, vector<1x8x32xf32>,
    %c7_i32_149 = arith.constant 7 : i32
    %343 = arith.subi %c7_i32_149, %c3_i32 : i32
    %344 = arith.index_cast %343 : i32 to index
    %c0_150 = arith.constant 0 : index
    %c32_151 = arith.constant 32 : index
    %345 = vector.load %arg6[%344, %c0_150, %c32_151] : memref<8x8x64xf32, #tpu.memory_space<vmem>>, vector<1x8x32xf32>
    %346 = vector.shape_cast %345 : vector<1x8x32xf32> to vector<8x32xf32>
    %347 = vector.shape_cast %334 : vector<8x32xf32> to vector<1x8x32xf32>
    tpu.vector_store %arg6[%344, %c0_150, %c32_151], %347 {strides = array<i32>} : memref<8x8x64xf32, #tpu.memory_space<vmem>>, vector<1x8x32xf32>,
    %c4_i32 = arith.constant 4 : i32
    %348 = arith.index_cast %c4_i32 : i32 to index
    %c0_152 = arith.constant 0 : index
    %c0_153 = arith.constant 0 : index
    %349 = vector.load %arg1[%348, %c0_152, %c0_153] : memref<8x8x64xf32, #tpu.memory_space<vmem>>, vector<1x8x64xf32>
    %350 = vector.shape_cast %349 : vector<1x8x64xf32> to vector<8x64xf32>
    %c7_i32_154 = arith.constant 7 : i32
    %351 = arith.subi %c7_i32_154, %c4_i32 : i32
    %352 = arith.index_cast %351 : i32 to index
    %c0_155 = arith.constant 0 : index
    %c0_156 = arith.constant 0 : index
    %353 = vector.load %arg1[%352, %c0_155, %c0_156] : memref<8x8x64xf32, #tpu.memory_space<vmem>>, vector<1x8x64xf32>
    %354 = vector.shape_cast %353 : vector<1x8x64xf32> to vector<8x64xf32>
    %c0_157 = arith.constant 0 : index
    %c0_158 = arith.constant 0 : index
    %355 = vector.load %arg9[%c0_157, %c0_158] : memref<8x32xf32, #tpu.memory_space<vmem>>, vector<8x32xf32>
    %356 = tpu.concatenate %350, %355 in 1 : vector<8x64xf32>, vector<8x32xf32> -> vector<8x96xf32>
    %357 = arith.truncf %356 : vector<8x96xf32> to vector<8x96xbf16>
    %c0_159 = arith.constant 0 : index
    %c0_160 = arith.constant 0 : index
    %358 = vector.load %arg11[%c0_159, %c0_160] : memref<8x32xf32, #tpu.memory_space<vmem>>, vector<8x32xf32>
    %359 = tpu.concatenate %354, %358 in 1 : vector<8x64xf32>, vector<8x32xf32> -> vector<8x96xf32>
    %360 = arith.truncf %359 : vector<8x96xf32> to vector<8x96xbf16>
    %cst_161 = arith.constant dense<0.000000e+00> : vector<8x128xf32>
    %361 = tpu.matmul %357, %8, %cst_161 {dimension_numbers = #tpu.dot_dimension_numbers<[1], [0], [0], [1], [0, 0, 1, 1], [], []>} : vector<8x96xbf16>, vector<96x128xbf16>, vector<8x128xf32> -> vector<8x128xf32>
    %362 = vector.broadcast %10 : vector<1x128xf32> to vector<8x128xf32>
    %363 = arith.addf %361, %362 : vector<8x128xf32>
    %cst_162 = arith.constant dense<0.000000e+00> : vector<8x128xf32>
    %364 = tpu.matmul %360, %9, %cst_162 {dimension_numbers = #tpu.dot_dimension_numbers<[1], [0], [0], [1], [0, 0, 1, 1], [], []>} : vector<8x96xbf16>, vector<96x128xbf16>, vector<8x128xf32> -> vector<8x128xf32>
    %365 = vector.broadcast %11 : vector<1x128xf32> to vector<8x128xf32>
    %366 = arith.addf %364, %365 : vector<8x128xf32>
    %c0_163 = arith.constant 0 : index
    %c0_164 = arith.constant 0 : index
    %367 = vector.load %arg10[%c0_163, %c0_164] : memref<8x32xf32, #tpu.memory_space<vmem>>, vector<8x32xf32>
    %368 = vector.extract_strided_slice %363 {offsets = [0, 0], sizes = [8, 32], strides = [1, 1]} : vector<8x128xf32> to vector<8x32xf32>
    %369 = arith.negf %368 : vector<8x32xf32>
    %370 = math.exp %369 : vector<8x32xf32>
    %cst_165 = arith.constant 1.000000e+00 : f32
    %371 = vector.broadcast %cst_165 : f32 to vector<8x32xf32>
    %372 = arith.addf %371, %370 : vector<8x32xf32>
    %373 = arith.divf %371, %372 : vector<8x32xf32>
    %374 = vector.extract_strided_slice %363 {offsets = [0, 32], sizes = [8, 32], strides = [1, 1]} : vector<8x128xf32> to vector<8x32xf32>
    %375 = arith.negf %374 : vector<8x32xf32>
    %376 = math.exp %375 : vector<8x32xf32>
    %cst_166 = arith.constant 1.000000e+00 : f32
    %377 = vector.broadcast %cst_166 : f32 to vector<8x32xf32>
    %378 = arith.addf %377, %376 : vector<8x32xf32>
    %379 = arith.divf %377, %378 : vector<8x32xf32>
    %380 = vector.extract_strided_slice %363 {offsets = [0, 64], sizes = [8, 32], strides = [1, 1]} : vector<8x128xf32> to vector<8x32xf32>
    %381 = math.tanh %380 : vector<8x32xf32>
    %382 = vector.extract_strided_slice %363 {offsets = [0, 96], sizes = [8, 32], strides = [1, 1]} : vector<8x128xf32> to vector<8x32xf32>
    %383 = arith.negf %382 : vector<8x32xf32>
    %384 = math.exp %383 : vector<8x32xf32>
    %cst_167 = arith.constant 1.000000e+00 : f32
    %385 = vector.broadcast %cst_167 : f32 to vector<8x32xf32>
    %386 = arith.addf %385, %384 : vector<8x32xf32>
    %387 = arith.divf %385, %386 : vector<8x32xf32>
    %388 = arith.mulf %379, %367 : vector<8x32xf32>
    %389 = arith.mulf %373, %381 : vector<8x32xf32>
    %390 = arith.addf %388, %389 : vector<8x32xf32>
    %391 = math.tanh %390 : vector<8x32xf32>
    %392 = arith.mulf %387, %391 : vector<8x32xf32>
    %c0_168 = arith.constant 0 : index
    %c0_169 = arith.constant 0 : index
    %393 = vector.load %arg12[%c0_168, %c0_169] : memref<8x32xf32, #tpu.memory_space<vmem>>, vector<8x32xf32>
    %394 = vector.extract_strided_slice %366 {offsets = [0, 0], sizes = [8, 32], strides = [1, 1]} : vector<8x128xf32> to vector<8x32xf32>
    %395 = arith.negf %394 : vector<8x32xf32>
    %396 = math.exp %395 : vector<8x32xf32>
    %cst_170 = arith.constant 1.000000e+00 : f32
    %397 = vector.broadcast %cst_170 : f32 to vector<8x32xf32>
    %398 = arith.addf %397, %396 : vector<8x32xf32>
    %399 = arith.divf %397, %398 : vector<8x32xf32>
    %400 = vector.extract_strided_slice %366 {offsets = [0, 32], sizes = [8, 32], strides = [1, 1]} : vector<8x128xf32> to vector<8x32xf32>
    %401 = arith.negf %400 : vector<8x32xf32>
    %402 = math.exp %401 : vector<8x32xf32>
    %cst_171 = arith.constant 1.000000e+00 : f32
    %403 = vector.broadcast %cst_171 : f32 to vector<8x32xf32>
    %404 = arith.addf %403, %402 : vector<8x32xf32>
    %405 = arith.divf %403, %404 : vector<8x32xf32>
    %406 = vector.extract_strided_slice %366 {offsets = [0, 64], sizes = [8, 32], strides = [1, 1]} : vector<8x128xf32> to vector<8x32xf32>
    %407 = math.tanh %406 : vector<8x32xf32>
    %408 = vector.extract_strided_slice %366 {offsets = [0, 96], sizes = [8, 32], strides = [1, 1]} : vector<8x128xf32> to vector<8x32xf32>
    %409 = arith.negf %408 : vector<8x32xf32>
    %410 = math.exp %409 : vector<8x32xf32>
    %cst_172 = arith.constant 1.000000e+00 : f32
    %411 = vector.broadcast %cst_172 : f32 to vector<8x32xf32>
    %412 = arith.addf %411, %410 : vector<8x32xf32>
    %413 = arith.divf %411, %412 : vector<8x32xf32>
    %414 = arith.mulf %405, %393 : vector<8x32xf32>
    %415 = arith.mulf %399, %407 : vector<8x32xf32>
    %416 = arith.addf %414, %415 : vector<8x32xf32>
    %417 = math.tanh %416 : vector<8x32xf32>
    %418 = arith.mulf %413, %417 : vector<8x32xf32>
    %c0_173 = arith.constant 0 : index
    %c0_174 = arith.constant 0 : index
    %419 = vector.load %arg9[%c0_173, %c0_174] : memref<8x32xf32, #tpu.memory_space<vmem>>, vector<8x32xf32>
    tpu.vector_store %arg9[%c0_173, %c0_174], %392 {strides = array<i32>} : memref<8x32xf32, #tpu.memory_space<vmem>>, vector<8x32xf32>,
    %c0_175 = arith.constant 0 : index
    %c0_176 = arith.constant 0 : index
    %420 = vector.load %arg10[%c0_175, %c0_176] : memref<8x32xf32, #tpu.memory_space<vmem>>, vector<8x32xf32>
    tpu.vector_store %arg10[%c0_175, %c0_176], %390 {strides = array<i32>} : memref<8x32xf32, #tpu.memory_space<vmem>>, vector<8x32xf32>,
    %c0_177 = arith.constant 0 : index
    %c0_178 = arith.constant 0 : index
    %421 = vector.load %arg11[%c0_177, %c0_178] : memref<8x32xf32, #tpu.memory_space<vmem>>, vector<8x32xf32>
    tpu.vector_store %arg11[%c0_177, %c0_178], %418 {strides = array<i32>} : memref<8x32xf32, #tpu.memory_space<vmem>>, vector<8x32xf32>,
    %c0_179 = arith.constant 0 : index
    %c0_180 = arith.constant 0 : index
    %422 = vector.load %arg12[%c0_179, %c0_180] : memref<8x32xf32, #tpu.memory_space<vmem>>, vector<8x32xf32>
    tpu.vector_store %arg12[%c0_179, %c0_180], %416 {strides = array<i32>} : memref<8x32xf32, #tpu.memory_space<vmem>>, vector<8x32xf32>,
    %423 = arith.index_cast %c4_i32 : i32 to index
    %c0_181 = arith.constant 0 : index
    %c0_182 = arith.constant 0 : index
    %424 = vector.load %arg6[%423, %c0_181, %c0_182] : memref<8x8x64xf32, #tpu.memory_space<vmem>>, vector<1x8x32xf32>
    %425 = vector.shape_cast %424 : vector<1x8x32xf32> to vector<8x32xf32>
    %426 = vector.shape_cast %392 : vector<8x32xf32> to vector<1x8x32xf32>
    tpu.vector_store %arg6[%423, %c0_181, %c0_182], %426 {strides = array<i32>} : memref<8x8x64xf32, #tpu.memory_space<vmem>>, vector<1x8x32xf32>,
    %c7_i32_183 = arith.constant 7 : i32
    %427 = arith.subi %c7_i32_183, %c4_i32 : i32
    %428 = arith.index_cast %427 : i32 to index
    %c0_184 = arith.constant 0 : index
    %c32_185 = arith.constant 32 : index
    %429 = vector.load %arg6[%428, %c0_184, %c32_185] : memref<8x8x64xf32, #tpu.memory_space<vmem>>, vector<1x8x32xf32>
    %430 = vector.shape_cast %429 : vector<1x8x32xf32> to vector<8x32xf32>
    %431 = vector.shape_cast %418 : vector<8x32xf32> to vector<1x8x32xf32>
    tpu.vector_store %arg6[%428, %c0_184, %c32_185], %431 {strides = array<i32>} : memref<8x8x64xf32, #tpu.memory_space<vmem>>, vector<1x8x32xf32>,
    %c5_i32 = arith.constant 5 : i32
    %432 = arith.index_cast %c5_i32 : i32 to index
    %c0_186 = arith.constant 0 : index
    %c0_187 = arith.constant 0 : index
    %433 = vector.load %arg1[%432, %c0_186, %c0_187] : memref<8x8x64xf32, #tpu.memory_space<vmem>>, vector<1x8x64xf32>
    %434 = vector.shape_cast %433 : vector<1x8x64xf32> to vector<8x64xf32>
    %c7_i32_188 = arith.constant 7 : i32
    %435 = arith.subi %c7_i32_188, %c5_i32 : i32
    %436 = arith.index_cast %435 : i32 to index
    %c0_189 = arith.constant 0 : index
    %c0_190 = arith.constant 0 : index
    %437 = vector.load %arg1[%436, %c0_189, %c0_190] : memref<8x8x64xf32, #tpu.memory_space<vmem>>, vector<1x8x64xf32>
    %438 = vector.shape_cast %437 : vector<1x8x64xf32> to vector<8x64xf32>
    %c0_191 = arith.constant 0 : index
    %c0_192 = arith.constant 0 : index
    %439 = vector.load %arg9[%c0_191, %c0_192] : memref<8x32xf32, #tpu.memory_space<vmem>>, vector<8x32xf32>
    %440 = tpu.concatenate %434, %439 in 1 : vector<8x64xf32>, vector<8x32xf32> -> vector<8x96xf32>
    %441 = arith.truncf %440 : vector<8x96xf32> to vector<8x96xbf16>
    %c0_193 = arith.constant 0 : index
    %c0_194 = arith.constant 0 : index
    %442 = vector.load %arg11[%c0_193, %c0_194] : memref<8x32xf32, #tpu.memory_space<vmem>>, vector<8x32xf32>
    %443 = tpu.concatenate %438, %442 in 1 : vector<8x64xf32>, vector<8x32xf32> -> vector<8x96xf32>
    %444 = arith.truncf %443 : vector<8x96xf32> to vector<8x96xbf16>
    %cst_195 = arith.constant dense<0.000000e+00> : vector<8x128xf32>
    %445 = tpu.matmul %441, %8, %cst_195 {dimension_numbers = #tpu.dot_dimension_numbers<[1], [0], [0], [1], [0, 0, 1, 1], [], []>} : vector<8x96xbf16>, vector<96x128xbf16>, vector<8x128xf32> -> vector<8x128xf32>
    %446 = vector.broadcast %10 : vector<1x128xf32> to vector<8x128xf32>
    %447 = arith.addf %445, %446 : vector<8x128xf32>
    %cst_196 = arith.constant dense<0.000000e+00> : vector<8x128xf32>
    %448 = tpu.matmul %444, %9, %cst_196 {dimension_numbers = #tpu.dot_dimension_numbers<[1], [0], [0], [1], [0, 0, 1, 1], [], []>} : vector<8x96xbf16>, vector<96x128xbf16>, vector<8x128xf32> -> vector<8x128xf32>
    %449 = vector.broadcast %11 : vector<1x128xf32> to vector<8x128xf32>
    %450 = arith.addf %448, %449 : vector<8x128xf32>
    %c0_197 = arith.constant 0 : index
    %c0_198 = arith.constant 0 : index
    %451 = vector.load %arg10[%c0_197, %c0_198] : memref<8x32xf32, #tpu.memory_space<vmem>>, vector<8x32xf32>
    %452 = vector.extract_strided_slice %447 {offsets = [0, 0], sizes = [8, 32], strides = [1, 1]} : vector<8x128xf32> to vector<8x32xf32>
    %453 = arith.negf %452 : vector<8x32xf32>
    %454 = math.exp %453 : vector<8x32xf32>
    %cst_199 = arith.constant 1.000000e+00 : f32
    %455 = vector.broadcast %cst_199 : f32 to vector<8x32xf32>
    %456 = arith.addf %455, %454 : vector<8x32xf32>
    %457 = arith.divf %455, %456 : vector<8x32xf32>
    %458 = vector.extract_strided_slice %447 {offsets = [0, 32], sizes = [8, 32], strides = [1, 1]} : vector<8x128xf32> to vector<8x32xf32>
    %459 = arith.negf %458 : vector<8x32xf32>
    %460 = math.exp %459 : vector<8x32xf32>
    %cst_200 = arith.constant 1.000000e+00 : f32
    %461 = vector.broadcast %cst_200 : f32 to vector<8x32xf32>
    %462 = arith.addf %461, %460 : vector<8x32xf32>
    %463 = arith.divf %461, %462 : vector<8x32xf32>
    %464 = vector.extract_strided_slice %447 {offsets = [0, 64], sizes = [8, 32], strides = [1, 1]} : vector<8x128xf32> to vector<8x32xf32>
    %465 = math.tanh %464 : vector<8x32xf32>
    %466 = vector.extract_strided_slice %447 {offsets = [0, 96], sizes = [8, 32], strides = [1, 1]} : vector<8x128xf32> to vector<8x32xf32>
    %467 = arith.negf %466 : vector<8x32xf32>
    %468 = math.exp %467 : vector<8x32xf32>
    %cst_201 = arith.constant 1.000000e+00 : f32
    %469 = vector.broadcast %cst_201 : f32 to vector<8x32xf32>
    %470 = arith.addf %469, %468 : vector<8x32xf32>
    %471 = arith.divf %469, %470 : vector<8x32xf32>
    %472 = arith.mulf %463, %451 : vector<8x32xf32>
    %473 = arith.mulf %457, %465 : vector<8x32xf32>
    %474 = arith.addf %472, %473 : vector<8x32xf32>
    %475 = math.tanh %474 : vector<8x32xf32>
    %476 = arith.mulf %471, %475 : vector<8x32xf32>
    %c0_202 = arith.constant 0 : index
    %c0_203 = arith.constant 0 : index
    %477 = vector.load %arg12[%c0_202, %c0_203] : memref<8x32xf32, #tpu.memory_space<vmem>>, vector<8x32xf32>
    %478 = vector.extract_strided_slice %450 {offsets = [0, 0], sizes = [8, 32], strides = [1, 1]} : vector<8x128xf32> to vector<8x32xf32>
    %479 = arith.negf %478 : vector<8x32xf32>
    %480 = math.exp %479 : vector<8x32xf32>
    %cst_204 = arith.constant 1.000000e+00 : f32
    %481 = vector.broadcast %cst_204 : f32 to vector<8x32xf32>
    %482 = arith.addf %481, %480 : vector<8x32xf32>
    %483 = arith.divf %481, %482 : vector<8x32xf32>
    %484 = vector.extract_strided_slice %450 {offsets = [0, 32], sizes = [8, 32], strides = [1, 1]} : vector<8x128xf32> to vector<8x32xf32>
    %485 = arith.negf %484 : vector<8x32xf32>
    %486 = math.exp %485 : vector<8x32xf32>
    %cst_205 = arith.constant 1.000000e+00 : f32
    %487 = vector.broadcast %cst_205 : f32 to vector<8x32xf32>
    %488 = arith.addf %487, %486 : vector<8x32xf32>
    %489 = arith.divf %487, %488 : vector<8x32xf32>
    %490 = vector.extract_strided_slice %450 {offsets = [0, 64], sizes = [8, 32], strides = [1, 1]} : vector<8x128xf32> to vector<8x32xf32>
    %491 = math.tanh %490 : vector<8x32xf32>
    %492 = vector.extract_strided_slice %450 {offsets = [0, 96], sizes = [8, 32], strides = [1, 1]} : vector<8x128xf32> to vector<8x32xf32>
    %493 = arith.negf %492 : vector<8x32xf32>
    %494 = math.exp %493 : vector<8x32xf32>
    %cst_206 = arith.constant 1.000000e+00 : f32
    %495 = vector.broadcast %cst_206 : f32 to vector<8x32xf32>
    %496 = arith.addf %495, %494 : vector<8x32xf32>
    %497 = arith.divf %495, %496 : vector<8x32xf32>
    %498 = arith.mulf %489, %477 : vector<8x32xf32>
    %499 = arith.mulf %483, %491 : vector<8x32xf32>
    %500 = arith.addf %498, %499 : vector<8x32xf32>
    %501 = math.tanh %500 : vector<8x32xf32>
    %502 = arith.mulf %497, %501 : vector<8x32xf32>
    %c0_207 = arith.constant 0 : index
    %c0_208 = arith.constant 0 : index
    %503 = vector.load %arg9[%c0_207, %c0_208] : memref<8x32xf32, #tpu.memory_space<vmem>>, vector<8x32xf32>
    tpu.vector_store %arg9[%c0_207, %c0_208], %476 {strides = array<i32>} : memref<8x32xf32, #tpu.memory_space<vmem>>, vector<8x32xf32>,
    %c0_209 = arith.constant 0 : index
    %c0_210 = arith.constant 0 : index
    %504 = vector.load %arg10[%c0_209, %c0_210] : memref<8x32xf32, #tpu.memory_space<vmem>>, vector<8x32xf32>
    tpu.vector_store %arg10[%c0_209, %c0_210], %474 {strides = array<i32>} : memref<8x32xf32, #tpu.memory_space<vmem>>, vector<8x32xf32>,
    %c0_211 = arith.constant 0 : index
    %c0_212 = arith.constant 0 : index
    %505 = vector.load %arg11[%c0_211, %c0_212] : memref<8x32xf32, #tpu.memory_space<vmem>>, vector<8x32xf32>
    tpu.vector_store %arg11[%c0_211, %c0_212], %502 {strides = array<i32>} : memref<8x32xf32, #tpu.memory_space<vmem>>, vector<8x32xf32>,
    %c0_213 = arith.constant 0 : index
    %c0_214 = arith.constant 0 : index
    %506 = vector.load %arg12[%c0_213, %c0_214] : memref<8x32xf32, #tpu.memory_space<vmem>>, vector<8x32xf32>
    tpu.vector_store %arg12[%c0_213, %c0_214], %500 {strides = array<i32>} : memref<8x32xf32, #tpu.memory_space<vmem>>, vector<8x32xf32>,
    %507 = arith.index_cast %c5_i32 : i32 to index
    %c0_215 = arith.constant 0 : index
    %c0_216 = arith.constant 0 : index
    %508 = vector.load %arg6[%507, %c0_215, %c0_216] : memref<8x8x64xf32, #tpu.memory_space<vmem>>, vector<1x8x32xf32>
    %509 = vector.shape_cast %508 : vector<1x8x32xf32> to vector<8x32xf32>
    %510 = vector.shape_cast %476 : vector<8x32xf32> to vector<1x8x32xf32>
    tpu.vector_store %arg6[%507, %c0_215, %c0_216], %510 {strides = array<i32>} : memref<8x8x64xf32, #tpu.memory_space<vmem>>, vector<1x8x32xf32>,
    %c7_i32_217 = arith.constant 7 : i32
    %511 = arith.subi %c7_i32_217, %c5_i32 : i32
    %512 = arith.index_cast %511 : i32 to index
    %c0_218 = arith.constant 0 : index
    %c32_219 = arith.constant 32 : index
    %513 = vector.load %arg6[%512, %c0_218, %c32_219] : memref<8x8x64xf32, #tpu.memory_space<vmem>>, vector<1x8x32xf32>
    %514 = vector.shape_cast %513 : vector<1x8x32xf32> to vector<8x32xf32>
    %515 = vector.shape_cast %502 : vector<8x32xf32> to vector<1x8x32xf32>
    tpu.vector_store %arg6[%512, %c0_218, %c32_219], %515 {strides = array<i32>} : memref<8x8x64xf32, #tpu.memory_space<vmem>>, vector<1x8x32xf32>,
    %c6_i32 = arith.constant 6 : i32
    %516 = arith.index_cast %c6_i32 : i32 to index
    %c0_220 = arith.constant 0 : index
    %c0_221 = arith.constant 0 : index
    %517 = vector.load %arg1[%516, %c0_220, %c0_221] : memref<8x8x64xf32, #tpu.memory_space<vmem>>, vector<1x8x64xf32>
    %518 = vector.shape_cast %517 : vector<1x8x64xf32> to vector<8x64xf32>
    %c7_i32_222 = arith.constant 7 : i32
    %519 = arith.subi %c7_i32_222, %c6_i32 : i32
    %520 = arith.index_cast %519 : i32 to index
    %c0_223 = arith.constant 0 : index
    %c0_224 = arith.constant 0 : index
    %521 = vector.load %arg1[%520, %c0_223, %c0_224] : memref<8x8x64xf32, #tpu.memory_space<vmem>>, vector<1x8x64xf32>
    %522 = vector.shape_cast %521 : vector<1x8x64xf32> to vector<8x64xf32>
    %c0_225 = arith.constant 0 : index
    %c0_226 = arith.constant 0 : index
    %523 = vector.load %arg9[%c0_225, %c0_226] : memref<8x32xf32, #tpu.memory_space<vmem>>, vector<8x32xf32>
    %524 = tpu.concatenate %518, %523 in 1 : vector<8x64xf32>, vector<8x32xf32> -> vector<8x96xf32>
    %525 = arith.truncf %524 : vector<8x96xf32> to vector<8x96xbf16>
    %c0_227 = arith.constant 0 : index
    %c0_228 = arith.constant 0 : index
    %526 = vector.load %arg11[%c0_227, %c0_228] : memref<8x32xf32, #tpu.memory_space<vmem>>, vector<8x32xf32>
    %527 = tpu.concatenate %522, %526 in 1 : vector<8x64xf32>, vector<8x32xf32> -> vector<8x96xf32>
    %528 = arith.truncf %527 : vector<8x96xf32> to vector<8x96xbf16>
    %cst_229 = arith.constant dense<0.000000e+00> : vector<8x128xf32>
    %529 = tpu.matmul %525, %8, %cst_229 {dimension_numbers = #tpu.dot_dimension_numbers<[1], [0], [0], [1], [0, 0, 1, 1], [], []>} : vector<8x96xbf16>, vector<96x128xbf16>, vector<8x128xf32> -> vector<8x128xf32>
    %530 = vector.broadcast %10 : vector<1x128xf32> to vector<8x128xf32>
    %531 = arith.addf %529, %530 : vector<8x128xf32>
    %cst_230 = arith.constant dense<0.000000e+00> : vector<8x128xf32>
    %532 = tpu.matmul %528, %9, %cst_230 {dimension_numbers = #tpu.dot_dimension_numbers<[1], [0], [0], [1], [0, 0, 1, 1], [], []>} : vector<8x96xbf16>, vector<96x128xbf16>, vector<8x128xf32> -> vector<8x128xf32>
    %533 = vector.broadcast %11 : vector<1x128xf32> to vector<8x128xf32>
    %534 = arith.addf %532, %533 : vector<8x128xf32>
    %c0_231 = arith.constant 0 : index
    %c0_232 = arith.constant 0 : index
    %535 = vector.load %arg10[%c0_231, %c0_232] : memref<8x32xf32, #tpu.memory_space<vmem>>, vector<8x32xf32>
    %536 = vector.extract_strided_slice %531 {offsets = [0, 0], sizes = [8, 32], strides = [1, 1]} : vector<8x128xf32> to vector<8x32xf32>
    %537 = arith.negf %536 : vector<8x32xf32>
    %538 = math.exp %537 : vector<8x32xf32>
    %cst_233 = arith.constant 1.000000e+00 : f32
    %539 = vector.broadcast %cst_233 : f32 to vector<8x32xf32>
    %540 = arith.addf %539, %538 : vector<8x32xf32>
    %541 = arith.divf %539, %540 : vector<8x32xf32>
    %542 = vector.extract_strided_slice %531 {offsets = [0, 32], sizes = [8, 32], strides = [1, 1]} : vector<8x128xf32> to vector<8x32xf32>
    %543 = arith.negf %542 : vector<8x32xf32>
    %544 = math.exp %543 : vector<8x32xf32>
    %cst_234 = arith.constant 1.000000e+00 : f32
    %545 = vector.broadcast %cst_234 : f32 to vector<8x32xf32>
    %546 = arith.addf %545, %544 : vector<8x32xf32>
    %547 = arith.divf %545, %546 : vector<8x32xf32>
    %548 = vector.extract_strided_slice %531 {offsets = [0, 64], sizes = [8, 32], strides = [1, 1]} : vector<8x128xf32> to vector<8x32xf32>
    %549 = math.tanh %548 : vector<8x32xf32>
    %550 = vector.extract_strided_slice %531 {offsets = [0, 96], sizes = [8, 32], strides = [1, 1]} : vector<8x128xf32> to vector<8x32xf32>
    %551 = arith.negf %550 : vector<8x32xf32>
    %552 = math.exp %551 : vector<8x32xf32>
    %cst_235 = arith.constant 1.000000e+00 : f32
    %553 = vector.broadcast %cst_235 : f32 to vector<8x32xf32>
    %554 = arith.addf %553, %552 : vector<8x32xf32>
    %555 = arith.divf %553, %554 : vector<8x32xf32>
    %556 = arith.mulf %547, %535 : vector<8x32xf32>
    %557 = arith.mulf %541, %549 : vector<8x32xf32>
    %558 = arith.addf %556, %557 : vector<8x32xf32>
    %559 = math.tanh %558 : vector<8x32xf32>
    %560 = arith.mulf %555, %559 : vector<8x32xf32>
    %c0_236 = arith.constant 0 : index
    %c0_237 = arith.constant 0 : index
    %561 = vector.load %arg12[%c0_236, %c0_237] : memref<8x32xf32, #tpu.memory_space<vmem>>, vector<8x32xf32>
    %562 = vector.extract_strided_slice %534 {offsets = [0, 0], sizes = [8, 32], strides = [1, 1]} : vector<8x128xf32> to vector<8x32xf32>
    %563 = arith.negf %562 : vector<8x32xf32>
    %564 = math.exp %563 : vector<8x32xf32>
    %cst_238 = arith.constant 1.000000e+00 : f32
    %565 = vector.broadcast %cst_238 : f32 to vector<8x32xf32>
    %566 = arith.addf %565, %564 : vector<8x32xf32>
    %567 = arith.divf %565, %566 : vector<8x32xf32>
    %568 = vector.extract_strided_slice %534 {offsets = [0, 32], sizes = [8, 32], strides = [1, 1]} : vector<8x128xf32> to vector<8x32xf32>
    %569 = arith.negf %568 : vector<8x32xf32>
    %570 = math.exp %569 : vector<8x32xf32>
    %cst_239 = arith.constant 1.000000e+00 : f32
    %571 = vector.broadcast %cst_239 : f32 to vector<8x32xf32>
    %572 = arith.addf %571, %570 : vector<8x32xf32>
    %573 = arith.divf %571, %572 : vector<8x32xf32>
    %574 = vector.extract_strided_slice %534 {offsets = [0, 64], sizes = [8, 32], strides = [1, 1]} : vector<8x128xf32> to vector<8x32xf32>
    %575 = math.tanh %574 : vector<8x32xf32>
    %576 = vector.extract_strided_slice %534 {offsets = [0, 96], sizes = [8, 32], strides = [1, 1]} : vector<8x128xf32> to vector<8x32xf32>
    %577 = arith.negf %576 : vector<8x32xf32>
    %578 = math.exp %577 : vector<8x32xf32>
    %cst_240 = arith.constant 1.000000e+00 : f32
    %579 = vector.broadcast %cst_240 : f32 to vector<8x32xf32>
    %580 = arith.addf %579, %578 : vector<8x32xf32>
    %581 = arith.divf %579, %580 : vector<8x32xf32>
    %582 = arith.mulf %573, %561 : vector<8x32xf32>
    %583 = arith.mulf %567, %575 : vector<8x32xf32>
    %584 = arith.addf %582, %583 : vector<8x32xf32>
    %585 = math.tanh %584 : vector<8x32xf32>
    %586 = arith.mulf %581, %585 : vector<8x32xf32>
    %c0_241 = arith.constant 0 : index
    %c0_242 = arith.constant 0 : index
    %587 = vector.load %arg9[%c0_241, %c0_242] : memref<8x32xf32, #tpu.memory_space<vmem>>, vector<8x32xf32>
    tpu.vector_store %arg9[%c0_241, %c0_242], %560 {strides = array<i32>} : memref<8x32xf32, #tpu.memory_space<vmem>>, vector<8x32xf32>,
    %c0_243 = arith.constant 0 : index
    %c0_244 = arith.constant 0 : index
    %588 = vector.load %arg10[%c0_243, %c0_244] : memref<8x32xf32, #tpu.memory_space<vmem>>, vector<8x32xf32>
    tpu.vector_store %arg10[%c0_243, %c0_244], %558 {strides = array<i32>} : memref<8x32xf32, #tpu.memory_space<vmem>>, vector<8x32xf32>,
    %c0_245 = arith.constant 0 : index
    %c0_246 = arith.constant 0 : index
    %589 = vector.load %arg11[%c0_245, %c0_246] : memref<8x32xf32, #tpu.memory_space<vmem>>, vector<8x32xf32>
    tpu.vector_store %arg11[%c0_245, %c0_246], %586 {strides = array<i32>} : memref<8x32xf32, #tpu.memory_space<vmem>>, vector<8x32xf32>,
    %c0_247 = arith.constant 0 : index
    %c0_248 = arith.constant 0 : index
    %590 = vector.load %arg12[%c0_247, %c0_248] : memref<8x32xf32, #tpu.memory_space<vmem>>, vector<8x32xf32>
    tpu.vector_store %arg12[%c0_247, %c0_248], %584 {strides = array<i32>} : memref<8x32xf32, #tpu.memory_space<vmem>>, vector<8x32xf32>,
    %591 = arith.index_cast %c6_i32 : i32 to index
    %c0_249 = arith.constant 0 : index
    %c0_250 = arith.constant 0 : index
    %592 = vector.load %arg6[%591, %c0_249, %c0_250] : memref<8x8x64xf32, #tpu.memory_space<vmem>>, vector<1x8x32xf32>
    %593 = vector.shape_cast %592 : vector<1x8x32xf32> to vector<8x32xf32>
    %594 = vector.shape_cast %560 : vector<8x32xf32> to vector<1x8x32xf32>
    tpu.vector_store %arg6[%591, %c0_249, %c0_250], %594 {strides = array<i32>} : memref<8x8x64xf32, #tpu.memory_space<vmem>>, vector<1x8x32xf32>,
    %c7_i32_251 = arith.constant 7 : i32
    %595 = arith.subi %c7_i32_251, %c6_i32 : i32
    %596 = arith.index_cast %595 : i32 to index
    %c0_252 = arith.constant 0 : index
    %c32_253 = arith.constant 32 : index
    %597 = vector.load %arg6[%596, %c0_252, %c32_253] : memref<8x8x64xf32, #tpu.memory_space<vmem>>, vector<1x8x32xf32>
    %598 = vector.shape_cast %597 : vector<1x8x32xf32> to vector<8x32xf32>
    %599 = vector.shape_cast %586 : vector<8x32xf32> to vector<1x8x32xf32>
    tpu.vector_store %arg6[%596, %c0_252, %c32_253], %599 {strides = array<i32>} : memref<8x8x64xf32, #tpu.memory_space<vmem>>, vector<1x8x32xf32>,
    %c7_i32_254 = arith.constant 7 : i32
    %600 = arith.index_cast %c7_i32_254 : i32 to index
    %c0_255 = arith.constant 0 : index
    %c0_256 = arith.constant 0 : index
    %601 = vector.load %arg1[%600, %c0_255, %c0_256] : memref<8x8x64xf32, #tpu.memory_space<vmem>>, vector<1x8x64xf32>
    %602 = vector.shape_cast %601 : vector<1x8x64xf32> to vector<8x64xf32>
    %c7_i32_257 = arith.constant 7 : i32
    %603 = arith.subi %c7_i32_257, %c7_i32_254 : i32
    %604 = arith.index_cast %603 : i32 to index
    %c0_258 = arith.constant 0 : index
    %c0_259 = arith.constant 0 : index
    %605 = vector.load %arg1[%604, %c0_258, %c0_259] : memref<8x8x64xf32, #tpu.memory_space<vmem>>, vector<1x8x64xf32>
    %606 = vector.shape_cast %605 : vector<1x8x64xf32> to vector<8x64xf32>
    %c0_260 = arith.constant 0 : index
    %c0_261 = arith.constant 0 : index
    %607 = vector.load %arg9[%c0_260, %c0_261] : memref<8x32xf32, #tpu.memory_space<vmem>>, vector<8x32xf32>
    %608 = tpu.concatenate %602, %607 in 1 : vector<8x64xf32>, vector<8x32xf32> -> vector<8x96xf32>
    %609 = arith.truncf %608 : vector<8x96xf32> to vector<8x96xbf16>
    %c0_262 = arith.constant 0 : index
    %c0_263 = arith.constant 0 : index
    %610 = vector.load %arg11[%c0_262, %c0_263] : memref<8x32xf32, #tpu.memory_space<vmem>>, vector<8x32xf32>
    %611 = tpu.concatenate %606, %610 in 1 : vector<8x64xf32>, vector<8x32xf32> -> vector<8x96xf32>
    %612 = arith.truncf %611 : vector<8x96xf32> to vector<8x96xbf16>
    %cst_264 = arith.constant dense<0.000000e+00> : vector<8x128xf32>
    %613 = tpu.matmul %609, %8, %cst_264 {dimension_numbers = #tpu.dot_dimension_numbers<[1], [0], [0], [1], [0, 0, 1, 1], [], []>} : vector<8x96xbf16>, vector<96x128xbf16>, vector<8x128xf32> -> vector<8x128xf32>
    %614 = vector.broadcast %10 : vector<1x128xf32> to vector<8x128xf32>
    %615 = arith.addf %613, %614 : vector<8x128xf32>
    %cst_265 = arith.constant dense<0.000000e+00> : vector<8x128xf32>
    %616 = tpu.matmul %612, %9, %cst_265 {dimension_numbers = #tpu.dot_dimension_numbers<[1], [0], [0], [1], [0, 0, 1, 1], [], []>} : vector<8x96xbf16>, vector<96x128xbf16>, vector<8x128xf32> -> vector<8x128xf32>
    %617 = vector.broadcast %11 : vector<1x128xf32> to vector<8x128xf32>
    %618 = arith.addf %616, %617 : vector<8x128xf32>
    %c0_266 = arith.constant 0 : index
    %c0_267 = arith.constant 0 : index
    %619 = vector.load %arg10[%c0_266, %c0_267] : memref<8x32xf32, #tpu.memory_space<vmem>>, vector<8x32xf32>
    %620 = vector.extract_strided_slice %615 {offsets = [0, 0], sizes = [8, 32], strides = [1, 1]} : vector<8x128xf32> to vector<8x32xf32>
    %621 = arith.negf %620 : vector<8x32xf32>
    %622 = math.exp %621 : vector<8x32xf32>
    %cst_268 = arith.constant 1.000000e+00 : f32
    %623 = vector.broadcast %cst_268 : f32 to vector<8x32xf32>
    %624 = arith.addf %623, %622 : vector<8x32xf32>
    %625 = arith.divf %623, %624 : vector<8x32xf32>
    %626 = vector.extract_strided_slice %615 {offsets = [0, 32], sizes = [8, 32], strides = [1, 1]} : vector<8x128xf32> to vector<8x32xf32>
    %627 = arith.negf %626 : vector<8x32xf32>
    %628 = math.exp %627 : vector<8x32xf32>
    %cst_269 = arith.constant 1.000000e+00 : f32
    %629 = vector.broadcast %cst_269 : f32 to vector<8x32xf32>
    %630 = arith.addf %629, %628 : vector<8x32xf32>
    %631 = arith.divf %629, %630 : vector<8x32xf32>
    %632 = vector.extract_strided_slice %615 {offsets = [0, 64], sizes = [8, 32], strides = [1, 1]} : vector<8x128xf32> to vector<8x32xf32>
    %633 = math.tanh %632 : vector<8x32xf32>
    %634 = vector.extract_strided_slice %615 {offsets = [0, 96], sizes = [8, 32], strides = [1, 1]} : vector<8x128xf32> to vector<8x32xf32>
    %635 = arith.negf %634 : vector<8x32xf32>
    %636 = math.exp %635 : vector<8x32xf32>
    %cst_270 = arith.constant 1.000000e+00 : f32
    %637 = vector.broadcast %cst_270 : f32 to vector<8x32xf32>
    %638 = arith.addf %637, %636 : vector<8x32xf32>
    %639 = arith.divf %637, %638 : vector<8x32xf32>
    %640 = arith.mulf %631, %619 : vector<8x32xf32>
    %641 = arith.mulf %625, %633 : vector<8x32xf32>
    %642 = arith.addf %640, %641 : vector<8x32xf32>
    %643 = math.tanh %642 : vector<8x32xf32>
    %644 = arith.mulf %639, %643 : vector<8x32xf32>
    %c0_271 = arith.constant 0 : index
    %c0_272 = arith.constant 0 : index
    %645 = vector.load %arg12[%c0_271, %c0_272] : memref<8x32xf32, #tpu.memory_space<vmem>>, vector<8x32xf32>
    %646 = vector.extract_strided_slice %618 {offsets = [0, 0], sizes = [8, 32], strides = [1, 1]} : vector<8x128xf32> to vector<8x32xf32>
    %647 = arith.negf %646 : vector<8x32xf32>
    %648 = math.exp %647 : vector<8x32xf32>
    %cst_273 = arith.constant 1.000000e+00 : f32
    %649 = vector.broadcast %cst_273 : f32 to vector<8x32xf32>
    %650 = arith.addf %649, %648 : vector<8x32xf32>
    %651 = arith.divf %649, %650 : vector<8x32xf32>
    %652 = vector.extract_strided_slice %618 {offsets = [0, 32], sizes = [8, 32], strides = [1, 1]} : vector<8x128xf32> to vector<8x32xf32>
    %653 = arith.negf %652 : vector<8x32xf32>
    %654 = math.exp %653 : vector<8x32xf32>
    %cst_274 = arith.constant 1.000000e+00 : f32
    %655 = vector.broadcast %cst_274 : f32 to vector<8x32xf32>
    %656 = arith.addf %655, %654 : vector<8x32xf32>
    %657 = arith.divf %655, %656 : vector<8x32xf32>
    %658 = vector.extract_strided_slice %618 {offsets = [0, 64], sizes = [8, 32], strides = [1, 1]} : vector<8x128xf32> to vector<8x32xf32>
    %659 = math.tanh %658 : vector<8x32xf32>
    %660 = vector.extract_strided_slice %618 {offsets = [0, 96], sizes = [8, 32], strides = [1, 1]} : vector<8x128xf32> to vector<8x32xf32>
    %661 = arith.negf %660 : vector<8x32xf32>
    %662 = math.exp %661 : vector<8x32xf32>
    %cst_275 = arith.constant 1.000000e+00 : f32
    %663 = vector.broadcast %cst_275 : f32 to vector<8x32xf32>
    %664 = arith.addf %663, %662 : vector<8x32xf32>
    %665 = arith.divf %663, %664 : vector<8x32xf32>
    %666 = arith.mulf %657, %645 : vector<8x32xf32>
    %667 = arith.mulf %651, %659 : vector<8x32xf32>
    %668 = arith.addf %666, %667 : vector<8x32xf32>
    %669 = math.tanh %668 : vector<8x32xf32>
    %670 = arith.mulf %665, %669 : vector<8x32xf32>
    %c0_276 = arith.constant 0 : index
    %c0_277 = arith.constant 0 : index
    %671 = vector.load %arg9[%c0_276, %c0_277] : memref<8x32xf32, #tpu.memory_space<vmem>>, vector<8x32xf32>
    tpu.vector_store %arg9[%c0_276, %c0_277], %644 {strides = array<i32>} : memref<8x32xf32, #tpu.memory_space<vmem>>, vector<8x32xf32>,
    %c0_278 = arith.constant 0 : index
    %c0_279 = arith.constant 0 : index
    %672 = vector.load %arg10[%c0_278, %c0_279] : memref<8x32xf32, #tpu.memory_space<vmem>>, vector<8x32xf32>
    tpu.vector_store %arg10[%c0_278, %c0_279], %642 {strides = array<i32>} : memref<8x32xf32, #tpu.memory_space<vmem>>, vector<8x32xf32>,
    %c0_280 = arith.constant 0 : index
    %c0_281 = arith.constant 0 : index
    %673 = vector.load %arg11[%c0_280, %c0_281] : memref<8x32xf32, #tpu.memory_space<vmem>>, vector<8x32xf32>
    tpu.vector_store %arg11[%c0_280, %c0_281], %670 {strides = array<i32>} : memref<8x32xf32, #tpu.memory_space<vmem>>, vector<8x32xf32>,
    %c0_282 = arith.constant 0 : index
    %c0_283 = arith.constant 0 : index
    %674 = vector.load %arg12[%c0_282, %c0_283] : memref<8x32xf32, #tpu.memory_space<vmem>>, vector<8x32xf32>
    tpu.vector_store %arg12[%c0_282, %c0_283], %668 {strides = array<i32>} : memref<8x32xf32, #tpu.memory_space<vmem>>, vector<8x32xf32>,
    %675 = arith.index_cast %c7_i32_254 : i32 to index
    %c0_284 = arith.constant 0 : index
    %c0_285 = arith.constant 0 : index
    %676 = vector.load %arg6[%675, %c0_284, %c0_285] : memref<8x8x64xf32, #tpu.memory_space<vmem>>, vector<1x8x32xf32>
    %677 = vector.shape_cast %676 : vector<1x8x32xf32> to vector<8x32xf32>
    %678 = vector.shape_cast %644 : vector<8x32xf32> to vector<1x8x32xf32>
    tpu.vector_store %arg6[%675, %c0_284, %c0_285], %678 {strides = array<i32>} : memref<8x8x64xf32, #tpu.memory_space<vmem>>, vector<1x8x32xf32>,
    %c7_i32_286 = arith.constant 7 : i32
    %679 = arith.subi %c7_i32_286, %c7_i32_254 : i32
    %680 = arith.index_cast %679 : i32 to index
    %c0_287 = arith.constant 0 : index
    %c32_288 = arith.constant 32 : index
    %681 = vector.load %arg6[%680, %c0_287, %c32_288] : memref<8x8x64xf32, #tpu.memory_space<vmem>>, vector<1x8x32xf32>
    %682 = vector.shape_cast %681 : vector<1x8x32xf32> to vector<8x32xf32>
    %683 = vector.shape_cast %670 : vector<8x32xf32> to vector<1x8x32xf32>
    tpu.vector_store %arg6[%680, %c0_287, %c32_288], %683 {strides = array<i32>} : memref<8x8x64xf32, #tpu.memory_space<vmem>>, vector<1x8x32xf32>,
    %c8_i32 = arith.constant 8 : i32
    %c0_289 = arith.constant 0 : index
    %c0_290 = arith.constant 0 : index
    %684 = vector.load %arg11[%c0_289, %c0_290] : memref<8x32xf32, #tpu.memory_space<vmem>>, vector<8x32xf32>
    %c0_291 = arith.constant 0 : index
    %c0_292 = arith.constant 0 : index
    %685 = vector.load %arg7[%c0_291, %c0_292] : memref<8x32xf32, #tpu.memory_space<vmem>>, vector<8x32xf32>
    tpu.vector_store %arg7[%c0_291, %c0_292], %684 {strides = array<i32>} : memref<8x32xf32, #tpu.memory_space<vmem>>, vector<8x32xf32>,
    %c0_293 = arith.constant 0 : index
    %c0_294 = arith.constant 0 : index
    %686 = vector.load %arg12[%c0_293, %c0_294] : memref<8x32xf32, #tpu.memory_space<vmem>>, vector<8x32xf32>
    %c0_295 = arith.constant 0 : index
    %c0_296 = arith.constant 0 : index
    %687 = vector.load %arg8[%c0_295, %c0_296] : memref<8x32xf32, #tpu.memory_space<vmem>>, vector<8x32xf32>
    tpu.vector_store %arg8[%c0_295, %c0_296], %686 {strides = array<i32>} : memref<8x32xf32, #tpu.memory_space<vmem>>, vector<8x32xf32>,
    return
  }
  func.func @transform_0(%arg0: i32) -> (i32, i32, i32) {
    %c0_i32 = arith.constant 0 : i32
    %c0_i32_0 = arith.constant 0 : i32
    %c0_i32_1 = arith.constant 0 : i32
    %c0_i32_2 = arith.constant 0 : i32
    return %c0_i32, %c0_i32_0, %c0_i32_1 : i32, i32, i32
  }
  func.func @transform_1(%arg0: i32) -> (i32, i32) {
    %c0_i32 = arith.constant 0 : i32
    %c0_i32_0 = arith.constant 0 : i32
    %c0_i32_1 = arith.constant 0 : i32
    return %c0_i32, %c0_i32_0 : i32, i32
  }
  func.func @transform_2(%arg0: i32) -> (i32, i32) {
    %c0_i32 = arith.constant 0 : i32
    %c0_i32_0 = arith.constant 0 : i32
    %c0_i32_1 = arith.constant 0 : i32
    return %c0_i32, %c0_i32_0 : i32, i32
  }
  func.func @transform_3(%arg0: i32) -> (i32, i32) {
    %c0_i32 = arith.constant 0 : i32
    %c0_i32_0 = arith.constant 0 : i32
    %c0_i32_1 = arith.constant 0 : i32
    return %c0_i32, %c0_i32_0 : i32, i32
  }
  func.func @transform_4(%arg0: i32) -> (i32, i32) {
    %c0_i32 = arith.constant 0 : i32
    %c0_i32_0 = arith.constant 0 : i32
    %c0_i32_1 = arith.constant 0 : i32
    return %c0_i32, %c0_i32_0 : i32, i32
  }
  func.func @transform_5(%arg0: i32) -> (i32, i32, i32) {
    %c0_i32 = arith.constant 0 : i32
    %c0_i32_0 = arith.constant 0 : i32
    %c0_i32_1 = arith.constant 0 : i32
    %c0_i32_2 = arith.constant 0 : i32
    return %c0_i32, %c0_i32_0, %c0_i32_1 : i32, i32, i32
  }
  func.func @transform_6(%arg0: i32) -> (i32, i32) {
    %c0_i32 = arith.constant 0 : i32
    %c0_i32_0 = arith.constant 0 : i32
    %c0_i32_1 = arith.constant 0 : i32
    return %c0_i32, %c0_i32_0 : i32, i32
  }
  func.func @transform_7(%arg0: i32) -> (i32, i32) {
    %c0_i32 = arith.constant 0 : i32
    %c0_i32_0 = arith.constant 0 : i32
    %c0_i32_1 = arith.constant 0 : i32
    return %c0_i32, %c0_i32_0 : i32, i32
  }
}

module attributes {stable_mosaic.version = 11 : i64} {
  func.func @_bilstm_layer_kernel(%arg0: i32, %arg1: memref<8x8x16xf32, #tpu.memory_space<vmem>>, %arg2: memref<48x128xbf16, #tpu.memory_space<vmem>>, %arg3: memref<48x128xbf16, #tpu.memory_space<vmem>>, %arg4: memref<1x128xf32, #tpu.memory_space<vmem>>, %arg5: memref<1x128xf32, #tpu.memory_space<vmem>>, %arg6: memref<8x8x64xf32, #tpu.memory_space<vmem>>, %arg7: memref<8x32xf32, #tpu.memory_space<vmem>>, %arg8: memref<8x32xf32, #tpu.memory_space<vmem>>, %arg9: memref<8x32xf32, #tpu.memory_space<vmem>>, %arg10: memref<8x32xf32, #tpu.memory_space<vmem>>, %arg11: memref<8x32xf32, #tpu.memory_space<vmem>>, %arg12: memref<8x32xf32, #tpu.memory_space<vmem>>) attributes {dimension_semantics = [#tpu.dimension_semantics<arbitrary>], iteration_bounds = array<i64: 1>, scalar_prefetch = 0 : i64, scratch_operands = 4 : i64, tpu.core_type = #tpu.core_type<tc>, window_params = [{pipeline_mode = #tpu.pipeline_mode<synchronous>, transform_indices = @transform_0, window_bounds = array<i64: 8, 8, 16>}, {pipeline_mode = #tpu.pipeline_mode<synchronous>, transform_indices = @transform_1, window_bounds = array<i64: 48, 128>}, {pipeline_mode = #tpu.pipeline_mode<synchronous>, transform_indices = @transform_2, window_bounds = array<i64: 48, 128>}, {pipeline_mode = #tpu.pipeline_mode<synchronous>, transform_indices = @transform_3, window_bounds = array<i64: 1, 128>}, {pipeline_mode = #tpu.pipeline_mode<synchronous>, transform_indices = @transform_4, window_bounds = array<i64: 1, 128>}, {pipeline_mode = #tpu.pipeline_mode<synchronous>, transform_indices = @transform_5, window_bounds = array<i64: 8, 8, 64>}, {pipeline_mode = #tpu.pipeline_mode<synchronous>, transform_indices = @transform_6, window_bounds = array<i64: 8, 32>}, {pipeline_mode = #tpu.pipeline_mode<synchronous>, transform_indices = @transform_7, window_bounds = array<i64: 8, 32>}]} {
    %cst = arith.constant 0.000000e+00 : f32
    %0 = vector.broadcast %cst : f32 to vector<8x32xf32>
    %c0 = arith.constant 0 : index
    %c0_0 = arith.constant 0 : index
    %1 = vector.load %arg9[%c0, %c0_0] : memref<8x32xf32, #tpu.memory_space<vmem>>, vector<8x32xf32>
    tpu.vector_store %arg9[%c0, %c0_0], %0 {strides = array<i32>} : memref<8x32xf32, #tpu.memory_space<vmem>>, vector<8x32xf32>,
    %cst_1 = arith.constant 0.000000e+00 : f32
    %2 = vector.broadcast %cst_1 : f32 to vector<8x32xf32>
    %c0_2 = arith.constant 0 : index
    %c0_3 = arith.constant 0 : index
    %3 = vector.load %arg10[%c0_2, %c0_3] : memref<8x32xf32, #tpu.memory_space<vmem>>, vector<8x32xf32>
    tpu.vector_store %arg10[%c0_2, %c0_3], %2 {strides = array<i32>} : memref<8x32xf32, #tpu.memory_space<vmem>>, vector<8x32xf32>,
    %cst_4 = arith.constant 0.000000e+00 : f32
    %4 = vector.broadcast %cst_4 : f32 to vector<8x32xf32>
    %c0_5 = arith.constant 0 : index
    %c0_6 = arith.constant 0 : index
    %5 = vector.load %arg11[%c0_5, %c0_6] : memref<8x32xf32, #tpu.memory_space<vmem>>, vector<8x32xf32>
    tpu.vector_store %arg11[%c0_5, %c0_6], %4 {strides = array<i32>} : memref<8x32xf32, #tpu.memory_space<vmem>>, vector<8x32xf32>,
    %cst_7 = arith.constant 0.000000e+00 : f32
    %6 = vector.broadcast %cst_7 : f32 to vector<8x32xf32>
    %c0_8 = arith.constant 0 : index
    %c0_9 = arith.constant 0 : index
    %7 = vector.load %arg12[%c0_8, %c0_9] : memref<8x32xf32, #tpu.memory_space<vmem>>, vector<8x32xf32>
    tpu.vector_store %arg12[%c0_8, %c0_9], %6 {strides = array<i32>} : memref<8x32xf32, #tpu.memory_space<vmem>>, vector<8x32xf32>,
    %c0_10 = arith.constant 0 : index
    %c0_11 = arith.constant 0 : index
    %8 = vector.load %arg2[%c0_10, %c0_11] : memref<48x128xbf16, #tpu.memory_space<vmem>>, vector<48x128xbf16>
    %c0_12 = arith.constant 0 : index
    %c0_13 = arith.constant 0 : index
    %9 = vector.load %arg3[%c0_12, %c0_13] : memref<48x128xbf16, #tpu.memory_space<vmem>>, vector<48x128xbf16>
    %c0_14 = arith.constant 0 : index
    %c0_15 = arith.constant 0 : index
    %10 = vector.load %arg4[%c0_14, %c0_15] : memref<1x128xf32, #tpu.memory_space<vmem>>, vector<1x128xf32>
    %c0_16 = arith.constant 0 : index
    %c0_17 = arith.constant 0 : index
    %11 = vector.load %arg5[%c0_16, %c0_17] : memref<1x128xf32, #tpu.memory_space<vmem>>, vector<1x128xf32>
    %c0_i32 = arith.constant 0 : i32
    %12 = arith.index_cast %c0_i32 : i32 to index
    %c0_18 = arith.constant 0 : index
    %c0_19 = arith.constant 0 : index
    %13 = vector.load %arg1[%12, %c0_18, %c0_19] : memref<8x8x16xf32, #tpu.memory_space<vmem>>, vector<1x8x16xf32>
    %14 = vector.shape_cast %13 : vector<1x8x16xf32> to vector<8x16xf32>
    %c7_i32 = arith.constant 7 : i32
    %15 = arith.subi %c7_i32, %c0_i32 : i32
    %16 = arith.index_cast %15 : i32 to index
    %c0_20 = arith.constant 0 : index
    %c0_21 = arith.constant 0 : index
    %17 = vector.load %arg1[%16, %c0_20, %c0_21] : memref<8x8x16xf32, #tpu.memory_space<vmem>>, vector<1x8x16xf32>
    %18 = vector.shape_cast %17 : vector<1x8x16xf32> to vector<8x16xf32>
    %c0_22 = arith.constant 0 : index
    %c0_23 = arith.constant 0 : index
    %19 = vector.load %arg9[%c0_22, %c0_23] : memref<8x32xf32, #tpu.memory_space<vmem>>, vector<8x32xf32>
    %20 = tpu.concatenate %14, %19 in 1 : vector<8x16xf32>, vector<8x32xf32> -> vector<8x48xf32>
    %21 = arith.truncf %20 : vector<8x48xf32> to vector<8x48xbf16>
    %c0_24 = arith.constant 0 : index
    %c0_25 = arith.constant 0 : index
    %22 = vector.load %arg11[%c0_24, %c0_25] : memref<8x32xf32, #tpu.memory_space<vmem>>, vector<8x32xf32>
    %23 = tpu.concatenate %18, %22 in 1 : vector<8x16xf32>, vector<8x32xf32> -> vector<8x48xf32>
    %24 = arith.truncf %23 : vector<8x48xf32> to vector<8x48xbf16>
    %cst_26 = arith.constant dense<0.000000e+00> : vector<8x128xf32>
    %25 = tpu.matmul %21, %8, %cst_26 {dimension_numbers = #tpu.dot_dimension_numbers<[1], [0], [0], [1], [0, 0, 1, 1], [], []>} : vector<8x48xbf16>, vector<48x128xbf16>, vector<8x128xf32> -> vector<8x128xf32>
    %26 = vector.broadcast %10 : vector<1x128xf32> to vector<8x128xf32>
    %27 = arith.addf %25, %26 : vector<8x128xf32>
    %cst_27 = arith.constant dense<0.000000e+00> : vector<8x128xf32>
    %28 = tpu.matmul %24, %9, %cst_27 {dimension_numbers = #tpu.dot_dimension_numbers<[1], [0], [0], [1], [0, 0, 1, 1], [], []>} : vector<8x48xbf16>, vector<48x128xbf16>, vector<8x128xf32> -> vector<8x128xf32>
    %29 = vector.broadcast %11 : vector<1x128xf32> to vector<8x128xf32>
    %30 = arith.addf %28, %29 : vector<8x128xf32>
    %c0_28 = arith.constant 0 : index
    %c0_29 = arith.constant 0 : index
    %31 = vector.load %arg10[%c0_28, %c0_29] : memref<8x32xf32, #tpu.memory_space<vmem>>, vector<8x32xf32>
    %32 = vector.extract_strided_slice %27 {offsets = [0, 0], sizes = [8, 32], strides = [1, 1]} : vector<8x128xf32> to vector<8x32xf32>
    %33 = arith.negf %32 : vector<8x32xf32>
    %34 = math.exp %33 : vector<8x32xf32>
    %cst_30 = arith.constant 1.000000e+00 : f32
    %35 = vector.broadcast %cst_30 : f32 to vector<8x32xf32>
    %36 = arith.addf %35, %34 : vector<8x32xf32>
    %37 = arith.divf %35, %36 : vector<8x32xf32>
    %38 = vector.extract_strided_slice %27 {offsets = [0, 32], sizes = [8, 32], strides = [1, 1]} : vector<8x128xf32> to vector<8x32xf32>
    %39 = arith.negf %38 : vector<8x32xf32>
    %40 = math.exp %39 : vector<8x32xf32>
    %cst_31 = arith.constant 1.000000e+00 : f32
    %41 = vector.broadcast %cst_31 : f32 to vector<8x32xf32>
    %42 = arith.addf %41, %40 : vector<8x32xf32>
    %43 = arith.divf %41, %42 : vector<8x32xf32>
    %44 = vector.extract_strided_slice %27 {offsets = [0, 64], sizes = [8, 32], strides = [1, 1]} : vector<8x128xf32> to vector<8x32xf32>
    %45 = math.tanh %44 : vector<8x32xf32>
    %46 = vector.extract_strided_slice %27 {offsets = [0, 96], sizes = [8, 32], strides = [1, 1]} : vector<8x128xf32> to vector<8x32xf32>
    %47 = arith.negf %46 : vector<8x32xf32>
    %48 = math.exp %47 : vector<8x32xf32>
    %cst_32 = arith.constant 1.000000e+00 : f32
    %49 = vector.broadcast %cst_32 : f32 to vector<8x32xf32>
    %50 = arith.addf %49, %48 : vector<8x32xf32>
    %51 = arith.divf %49, %50 : vector<8x32xf32>
    %52 = arith.mulf %43, %31 : vector<8x32xf32>
    %53 = arith.mulf %37, %45 : vector<8x32xf32>
    %54 = arith.addf %52, %53 : vector<8x32xf32>
    %55 = math.tanh %54 : vector<8x32xf32>
    %56 = arith.mulf %51, %55 : vector<8x32xf32>
    %c0_33 = arith.constant 0 : index
    %c0_34 = arith.constant 0 : index
    %57 = vector.load %arg12[%c0_33, %c0_34] : memref<8x32xf32, #tpu.memory_space<vmem>>, vector<8x32xf32>
    %58 = vector.extract_strided_slice %30 {offsets = [0, 0], sizes = [8, 32], strides = [1, 1]} : vector<8x128xf32> to vector<8x32xf32>
    %59 = arith.negf %58 : vector<8x32xf32>
    %60 = math.exp %59 : vector<8x32xf32>
    %cst_35 = arith.constant 1.000000e+00 : f32
    %61 = vector.broadcast %cst_35 : f32 to vector<8x32xf32>
    %62 = arith.addf %61, %60 : vector<8x32xf32>
    %63 = arith.divf %61, %62 : vector<8x32xf32>
    %64 = vector.extract_strided_slice %30 {offsets = [0, 32], sizes = [8, 32], strides = [1, 1]} : vector<8x128xf32> to vector<8x32xf32>
    %65 = arith.negf %64 : vector<8x32xf32>
    %66 = math.exp %65 : vector<8x32xf32>
    %cst_36 = arith.constant 1.000000e+00 : f32
    %67 = vector.broadcast %cst_36 : f32 to vector<8x32xf32>
    %68 = arith.addf %67, %66 : vector<8x32xf32>
    %69 = arith.divf %67, %68 : vector<8x32xf32>
    %70 = vector.extract_strided_slice %30 {offsets = [0, 64], sizes = [8, 32], strides = [1, 1]} : vector<8x128xf32> to vector<8x32xf32>
    %71 = math.tanh %70 : vector<8x32xf32>
    %72 = vector.extract_strided_slice %30 {offsets = [0, 96], sizes = [8, 32], strides = [1, 1]} : vector<8x128xf32> to vector<8x32xf32>
    %73 = arith.negf %72 : vector<8x32xf32>
    %74 = math.exp %73 : vector<8x32xf32>
    %cst_37 = arith.constant 1.000000e+00 : f32
    %75 = vector.broadcast %cst_37 : f32 to vector<8x32xf32>
    %76 = arith.addf %75, %74 : vector<8x32xf32>
    %77 = arith.divf %75, %76 : vector<8x32xf32>
    %78 = arith.mulf %69, %57 : vector<8x32xf32>
    %79 = arith.mulf %63, %71 : vector<8x32xf32>
    %80 = arith.addf %78, %79 : vector<8x32xf32>
    %81 = math.tanh %80 : vector<8x32xf32>
    %82 = arith.mulf %77, %81 : vector<8x32xf32>
    %c0_38 = arith.constant 0 : index
    %c0_39 = arith.constant 0 : index
    %83 = vector.load %arg9[%c0_38, %c0_39] : memref<8x32xf32, #tpu.memory_space<vmem>>, vector<8x32xf32>
    tpu.vector_store %arg9[%c0_38, %c0_39], %56 {strides = array<i32>} : memref<8x32xf32, #tpu.memory_space<vmem>>, vector<8x32xf32>,
    %c0_40 = arith.constant 0 : index
    %c0_41 = arith.constant 0 : index
    %84 = vector.load %arg10[%c0_40, %c0_41] : memref<8x32xf32, #tpu.memory_space<vmem>>, vector<8x32xf32>
    tpu.vector_store %arg10[%c0_40, %c0_41], %54 {strides = array<i32>} : memref<8x32xf32, #tpu.memory_space<vmem>>, vector<8x32xf32>,
    %c0_42 = arith.constant 0 : index
    %c0_43 = arith.constant 0 : index
    %85 = vector.load %arg11[%c0_42, %c0_43] : memref<8x32xf32, #tpu.memory_space<vmem>>, vector<8x32xf32>
    tpu.vector_store %arg11[%c0_42, %c0_43], %82 {strides = array<i32>} : memref<8x32xf32, #tpu.memory_space<vmem>>, vector<8x32xf32>,
    %c0_44 = arith.constant 0 : index
    %c0_45 = arith.constant 0 : index
    %86 = vector.load %arg12[%c0_44, %c0_45] : memref<8x32xf32, #tpu.memory_space<vmem>>, vector<8x32xf32>
    tpu.vector_store %arg12[%c0_44, %c0_45], %80 {strides = array<i32>} : memref<8x32xf32, #tpu.memory_space<vmem>>, vector<8x32xf32>,
    %87 = arith.index_cast %c0_i32 : i32 to index
    %c0_46 = arith.constant 0 : index
    %c0_47 = arith.constant 0 : index
    %88 = vector.load %arg6[%87, %c0_46, %c0_47] : memref<8x8x64xf32, #tpu.memory_space<vmem>>, vector<1x8x32xf32>
    %89 = vector.shape_cast %88 : vector<1x8x32xf32> to vector<8x32xf32>
    %90 = vector.shape_cast %56 : vector<8x32xf32> to vector<1x8x32xf32>
    tpu.vector_store %arg6[%87, %c0_46, %c0_47], %90 {strides = array<i32>} : memref<8x8x64xf32, #tpu.memory_space<vmem>>, vector<1x8x32xf32>,
    %c7_i32_48 = arith.constant 7 : i32
    %91 = arith.subi %c7_i32_48, %c0_i32 : i32
    %92 = arith.index_cast %91 : i32 to index
    %c0_49 = arith.constant 0 : index
    %c32 = arith.constant 32 : index
    %93 = vector.load %arg6[%92, %c0_49, %c32] : memref<8x8x64xf32, #tpu.memory_space<vmem>>, vector<1x8x32xf32>
    %94 = vector.shape_cast %93 : vector<1x8x32xf32> to vector<8x32xf32>
    %95 = vector.shape_cast %82 : vector<8x32xf32> to vector<1x8x32xf32>
    tpu.vector_store %arg6[%92, %c0_49, %c32], %95 {strides = array<i32>} : memref<8x8x64xf32, #tpu.memory_space<vmem>>, vector<1x8x32xf32>,
    %c1_i32 = arith.constant 1 : i32
    %96 = arith.index_cast %c1_i32 : i32 to index
    %c0_50 = arith.constant 0 : index
    %c0_51 = arith.constant 0 : index
    %97 = vector.load %arg1[%96, %c0_50, %c0_51] : memref<8x8x16xf32, #tpu.memory_space<vmem>>, vector<1x8x16xf32>
    %98 = vector.shape_cast %97 : vector<1x8x16xf32> to vector<8x16xf32>
    %c7_i32_52 = arith.constant 7 : i32
    %99 = arith.subi %c7_i32_52, %c1_i32 : i32
    %100 = arith.index_cast %99 : i32 to index
    %c0_53 = arith.constant 0 : index
    %c0_54 = arith.constant 0 : index
    %101 = vector.load %arg1[%100, %c0_53, %c0_54] : memref<8x8x16xf32, #tpu.memory_space<vmem>>, vector<1x8x16xf32>
    %102 = vector.shape_cast %101 : vector<1x8x16xf32> to vector<8x16xf32>
    %c0_55 = arith.constant 0 : index
    %c0_56 = arith.constant 0 : index
    %103 = vector.load %arg9[%c0_55, %c0_56] : memref<8x32xf32, #tpu.memory_space<vmem>>, vector<8x32xf32>
    %104 = tpu.concatenate %98, %103 in 1 : vector<8x16xf32>, vector<8x32xf32> -> vector<8x48xf32>
    %105 = arith.truncf %104 : vector<8x48xf32> to vector<8x48xbf16>
    %c0_57 = arith.constant 0 : index
    %c0_58 = arith.constant 0 : index
    %106 = vector.load %arg11[%c0_57, %c0_58] : memref<8x32xf32, #tpu.memory_space<vmem>>, vector<8x32xf32>
    %107 = tpu.concatenate %102, %106 in 1 : vector<8x16xf32>, vector<8x32xf32> -> vector<8x48xf32>
    %108 = arith.truncf %107 : vector<8x48xf32> to vector<8x48xbf16>
    %cst_59 = arith.constant dense<0.000000e+00> : vector<8x128xf32>
    %109 = tpu.matmul %105, %8, %cst_59 {dimension_numbers = #tpu.dot_dimension_numbers<[1], [0], [0], [1], [0, 0, 1, 1], [], []>} : vector<8x48xbf16>, vector<48x128xbf16>, vector<8x128xf32> -> vector<8x128xf32>
    %110 = vector.broadcast %10 : vector<1x128xf32> to vector<8x128xf32>
    %111 = arith.addf %109, %110 : vector<8x128xf32>
    %cst_60 = arith.constant dense<0.000000e+00> : vector<8x128xf32>
    %112 = tpu.matmul %108, %9, %cst_60 {dimension_numbers = #tpu.dot_dimension_numbers<[1], [0], [0], [1], [0, 0, 1, 1], [], []>} : vector<8x48xbf16>, vector<48x128xbf16>, vector<8x128xf32> -> vector<8x128xf32>
    %113 = vector.broadcast %11 : vector<1x128xf32> to vector<8x128xf32>
    %114 = arith.addf %112, %113 : vector<8x128xf32>
    %c0_61 = arith.constant 0 : index
    %c0_62 = arith.constant 0 : index
    %115 = vector.load %arg10[%c0_61, %c0_62] : memref<8x32xf32, #tpu.memory_space<vmem>>, vector<8x32xf32>
    %116 = vector.extract_strided_slice %111 {offsets = [0, 0], sizes = [8, 32], strides = [1, 1]} : vector<8x128xf32> to vector<8x32xf32>
    %117 = arith.negf %116 : vector<8x32xf32>
    %118 = math.exp %117 : vector<8x32xf32>
    %cst_63 = arith.constant 1.000000e+00 : f32
    %119 = vector.broadcast %cst_63 : f32 to vector<8x32xf32>
    %120 = arith.addf %119, %118 : vector<8x32xf32>
    %121 = arith.divf %119, %120 : vector<8x32xf32>
    %122 = vector.extract_strided_slice %111 {offsets = [0, 32], sizes = [8, 32], strides = [1, 1]} : vector<8x128xf32> to vector<8x32xf32>
    %123 = arith.negf %122 : vector<8x32xf32>
    %124 = math.exp %123 : vector<8x32xf32>
    %cst_64 = arith.constant 1.000000e+00 : f32
    %125 = vector.broadcast %cst_64 : f32 to vector<8x32xf32>
    %126 = arith.addf %125, %124 : vector<8x32xf32>
    %127 = arith.divf %125, %126 : vector<8x32xf32>
    %128 = vector.extract_strided_slice %111 {offsets = [0, 64], sizes = [8, 32], strides = [1, 1]} : vector<8x128xf32> to vector<8x32xf32>
    %129 = math.tanh %128 : vector<8x32xf32>
    %130 = vector.extract_strided_slice %111 {offsets = [0, 96], sizes = [8, 32], strides = [1, 1]} : vector<8x128xf32> to vector<8x32xf32>
    %131 = arith.negf %130 : vector<8x32xf32>
    %132 = math.exp %131 : vector<8x32xf32>
    %cst_65 = arith.constant 1.000000e+00 : f32
    %133 = vector.broadcast %cst_65 : f32 to vector<8x32xf32>
    %134 = arith.addf %133, %132 : vector<8x32xf32>
    %135 = arith.divf %133, %134 : vector<8x32xf32>
    %136 = arith.mulf %127, %115 : vector<8x32xf32>
    %137 = arith.mulf %121, %129 : vector<8x32xf32>
    %138 = arith.addf %136, %137 : vector<8x32xf32>
    %139 = math.tanh %138 : vector<8x32xf32>
    %140 = arith.mulf %135, %139 : vector<8x32xf32>
    %c0_66 = arith.constant 0 : index
    %c0_67 = arith.constant 0 : index
    %141 = vector.load %arg12[%c0_66, %c0_67] : memref<8x32xf32, #tpu.memory_space<vmem>>, vector<8x32xf32>
    %142 = vector.extract_strided_slice %114 {offsets = [0, 0], sizes = [8, 32], strides = [1, 1]} : vector<8x128xf32> to vector<8x32xf32>
    %143 = arith.negf %142 : vector<8x32xf32>
    %144 = math.exp %143 : vector<8x32xf32>
    %cst_68 = arith.constant 1.000000e+00 : f32
    %145 = vector.broadcast %cst_68 : f32 to vector<8x32xf32>
    %146 = arith.addf %145, %144 : vector<8x32xf32>
    %147 = arith.divf %145, %146 : vector<8x32xf32>
    %148 = vector.extract_strided_slice %114 {offsets = [0, 32], sizes = [8, 32], strides = [1, 1]} : vector<8x128xf32> to vector<8x32xf32>
    %149 = arith.negf %148 : vector<8x32xf32>
    %150 = math.exp %149 : vector<8x32xf32>
    %cst_69 = arith.constant 1.000000e+00 : f32
    %151 = vector.broadcast %cst_69 : f32 to vector<8x32xf32>
    %152 = arith.addf %151, %150 : vector<8x32xf32>
    %153 = arith.divf %151, %152 : vector<8x32xf32>
    %154 = vector.extract_strided_slice %114 {offsets = [0, 64], sizes = [8, 32], strides = [1, 1]} : vector<8x128xf32> to vector<8x32xf32>
    %155 = math.tanh %154 : vector<8x32xf32>
    %156 = vector.extract_strided_slice %114 {offsets = [0, 96], sizes = [8, 32], strides = [1, 1]} : vector<8x128xf32> to vector<8x32xf32>
    %157 = arith.negf %156 : vector<8x32xf32>
    %158 = math.exp %157 : vector<8x32xf32>
    %cst_70 = arith.constant 1.000000e+00 : f32
    %159 = vector.broadcast %cst_70 : f32 to vector<8x32xf32>
    %160 = arith.addf %159, %158 : vector<8x32xf32>
    %161 = arith.divf %159, %160 : vector<8x32xf32>
    %162 = arith.mulf %153, %141 : vector<8x32xf32>
    %163 = arith.mulf %147, %155 : vector<8x32xf32>
    %164 = arith.addf %162, %163 : vector<8x32xf32>
    %165 = math.tanh %164 : vector<8x32xf32>
    %166 = arith.mulf %161, %165 : vector<8x32xf32>
    %c0_71 = arith.constant 0 : index
    %c0_72 = arith.constant 0 : index
    %167 = vector.load %arg9[%c0_71, %c0_72] : memref<8x32xf32, #tpu.memory_space<vmem>>, vector<8x32xf32>
    tpu.vector_store %arg9[%c0_71, %c0_72], %140 {strides = array<i32>} : memref<8x32xf32, #tpu.memory_space<vmem>>, vector<8x32xf32>,
    %c0_73 = arith.constant 0 : index
    %c0_74 = arith.constant 0 : index
    %168 = vector.load %arg10[%c0_73, %c0_74] : memref<8x32xf32, #tpu.memory_space<vmem>>, vector<8x32xf32>
    tpu.vector_store %arg10[%c0_73, %c0_74], %138 {strides = array<i32>} : memref<8x32xf32, #tpu.memory_space<vmem>>, vector<8x32xf32>,
    %c0_75 = arith.constant 0 : index
    %c0_76 = arith.constant 0 : index
    %169 = vector.load %arg11[%c0_75, %c0_76] : memref<8x32xf32, #tpu.memory_space<vmem>>, vector<8x32xf32>
    tpu.vector_store %arg11[%c0_75, %c0_76], %166 {strides = array<i32>} : memref<8x32xf32, #tpu.memory_space<vmem>>, vector<8x32xf32>,
    %c0_77 = arith.constant 0 : index
    %c0_78 = arith.constant 0 : index
    %170 = vector.load %arg12[%c0_77, %c0_78] : memref<8x32xf32, #tpu.memory_space<vmem>>, vector<8x32xf32>
    tpu.vector_store %arg12[%c0_77, %c0_78], %164 {strides = array<i32>} : memref<8x32xf32, #tpu.memory_space<vmem>>, vector<8x32xf32>,
    %171 = arith.index_cast %c1_i32 : i32 to index
    %c0_79 = arith.constant 0 : index
    %c0_80 = arith.constant 0 : index
    %172 = vector.load %arg6[%171, %c0_79, %c0_80] : memref<8x8x64xf32, #tpu.memory_space<vmem>>, vector<1x8x32xf32>
    %173 = vector.shape_cast %172 : vector<1x8x32xf32> to vector<8x32xf32>
    %174 = vector.shape_cast %140 : vector<8x32xf32> to vector<1x8x32xf32>
    tpu.vector_store %arg6[%171, %c0_79, %c0_80], %174 {strides = array<i32>} : memref<8x8x64xf32, #tpu.memory_space<vmem>>, vector<1x8x32xf32>,
    %c7_i32_81 = arith.constant 7 : i32
    %175 = arith.subi %c7_i32_81, %c1_i32 : i32
    %176 = arith.index_cast %175 : i32 to index
    %c0_82 = arith.constant 0 : index
    %c32_83 = arith.constant 32 : index
    %177 = vector.load %arg6[%176, %c0_82, %c32_83] : memref<8x8x64xf32, #tpu.memory_space<vmem>>, vector<1x8x32xf32>
    %178 = vector.shape_cast %177 : vector<1x8x32xf32> to vector<8x32xf32>
    %179 = vector.shape_cast %166 : vector<8x32xf32> to vector<1x8x32xf32>
    tpu.vector_store %arg6[%176, %c0_82, %c32_83], %179 {strides = array<i32>} : memref<8x8x64xf32, #tpu.memory_space<vmem>>, vector<1x8x32xf32>,
    %c2_i32 = arith.constant 2 : i32
    %180 = arith.index_cast %c2_i32 : i32 to index
    %c0_84 = arith.constant 0 : index
    %c0_85 = arith.constant 0 : index
    %181 = vector.load %arg1[%180, %c0_84, %c0_85] : memref<8x8x16xf32, #tpu.memory_space<vmem>>, vector<1x8x16xf32>
    %182 = vector.shape_cast %181 : vector<1x8x16xf32> to vector<8x16xf32>
    %c7_i32_86 = arith.constant 7 : i32
    %183 = arith.subi %c7_i32_86, %c2_i32 : i32
    %184 = arith.index_cast %183 : i32 to index
    %c0_87 = arith.constant 0 : index
    %c0_88 = arith.constant 0 : index
    %185 = vector.load %arg1[%184, %c0_87, %c0_88] : memref<8x8x16xf32, #tpu.memory_space<vmem>>, vector<1x8x16xf32>
    %186 = vector.shape_cast %185 : vector<1x8x16xf32> to vector<8x16xf32>
    %c0_89 = arith.constant 0 : index
    %c0_90 = arith.constant 0 : index
    %187 = vector.load %arg9[%c0_89, %c0_90] : memref<8x32xf32, #tpu.memory_space<vmem>>, vector<8x32xf32>
    %188 = tpu.concatenate %182, %187 in 1 : vector<8x16xf32>, vector<8x32xf32> -> vector<8x48xf32>
    %189 = arith.truncf %188 : vector<8x48xf32> to vector<8x48xbf16>
    %c0_91 = arith.constant 0 : index
    %c0_92 = arith.constant 0 : index
    %190 = vector.load %arg11[%c0_91, %c0_92] : memref<8x32xf32, #tpu.memory_space<vmem>>, vector<8x32xf32>
    %191 = tpu.concatenate %186, %190 in 1 : vector<8x16xf32>, vector<8x32xf32> -> vector<8x48xf32>
    %192 = arith.truncf %191 : vector<8x48xf32> to vector<8x48xbf16>
    %cst_93 = arith.constant dense<0.000000e+00> : vector<8x128xf32>
    %193 = tpu.matmul %189, %8, %cst_93 {dimension_numbers = #tpu.dot_dimension_numbers<[1], [0], [0], [1], [0, 0, 1, 1], [], []>} : vector<8x48xbf16>, vector<48x128xbf16>, vector<8x128xf32> -> vector<8x128xf32>
    %194 = vector.broadcast %10 : vector<1x128xf32> to vector<8x128xf32>
    %195 = arith.addf %193, %194 : vector<8x128xf32>
    %cst_94 = arith.constant dense<0.000000e+00> : vector<8x128xf32>
    %196 = tpu.matmul %192, %9, %cst_94 {dimension_numbers = #tpu.dot_dimension_numbers<[1], [0], [0], [1], [0, 0, 1, 1], [], []>} : vector<8x48xbf16>, vector<48x128xbf16>, vector<8x128xf32> -> vector<8x128xf32>
    %197 = vector.broadcast %11 : vector<1x128xf32> to vector<8x128xf32>
    %198 = arith.addf %196, %197 : vector<8x128xf32>
    %c0_95 = arith.constant 0 : index
    %c0_96 = arith.constant 0 : index
    %199 = vector.load %arg10[%c0_95, %c0_96] : memref<8x32xf32, #tpu.memory_space<vmem>>, vector<8x32xf32>
    %200 = vector.extract_strided_slice %195 {offsets = [0, 0], sizes = [8, 32], strides = [1, 1]} : vector<8x128xf32> to vector<8x32xf32>
    %201 = arith.negf %200 : vector<8x32xf32>
    %202 = math.exp %201 : vector<8x32xf32>
    %cst_97 = arith.constant 1.000000e+00 : f32
    %203 = vector.broadcast %cst_97 : f32 to vector<8x32xf32>
    %204 = arith.addf %203, %202 : vector<8x32xf32>
    %205 = arith.divf %203, %204 : vector<8x32xf32>
    %206 = vector.extract_strided_slice %195 {offsets = [0, 32], sizes = [8, 32], strides = [1, 1]} : vector<8x128xf32> to vector<8x32xf32>
    %207 = arith.negf %206 : vector<8x32xf32>
    %208 = math.exp %207 : vector<8x32xf32>
    %cst_98 = arith.constant 1.000000e+00 : f32
    %209 = vector.broadcast %cst_98 : f32 to vector<8x32xf32>
    %210 = arith.addf %209, %208 : vector<8x32xf32>
    %211 = arith.divf %209, %210 : vector<8x32xf32>
    %212 = vector.extract_strided_slice %195 {offsets = [0, 64], sizes = [8, 32], strides = [1, 1]} : vector<8x128xf32> to vector<8x32xf32>
    %213 = math.tanh %212 : vector<8x32xf32>
    %214 = vector.extract_strided_slice %195 {offsets = [0, 96], sizes = [8, 32], strides = [1, 1]} : vector<8x128xf32> to vector<8x32xf32>
    %215 = arith.negf %214 : vector<8x32xf32>
    %216 = math.exp %215 : vector<8x32xf32>
    %cst_99 = arith.constant 1.000000e+00 : f32
    %217 = vector.broadcast %cst_99 : f32 to vector<8x32xf32>
    %218 = arith.addf %217, %216 : vector<8x32xf32>
    %219 = arith.divf %217, %218 : vector<8x32xf32>
    %220 = arith.mulf %211, %199 : vector<8x32xf32>
    %221 = arith.mulf %205, %213 : vector<8x32xf32>
    %222 = arith.addf %220, %221 : vector<8x32xf32>
    %223 = math.tanh %222 : vector<8x32xf32>
    %224 = arith.mulf %219, %223 : vector<8x32xf32>
    %c0_100 = arith.constant 0 : index
    %c0_101 = arith.constant 0 : index
    %225 = vector.load %arg12[%c0_100, %c0_101] : memref<8x32xf32, #tpu.memory_space<vmem>>, vector<8x32xf32>
    %226 = vector.extract_strided_slice %198 {offsets = [0, 0], sizes = [8, 32], strides = [1, 1]} : vector<8x128xf32> to vector<8x32xf32>
    %227 = arith.negf %226 : vector<8x32xf32>
    %228 = math.exp %227 : vector<8x32xf32>
    %cst_102 = arith.constant 1.000000e+00 : f32
    %229 = vector.broadcast %cst_102 : f32 to vector<8x32xf32>
    %230 = arith.addf %229, %228 : vector<8x32xf32>
    %231 = arith.divf %229, %230 : vector<8x32xf32>
    %232 = vector.extract_strided_slice %198 {offsets = [0, 32], sizes = [8, 32], strides = [1, 1]} : vector<8x128xf32> to vector<8x32xf32>
    %233 = arith.negf %232 : vector<8x32xf32>
    %234 = math.exp %233 : vector<8x32xf32>
    %cst_103 = arith.constant 1.000000e+00 : f32
    %235 = vector.broadcast %cst_103 : f32 to vector<8x32xf32>
    %236 = arith.addf %235, %234 : vector<8x32xf32>
    %237 = arith.divf %235, %236 : vector<8x32xf32>
    %238 = vector.extract_strided_slice %198 {offsets = [0, 64], sizes = [8, 32], strides = [1, 1]} : vector<8x128xf32> to vector<8x32xf32>
    %239 = math.tanh %238 : vector<8x32xf32>
    %240 = vector.extract_strided_slice %198 {offsets = [0, 96], sizes = [8, 32], strides = [1, 1]} : vector<8x128xf32> to vector<8x32xf32>
    %241 = arith.negf %240 : vector<8x32xf32>
    %242 = math.exp %241 : vector<8x32xf32>
    %cst_104 = arith.constant 1.000000e+00 : f32
    %243 = vector.broadcast %cst_104 : f32 to vector<8x32xf32>
    %244 = arith.addf %243, %242 : vector<8x32xf32>
    %245 = arith.divf %243, %244 : vector<8x32xf32>
    %246 = arith.mulf %237, %225 : vector<8x32xf32>
    %247 = arith.mulf %231, %239 : vector<8x32xf32>
    %248 = arith.addf %246, %247 : vector<8x32xf32>
    %249 = math.tanh %248 : vector<8x32xf32>
    %250 = arith.mulf %245, %249 : vector<8x32xf32>
    %c0_105 = arith.constant 0 : index
    %c0_106 = arith.constant 0 : index
    %251 = vector.load %arg9[%c0_105, %c0_106] : memref<8x32xf32, #tpu.memory_space<vmem>>, vector<8x32xf32>
    tpu.vector_store %arg9[%c0_105, %c0_106], %224 {strides = array<i32>} : memref<8x32xf32, #tpu.memory_space<vmem>>, vector<8x32xf32>,
    %c0_107 = arith.constant 0 : index
    %c0_108 = arith.constant 0 : index
    %252 = vector.load %arg10[%c0_107, %c0_108] : memref<8x32xf32, #tpu.memory_space<vmem>>, vector<8x32xf32>
    tpu.vector_store %arg10[%c0_107, %c0_108], %222 {strides = array<i32>} : memref<8x32xf32, #tpu.memory_space<vmem>>, vector<8x32xf32>,
    %c0_109 = arith.constant 0 : index
    %c0_110 = arith.constant 0 : index
    %253 = vector.load %arg11[%c0_109, %c0_110] : memref<8x32xf32, #tpu.memory_space<vmem>>, vector<8x32xf32>
    tpu.vector_store %arg11[%c0_109, %c0_110], %250 {strides = array<i32>} : memref<8x32xf32, #tpu.memory_space<vmem>>, vector<8x32xf32>,
    %c0_111 = arith.constant 0 : index
    %c0_112 = arith.constant 0 : index
    %254 = vector.load %arg12[%c0_111, %c0_112] : memref<8x32xf32, #tpu.memory_space<vmem>>, vector<8x32xf32>
    tpu.vector_store %arg12[%c0_111, %c0_112], %248 {strides = array<i32>} : memref<8x32xf32, #tpu.memory_space<vmem>>, vector<8x32xf32>,
    %255 = arith.index_cast %c2_i32 : i32 to index
    %c0_113 = arith.constant 0 : index
    %c0_114 = arith.constant 0 : index
    %256 = vector.load %arg6[%255, %c0_113, %c0_114] : memref<8x8x64xf32, #tpu.memory_space<vmem>>, vector<1x8x32xf32>
    %257 = vector.shape_cast %256 : vector<1x8x32xf32> to vector<8x32xf32>
    %258 = vector.shape_cast %224 : vector<8x32xf32> to vector<1x8x32xf32>
    tpu.vector_store %arg6[%255, %c0_113, %c0_114], %258 {strides = array<i32>} : memref<8x8x64xf32, #tpu.memory_space<vmem>>, vector<1x8x32xf32>,
    %c7_i32_115 = arith.constant 7 : i32
    %259 = arith.subi %c7_i32_115, %c2_i32 : i32
    %260 = arith.index_cast %259 : i32 to index
    %c0_116 = arith.constant 0 : index
    %c32_117 = arith.constant 32 : index
    %261 = vector.load %arg6[%260, %c0_116, %c32_117] : memref<8x8x64xf32, #tpu.memory_space<vmem>>, vector<1x8x32xf32>
    %262 = vector.shape_cast %261 : vector<1x8x32xf32> to vector<8x32xf32>
    %263 = vector.shape_cast %250 : vector<8x32xf32> to vector<1x8x32xf32>
    tpu.vector_store %arg6[%260, %c0_116, %c32_117], %263 {strides = array<i32>} : memref<8x8x64xf32, #tpu.memory_space<vmem>>, vector<1x8x32xf32>,
    %c3_i32 = arith.constant 3 : i32
    %264 = arith.index_cast %c3_i32 : i32 to index
    %c0_118 = arith.constant 0 : index
    %c0_119 = arith.constant 0 : index
    %265 = vector.load %arg1[%264, %c0_118, %c0_119] : memref<8x8x16xf32, #tpu.memory_space<vmem>>, vector<1x8x16xf32>
    %266 = vector.shape_cast %265 : vector<1x8x16xf32> to vector<8x16xf32>
    %c7_i32_120 = arith.constant 7 : i32
    %267 = arith.subi %c7_i32_120, %c3_i32 : i32
    %268 = arith.index_cast %267 : i32 to index
    %c0_121 = arith.constant 0 : index
    %c0_122 = arith.constant 0 : index
    %269 = vector.load %arg1[%268, %c0_121, %c0_122] : memref<8x8x16xf32, #tpu.memory_space<vmem>>, vector<1x8x16xf32>
    %270 = vector.shape_cast %269 : vector<1x8x16xf32> to vector<8x16xf32>
    %c0_123 = arith.constant 0 : index
    %c0_124 = arith.constant 0 : index
    %271 = vector.load %arg9[%c0_123, %c0_124] : memref<8x32xf32, #tpu.memory_space<vmem>>, vector<8x32xf32>
    %272 = tpu.concatenate %266, %271 in 1 : vector<8x16xf32>, vector<8x32xf32> -> vector<8x48xf32>
    %273 = arith.truncf %272 : vector<8x48xf32> to vector<8x48xbf16>
    %c0_125 = arith.constant 0 : index
    %c0_126 = arith.constant 0 : index
    %274 = vector.load %arg11[%c0_125, %c0_126] : memref<8x32xf32, #tpu.memory_space<vmem>>, vector<8x32xf32>
    %275 = tpu.concatenate %270, %274 in 1 : vector<8x16xf32>, vector<8x32xf32> -> vector<8x48xf32>
    %276 = arith.truncf %275 : vector<8x48xf32> to vector<8x48xbf16>
    %cst_127 = arith.constant dense<0.000000e+00> : vector<8x128xf32>
    %277 = tpu.matmul %273, %8, %cst_127 {dimension_numbers = #tpu.dot_dimension_numbers<[1], [0], [0], [1], [0, 0, 1, 1], [], []>} : vector<8x48xbf16>, vector<48x128xbf16>, vector<8x128xf32> -> vector<8x128xf32>
    %278 = vector.broadcast %10 : vector<1x128xf32> to vector<8x128xf32>
    %279 = arith.addf %277, %278 : vector<8x128xf32>
    %cst_128 = arith.constant dense<0.000000e+00> : vector<8x128xf32>
    %280 = tpu.matmul %276, %9, %cst_128 {dimension_numbers = #tpu.dot_dimension_numbers<[1], [0], [0], [1], [0, 0, 1, 1], [], []>} : vector<8x48xbf16>, vector<48x128xbf16>, vector<8x128xf32> -> vector<8x128xf32>
    %281 = vector.broadcast %11 : vector<1x128xf32> to vector<8x128xf32>
    %282 = arith.addf %280, %281 : vector<8x128xf32>
    %c0_129 = arith.constant 0 : index
    %c0_130 = arith.constant 0 : index
    %283 = vector.load %arg10[%c0_129, %c0_130] : memref<8x32xf32, #tpu.memory_space<vmem>>, vector<8x32xf32>
    %284 = vector.extract_strided_slice %279 {offsets = [0, 0], sizes = [8, 32], strides = [1, 1]} : vector<8x128xf32> to vector<8x32xf32>
    %285 = arith.negf %284 : vector<8x32xf32>
    %286 = math.exp %285 : vector<8x32xf32>
    %cst_131 = arith.constant 1.000000e+00 : f32
    %287 = vector.broadcast %cst_131 : f32 to vector<8x32xf32>
    %288 = arith.addf %287, %286 : vector<8x32xf32>
    %289 = arith.divf %287, %288 : vector<8x32xf32>
    %290 = vector.extract_strided_slice %279 {offsets = [0, 32], sizes = [8, 32], strides = [1, 1]} : vector<8x128xf32> to vector<8x32xf32>
    %291 = arith.negf %290 : vector<8x32xf32>
    %292 = math.exp %291 : vector<8x32xf32>
    %cst_132 = arith.constant 1.000000e+00 : f32
    %293 = vector.broadcast %cst_132 : f32 to vector<8x32xf32>
    %294 = arith.addf %293, %292 : vector<8x32xf32>
    %295 = arith.divf %293, %294 : vector<8x32xf32>
    %296 = vector.extract_strided_slice %279 {offsets = [0, 64], sizes = [8, 32], strides = [1, 1]} : vector<8x128xf32> to vector<8x32xf32>
    %297 = math.tanh %296 : vector<8x32xf32>
    %298 = vector.extract_strided_slice %279 {offsets = [0, 96], sizes = [8, 32], strides = [1, 1]} : vector<8x128xf32> to vector<8x32xf32>
    %299 = arith.negf %298 : vector<8x32xf32>
    %300 = math.exp %299 : vector<8x32xf32>
    %cst_133 = arith.constant 1.000000e+00 : f32
    %301 = vector.broadcast %cst_133 : f32 to vector<8x32xf32>
    %302 = arith.addf %301, %300 : vector<8x32xf32>
    %303 = arith.divf %301, %302 : vector<8x32xf32>
    %304 = arith.mulf %295, %283 : vector<8x32xf32>
    %305 = arith.mulf %289, %297 : vector<8x32xf32>
    %306 = arith.addf %304, %305 : vector<8x32xf32>
    %307 = math.tanh %306 : vector<8x32xf32>
    %308 = arith.mulf %303, %307 : vector<8x32xf32>
    %c0_134 = arith.constant 0 : index
    %c0_135 = arith.constant 0 : index
    %309 = vector.load %arg12[%c0_134, %c0_135] : memref<8x32xf32, #tpu.memory_space<vmem>>, vector<8x32xf32>
    %310 = vector.extract_strided_slice %282 {offsets = [0, 0], sizes = [8, 32], strides = [1, 1]} : vector<8x128xf32> to vector<8x32xf32>
    %311 = arith.negf %310 : vector<8x32xf32>
    %312 = math.exp %311 : vector<8x32xf32>
    %cst_136 = arith.constant 1.000000e+00 : f32
    %313 = vector.broadcast %cst_136 : f32 to vector<8x32xf32>
    %314 = arith.addf %313, %312 : vector<8x32xf32>
    %315 = arith.divf %313, %314 : vector<8x32xf32>
    %316 = vector.extract_strided_slice %282 {offsets = [0, 32], sizes = [8, 32], strides = [1, 1]} : vector<8x128xf32> to vector<8x32xf32>
    %317 = arith.negf %316 : vector<8x32xf32>
    %318 = math.exp %317 : vector<8x32xf32>
    %cst_137 = arith.constant 1.000000e+00 : f32
    %319 = vector.broadcast %cst_137 : f32 to vector<8x32xf32>
    %320 = arith.addf %319, %318 : vector<8x32xf32>
    %321 = arith.divf %319, %320 : vector<8x32xf32>
    %322 = vector.extract_strided_slice %282 {offsets = [0, 64], sizes = [8, 32], strides = [1, 1]} : vector<8x128xf32> to vector<8x32xf32>
    %323 = math.tanh %322 : vector<8x32xf32>
    %324 = vector.extract_strided_slice %282 {offsets = [0, 96], sizes = [8, 32], strides = [1, 1]} : vector<8x128xf32> to vector<8x32xf32>
    %325 = arith.negf %324 : vector<8x32xf32>
    %326 = math.exp %325 : vector<8x32xf32>
    %cst_138 = arith.constant 1.000000e+00 : f32
    %327 = vector.broadcast %cst_138 : f32 to vector<8x32xf32>
    %328 = arith.addf %327, %326 : vector<8x32xf32>
    %329 = arith.divf %327, %328 : vector<8x32xf32>
    %330 = arith.mulf %321, %309 : vector<8x32xf32>
    %331 = arith.mulf %315, %323 : vector<8x32xf32>
    %332 = arith.addf %330, %331 : vector<8x32xf32>
    %333 = math.tanh %332 : vector<8x32xf32>
    %334 = arith.mulf %329, %333 : vector<8x32xf32>
    %c0_139 = arith.constant 0 : index
    %c0_140 = arith.constant 0 : index
    %335 = vector.load %arg9[%c0_139, %c0_140] : memref<8x32xf32, #tpu.memory_space<vmem>>, vector<8x32xf32>
    tpu.vector_store %arg9[%c0_139, %c0_140], %308 {strides = array<i32>} : memref<8x32xf32, #tpu.memory_space<vmem>>, vector<8x32xf32>,
    %c0_141 = arith.constant 0 : index
    %c0_142 = arith.constant 0 : index
    %336 = vector.load %arg10[%c0_141, %c0_142] : memref<8x32xf32, #tpu.memory_space<vmem>>, vector<8x32xf32>
    tpu.vector_store %arg10[%c0_141, %c0_142], %306 {strides = array<i32>} : memref<8x32xf32, #tpu.memory_space<vmem>>, vector<8x32xf32>,
    %c0_143 = arith.constant 0 : index
    %c0_144 = arith.constant 0 : index
    %337 = vector.load %arg11[%c0_143, %c0_144] : memref<8x32xf32, #tpu.memory_space<vmem>>, vector<8x32xf32>
    tpu.vector_store %arg11[%c0_143, %c0_144], %334 {strides = array<i32>} : memref<8x32xf32, #tpu.memory_space<vmem>>, vector<8x32xf32>,
    %c0_145 = arith.constant 0 : index
    %c0_146 = arith.constant 0 : index
    %338 = vector.load %arg12[%c0_145, %c0_146] : memref<8x32xf32, #tpu.memory_space<vmem>>, vector<8x32xf32>
    tpu.vector_store %arg12[%c0_145, %c0_146], %332 {strides = array<i32>} : memref<8x32xf32, #tpu.memory_space<vmem>>, vector<8x32xf32>,
    %339 = arith.index_cast %c3_i32 : i32 to index
    %c0_147 = arith.constant 0 : index
    %c0_148 = arith.constant 0 : index
    %340 = vector.load %arg6[%339, %c0_147, %c0_148] : memref<8x8x64xf32, #tpu.memory_space<vmem>>, vector<1x8x32xf32>
    %341 = vector.shape_cast %340 : vector<1x8x32xf32> to vector<8x32xf32>
    %342 = vector.shape_cast %308 : vector<8x32xf32> to vector<1x8x32xf32>
    tpu.vector_store %arg6[%339, %c0_147, %c0_148], %342 {strides = array<i32>} : memref<8x8x64xf32, #tpu.memory_space<vmem>>, vector<1x8x32xf32>,
    %c7_i32_149 = arith.constant 7 : i32
    %343 = arith.subi %c7_i32_149, %c3_i32 : i32
    %344 = arith.index_cast %343 : i32 to index
    %c0_150 = arith.constant 0 : index
    %c32_151 = arith.constant 32 : index
    %345 = vector.load %arg6[%344, %c0_150, %c32_151] : memref<8x8x64xf32, #tpu.memory_space<vmem>>, vector<1x8x32xf32>
    %346 = vector.shape_cast %345 : vector<1x8x32xf32> to vector<8x32xf32>
    %347 = vector.shape_cast %334 : vector<8x32xf32> to vector<1x8x32xf32>
    tpu.vector_store %arg6[%344, %c0_150, %c32_151], %347 {strides = array<i32>} : memref<8x8x64xf32, #tpu.memory_space<vmem>>, vector<1x8x32xf32>,
    %c4_i32 = arith.constant 4 : i32
    %348 = arith.index_cast %c4_i32 : i32 to index
    %c0_152 = arith.constant 0 : index
    %c0_153 = arith.constant 0 : index
    %349 = vector.load %arg1[%348, %c0_152, %c0_153] : memref<8x8x16xf32, #tpu.memory_space<vmem>>, vector<1x8x16xf32>
    %350 = vector.shape_cast %349 : vector<1x8x16xf32> to vector<8x16xf32>
    %c7_i32_154 = arith.constant 7 : i32
    %351 = arith.subi %c7_i32_154, %c4_i32 : i32
    %352 = arith.index_cast %351 : i32 to index
    %c0_155 = arith.constant 0 : index
    %c0_156 = arith.constant 0 : index
    %353 = vector.load %arg1[%352, %c0_155, %c0_156] : memref<8x8x16xf32, #tpu.memory_space<vmem>>, vector<1x8x16xf32>
    %354 = vector.shape_cast %353 : vector<1x8x16xf32> to vector<8x16xf32>
    %c0_157 = arith.constant 0 : index
    %c0_158 = arith.constant 0 : index
    %355 = vector.load %arg9[%c0_157, %c0_158] : memref<8x32xf32, #tpu.memory_space<vmem>>, vector<8x32xf32>
    %356 = tpu.concatenate %350, %355 in 1 : vector<8x16xf32>, vector<8x32xf32> -> vector<8x48xf32>
    %357 = arith.truncf %356 : vector<8x48xf32> to vector<8x48xbf16>
    %c0_159 = arith.constant 0 : index
    %c0_160 = arith.constant 0 : index
    %358 = vector.load %arg11[%c0_159, %c0_160] : memref<8x32xf32, #tpu.memory_space<vmem>>, vector<8x32xf32>
    %359 = tpu.concatenate %354, %358 in 1 : vector<8x16xf32>, vector<8x32xf32> -> vector<8x48xf32>
    %360 = arith.truncf %359 : vector<8x48xf32> to vector<8x48xbf16>
    %cst_161 = arith.constant dense<0.000000e+00> : vector<8x128xf32>
    %361 = tpu.matmul %357, %8, %cst_161 {dimension_numbers = #tpu.dot_dimension_numbers<[1], [0], [0], [1], [0, 0, 1, 1], [], []>} : vector<8x48xbf16>, vector<48x128xbf16>, vector<8x128xf32> -> vector<8x128xf32>
    %362 = vector.broadcast %10 : vector<1x128xf32> to vector<8x128xf32>
    %363 = arith.addf %361, %362 : vector<8x128xf32>
    %cst_162 = arith.constant dense<0.000000e+00> : vector<8x128xf32>
    %364 = tpu.matmul %360, %9, %cst_162 {dimension_numbers = #tpu.dot_dimension_numbers<[1], [0], [0], [1], [0, 0, 1, 1], [], []>} : vector<8x48xbf16>, vector<48x128xbf16>, vector<8x128xf32> -> vector<8x128xf32>
    %365 = vector.broadcast %11 : vector<1x128xf32> to vector<8x128xf32>
    %366 = arith.addf %364, %365 : vector<8x128xf32>
    %c0_163 = arith.constant 0 : index
    %c0_164 = arith.constant 0 : index
    %367 = vector.load %arg10[%c0_163, %c0_164] : memref<8x32xf32, #tpu.memory_space<vmem>>, vector<8x32xf32>
    %368 = vector.extract_strided_slice %363 {offsets = [0, 0], sizes = [8, 32], strides = [1, 1]} : vector<8x128xf32> to vector<8x32xf32>
    %369 = arith.negf %368 : vector<8x32xf32>
    %370 = math.exp %369 : vector<8x32xf32>
    %cst_165 = arith.constant 1.000000e+00 : f32
    %371 = vector.broadcast %cst_165 : f32 to vector<8x32xf32>
    %372 = arith.addf %371, %370 : vector<8x32xf32>
    %373 = arith.divf %371, %372 : vector<8x32xf32>
    %374 = vector.extract_strided_slice %363 {offsets = [0, 32], sizes = [8, 32], strides = [1, 1]} : vector<8x128xf32> to vector<8x32xf32>
    %375 = arith.negf %374 : vector<8x32xf32>
    %376 = math.exp %375 : vector<8x32xf32>
    %cst_166 = arith.constant 1.000000e+00 : f32
    %377 = vector.broadcast %cst_166 : f32 to vector<8x32xf32>
    %378 = arith.addf %377, %376 : vector<8x32xf32>
    %379 = arith.divf %377, %378 : vector<8x32xf32>
    %380 = vector.extract_strided_slice %363 {offsets = [0, 64], sizes = [8, 32], strides = [1, 1]} : vector<8x128xf32> to vector<8x32xf32>
    %381 = math.tanh %380 : vector<8x32xf32>
    %382 = vector.extract_strided_slice %363 {offsets = [0, 96], sizes = [8, 32], strides = [1, 1]} : vector<8x128xf32> to vector<8x32xf32>
    %383 = arith.negf %382 : vector<8x32xf32>
    %384 = math.exp %383 : vector<8x32xf32>
    %cst_167 = arith.constant 1.000000e+00 : f32
    %385 = vector.broadcast %cst_167 : f32 to vector<8x32xf32>
    %386 = arith.addf %385, %384 : vector<8x32xf32>
    %387 = arith.divf %385, %386 : vector<8x32xf32>
    %388 = arith.mulf %379, %367 : vector<8x32xf32>
    %389 = arith.mulf %373, %381 : vector<8x32xf32>
    %390 = arith.addf %388, %389 : vector<8x32xf32>
    %391 = math.tanh %390 : vector<8x32xf32>
    %392 = arith.mulf %387, %391 : vector<8x32xf32>
    %c0_168 = arith.constant 0 : index
    %c0_169 = arith.constant 0 : index
    %393 = vector.load %arg12[%c0_168, %c0_169] : memref<8x32xf32, #tpu.memory_space<vmem>>, vector<8x32xf32>
    %394 = vector.extract_strided_slice %366 {offsets = [0, 0], sizes = [8, 32], strides = [1, 1]} : vector<8x128xf32> to vector<8x32xf32>
    %395 = arith.negf %394 : vector<8x32xf32>
    %396 = math.exp %395 : vector<8x32xf32>
    %cst_170 = arith.constant 1.000000e+00 : f32
    %397 = vector.broadcast %cst_170 : f32 to vector<8x32xf32>
    %398 = arith.addf %397, %396 : vector<8x32xf32>
    %399 = arith.divf %397, %398 : vector<8x32xf32>
    %400 = vector.extract_strided_slice %366 {offsets = [0, 32], sizes = [8, 32], strides = [1, 1]} : vector<8x128xf32> to vector<8x32xf32>
    %401 = arith.negf %400 : vector<8x32xf32>
    %402 = math.exp %401 : vector<8x32xf32>
    %cst_171 = arith.constant 1.000000e+00 : f32
    %403 = vector.broadcast %cst_171 : f32 to vector<8x32xf32>
    %404 = arith.addf %403, %402 : vector<8x32xf32>
    %405 = arith.divf %403, %404 : vector<8x32xf32>
    %406 = vector.extract_strided_slice %366 {offsets = [0, 64], sizes = [8, 32], strides = [1, 1]} : vector<8x128xf32> to vector<8x32xf32>
    %407 = math.tanh %406 : vector<8x32xf32>
    %408 = vector.extract_strided_slice %366 {offsets = [0, 96], sizes = [8, 32], strides = [1, 1]} : vector<8x128xf32> to vector<8x32xf32>
    %409 = arith.negf %408 : vector<8x32xf32>
    %410 = math.exp %409 : vector<8x32xf32>
    %cst_172 = arith.constant 1.000000e+00 : f32
    %411 = vector.broadcast %cst_172 : f32 to vector<8x32xf32>
    %412 = arith.addf %411, %410 : vector<8x32xf32>
    %413 = arith.divf %411, %412 : vector<8x32xf32>
    %414 = arith.mulf %405, %393 : vector<8x32xf32>
    %415 = arith.mulf %399, %407 : vector<8x32xf32>
    %416 = arith.addf %414, %415 : vector<8x32xf32>
    %417 = math.tanh %416 : vector<8x32xf32>
    %418 = arith.mulf %413, %417 : vector<8x32xf32>
    %c0_173 = arith.constant 0 : index
    %c0_174 = arith.constant 0 : index
    %419 = vector.load %arg9[%c0_173, %c0_174] : memref<8x32xf32, #tpu.memory_space<vmem>>, vector<8x32xf32>
    tpu.vector_store %arg9[%c0_173, %c0_174], %392 {strides = array<i32>} : memref<8x32xf32, #tpu.memory_space<vmem>>, vector<8x32xf32>,
    %c0_175 = arith.constant 0 : index
    %c0_176 = arith.constant 0 : index
    %420 = vector.load %arg10[%c0_175, %c0_176] : memref<8x32xf32, #tpu.memory_space<vmem>>, vector<8x32xf32>
    tpu.vector_store %arg10[%c0_175, %c0_176], %390 {strides = array<i32>} : memref<8x32xf32, #tpu.memory_space<vmem>>, vector<8x32xf32>,
    %c0_177 = arith.constant 0 : index
    %c0_178 = arith.constant 0 : index
    %421 = vector.load %arg11[%c0_177, %c0_178] : memref<8x32xf32, #tpu.memory_space<vmem>>, vector<8x32xf32>
    tpu.vector_store %arg11[%c0_177, %c0_178], %418 {strides = array<i32>} : memref<8x32xf32, #tpu.memory_space<vmem>>, vector<8x32xf32>,
    %c0_179 = arith.constant 0 : index
    %c0_180 = arith.constant 0 : index
    %422 = vector.load %arg12[%c0_179, %c0_180] : memref<8x32xf32, #tpu.memory_space<vmem>>, vector<8x32xf32>
    tpu.vector_store %arg12[%c0_179, %c0_180], %416 {strides = array<i32>} : memref<8x32xf32, #tpu.memory_space<vmem>>, vector<8x32xf32>,
    %423 = arith.index_cast %c4_i32 : i32 to index
    %c0_181 = arith.constant 0 : index
    %c0_182 = arith.constant 0 : index
    %424 = vector.load %arg6[%423, %c0_181, %c0_182] : memref<8x8x64xf32, #tpu.memory_space<vmem>>, vector<1x8x32xf32>
    %425 = vector.shape_cast %424 : vector<1x8x32xf32> to vector<8x32xf32>
    %426 = vector.shape_cast %392 : vector<8x32xf32> to vector<1x8x32xf32>
    tpu.vector_store %arg6[%423, %c0_181, %c0_182], %426 {strides = array<i32>} : memref<8x8x64xf32, #tpu.memory_space<vmem>>, vector<1x8x32xf32>,
    %c7_i32_183 = arith.constant 7 : i32
    %427 = arith.subi %c7_i32_183, %c4_i32 : i32
    %428 = arith.index_cast %427 : i32 to index
    %c0_184 = arith.constant 0 : index
    %c32_185 = arith.constant 32 : index
    %429 = vector.load %arg6[%428, %c0_184, %c32_185] : memref<8x8x64xf32, #tpu.memory_space<vmem>>, vector<1x8x32xf32>
    %430 = vector.shape_cast %429 : vector<1x8x32xf32> to vector<8x32xf32>
    %431 = vector.shape_cast %418 : vector<8x32xf32> to vector<1x8x32xf32>
    tpu.vector_store %arg6[%428, %c0_184, %c32_185], %431 {strides = array<i32>} : memref<8x8x64xf32, #tpu.memory_space<vmem>>, vector<1x8x32xf32>,
    %c5_i32 = arith.constant 5 : i32
    %432 = arith.index_cast %c5_i32 : i32 to index
    %c0_186 = arith.constant 0 : index
    %c0_187 = arith.constant 0 : index
    %433 = vector.load %arg1[%432, %c0_186, %c0_187] : memref<8x8x16xf32, #tpu.memory_space<vmem>>, vector<1x8x16xf32>
    %434 = vector.shape_cast %433 : vector<1x8x16xf32> to vector<8x16xf32>
    %c7_i32_188 = arith.constant 7 : i32
    %435 = arith.subi %c7_i32_188, %c5_i32 : i32
    %436 = arith.index_cast %435 : i32 to index
    %c0_189 = arith.constant 0 : index
    %c0_190 = arith.constant 0 : index
    %437 = vector.load %arg1[%436, %c0_189, %c0_190] : memref<8x8x16xf32, #tpu.memory_space<vmem>>, vector<1x8x16xf32>
    %438 = vector.shape_cast %437 : vector<1x8x16xf32> to vector<8x16xf32>
    %c0_191 = arith.constant 0 : index
    %c0_192 = arith.constant 0 : index
    %439 = vector.load %arg9[%c0_191, %c0_192] : memref<8x32xf32, #tpu.memory_space<vmem>>, vector<8x32xf32>
    %440 = tpu.concatenate %434, %439 in 1 : vector<8x16xf32>, vector<8x32xf32> -> vector<8x48xf32>
    %441 = arith.truncf %440 : vector<8x48xf32> to vector<8x48xbf16>
    %c0_193 = arith.constant 0 : index
    %c0_194 = arith.constant 0 : index
    %442 = vector.load %arg11[%c0_193, %c0_194] : memref<8x32xf32, #tpu.memory_space<vmem>>, vector<8x32xf32>
    %443 = tpu.concatenate %438, %442 in 1 : vector<8x16xf32>, vector<8x32xf32> -> vector<8x48xf32>
    %444 = arith.truncf %443 : vector<8x48xf32> to vector<8x48xbf16>
    %cst_195 = arith.constant dense<0.000000e+00> : vector<8x128xf32>
    %445 = tpu.matmul %441, %8, %cst_195 {dimension_numbers = #tpu.dot_dimension_numbers<[1], [0], [0], [1], [0, 0, 1, 1], [], []>} : vector<8x48xbf16>, vector<48x128xbf16>, vector<8x128xf32> -> vector<8x128xf32>
    %446 = vector.broadcast %10 : vector<1x128xf32> to vector<8x128xf32>
    %447 = arith.addf %445, %446 : vector<8x128xf32>
    %cst_196 = arith.constant dense<0.000000e+00> : vector<8x128xf32>
    %448 = tpu.matmul %444, %9, %cst_196 {dimension_numbers = #tpu.dot_dimension_numbers<[1], [0], [0], [1], [0, 0, 1, 1], [], []>} : vector<8x48xbf16>, vector<48x128xbf16>, vector<8x128xf32> -> vector<8x128xf32>
    %449 = vector.broadcast %11 : vector<1x128xf32> to vector<8x128xf32>
    %450 = arith.addf %448, %449 : vector<8x128xf32>
    %c0_197 = arith.constant 0 : index
    %c0_198 = arith.constant 0 : index
    %451 = vector.load %arg10[%c0_197, %c0_198] : memref<8x32xf32, #tpu.memory_space<vmem>>, vector<8x32xf32>
    %452 = vector.extract_strided_slice %447 {offsets = [0, 0], sizes = [8, 32], strides = [1, 1]} : vector<8x128xf32> to vector<8x32xf32>
    %453 = arith.negf %452 : vector<8x32xf32>
    %454 = math.exp %453 : vector<8x32xf32>
    %cst_199 = arith.constant 1.000000e+00 : f32
    %455 = vector.broadcast %cst_199 : f32 to vector<8x32xf32>
    %456 = arith.addf %455, %454 : vector<8x32xf32>
    %457 = arith.divf %455, %456 : vector<8x32xf32>
    %458 = vector.extract_strided_slice %447 {offsets = [0, 32], sizes = [8, 32], strides = [1, 1]} : vector<8x128xf32> to vector<8x32xf32>
    %459 = arith.negf %458 : vector<8x32xf32>
    %460 = math.exp %459 : vector<8x32xf32>
    %cst_200 = arith.constant 1.000000e+00 : f32
    %461 = vector.broadcast %cst_200 : f32 to vector<8x32xf32>
    %462 = arith.addf %461, %460 : vector<8x32xf32>
    %463 = arith.divf %461, %462 : vector<8x32xf32>
    %464 = vector.extract_strided_slice %447 {offsets = [0, 64], sizes = [8, 32], strides = [1, 1]} : vector<8x128xf32> to vector<8x32xf32>
    %465 = math.tanh %464 : vector<8x32xf32>
    %466 = vector.extract_strided_slice %447 {offsets = [0, 96], sizes = [8, 32], strides = [1, 1]} : vector<8x128xf32> to vector<8x32xf32>
    %467 = arith.negf %466 : vector<8x32xf32>
    %468 = math.exp %467 : vector<8x32xf32>
    %cst_201 = arith.constant 1.000000e+00 : f32
    %469 = vector.broadcast %cst_201 : f32 to vector<8x32xf32>
    %470 = arith.addf %469, %468 : vector<8x32xf32>
    %471 = arith.divf %469, %470 : vector<8x32xf32>
    %472 = arith.mulf %463, %451 : vector<8x32xf32>
    %473 = arith.mulf %457, %465 : vector<8x32xf32>
    %474 = arith.addf %472, %473 : vector<8x32xf32>
    %475 = math.tanh %474 : vector<8x32xf32>
    %476 = arith.mulf %471, %475 : vector<8x32xf32>
    %c0_202 = arith.constant 0 : index
    %c0_203 = arith.constant 0 : index
    %477 = vector.load %arg12[%c0_202, %c0_203] : memref<8x32xf32, #tpu.memory_space<vmem>>, vector<8x32xf32>
    %478 = vector.extract_strided_slice %450 {offsets = [0, 0], sizes = [8, 32], strides = [1, 1]} : vector<8x128xf32> to vector<8x32xf32>
    %479 = arith.negf %478 : vector<8x32xf32>
    %480 = math.exp %479 : vector<8x32xf32>
    %cst_204 = arith.constant 1.000000e+00 : f32
    %481 = vector.broadcast %cst_204 : f32 to vector<8x32xf32>
    %482 = arith.addf %481, %480 : vector<8x32xf32>
    %483 = arith.divf %481, %482 : vector<8x32xf32>
    %484 = vector.extract_strided_slice %450 {offsets = [0, 32], sizes = [8, 32], strides = [1, 1]} : vector<8x128xf32> to vector<8x32xf32>
    %485 = arith.negf %484 : vector<8x32xf32>
    %486 = math.exp %485 : vector<8x32xf32>
    %cst_205 = arith.constant 1.000000e+00 : f32
    %487 = vector.broadcast %cst_205 : f32 to vector<8x32xf32>
    %488 = arith.addf %487, %486 : vector<8x32xf32>
    %489 = arith.divf %487, %488 : vector<8x32xf32>
    %490 = vector.extract_strided_slice %450 {offsets = [0, 64], sizes = [8, 32], strides = [1, 1]} : vector<8x128xf32> to vector<8x32xf32>
    %491 = math.tanh %490 : vector<8x32xf32>
    %492 = vector.extract_strided_slice %450 {offsets = [0, 96], sizes = [8, 32], strides = [1, 1]} : vector<8x128xf32> to vector<8x32xf32>
    %493 = arith.negf %492 : vector<8x32xf32>
    %494 = math.exp %493 : vector<8x32xf32>
    %cst_206 = arith.constant 1.000000e+00 : f32
    %495 = vector.broadcast %cst_206 : f32 to vector<8x32xf32>
    %496 = arith.addf %495, %494 : vector<8x32xf32>
    %497 = arith.divf %495, %496 : vector<8x32xf32>
    %498 = arith.mulf %489, %477 : vector<8x32xf32>
    %499 = arith.mulf %483, %491 : vector<8x32xf32>
    %500 = arith.addf %498, %499 : vector<8x32xf32>
    %501 = math.tanh %500 : vector<8x32xf32>
    %502 = arith.mulf %497, %501 : vector<8x32xf32>
    %c0_207 = arith.constant 0 : index
    %c0_208 = arith.constant 0 : index
    %503 = vector.load %arg9[%c0_207, %c0_208] : memref<8x32xf32, #tpu.memory_space<vmem>>, vector<8x32xf32>
    tpu.vector_store %arg9[%c0_207, %c0_208], %476 {strides = array<i32>} : memref<8x32xf32, #tpu.memory_space<vmem>>, vector<8x32xf32>,
    %c0_209 = arith.constant 0 : index
    %c0_210 = arith.constant 0 : index
    %504 = vector.load %arg10[%c0_209, %c0_210] : memref<8x32xf32, #tpu.memory_space<vmem>>, vector<8x32xf32>
    tpu.vector_store %arg10[%c0_209, %c0_210], %474 {strides = array<i32>} : memref<8x32xf32, #tpu.memory_space<vmem>>, vector<8x32xf32>,
    %c0_211 = arith.constant 0 : index
    %c0_212 = arith.constant 0 : index
    %505 = vector.load %arg11[%c0_211, %c0_212] : memref<8x32xf32, #tpu.memory_space<vmem>>, vector<8x32xf32>
    tpu.vector_store %arg11[%c0_211, %c0_212], %502 {strides = array<i32>} : memref<8x32xf32, #tpu.memory_space<vmem>>, vector<8x32xf32>,
    %c0_213 = arith.constant 0 : index
    %c0_214 = arith.constant 0 : index
    %506 = vector.load %arg12[%c0_213, %c0_214] : memref<8x32xf32, #tpu.memory_space<vmem>>, vector<8x32xf32>
    tpu.vector_store %arg12[%c0_213, %c0_214], %500 {strides = array<i32>} : memref<8x32xf32, #tpu.memory_space<vmem>>, vector<8x32xf32>,
    %507 = arith.index_cast %c5_i32 : i32 to index
    %c0_215 = arith.constant 0 : index
    %c0_216 = arith.constant 0 : index
    %508 = vector.load %arg6[%507, %c0_215, %c0_216] : memref<8x8x64xf32, #tpu.memory_space<vmem>>, vector<1x8x32xf32>
    %509 = vector.shape_cast %508 : vector<1x8x32xf32> to vector<8x32xf32>
    %510 = vector.shape_cast %476 : vector<8x32xf32> to vector<1x8x32xf32>
    tpu.vector_store %arg6[%507, %c0_215, %c0_216], %510 {strides = array<i32>} : memref<8x8x64xf32, #tpu.memory_space<vmem>>, vector<1x8x32xf32>,
    %c7_i32_217 = arith.constant 7 : i32
    %511 = arith.subi %c7_i32_217, %c5_i32 : i32
    %512 = arith.index_cast %511 : i32 to index
    %c0_218 = arith.constant 0 : index
    %c32_219 = arith.constant 32 : index
    %513 = vector.load %arg6[%512, %c0_218, %c32_219] : memref<8x8x64xf32, #tpu.memory_space<vmem>>, vector<1x8x32xf32>
    %514 = vector.shape_cast %513 : vector<1x8x32xf32> to vector<8x32xf32>
    %515 = vector.shape_cast %502 : vector<8x32xf32> to vector<1x8x32xf32>
    tpu.vector_store %arg6[%512, %c0_218, %c32_219], %515 {strides = array<i32>} : memref<8x8x64xf32, #tpu.memory_space<vmem>>, vector<1x8x32xf32>,
    %c6_i32 = arith.constant 6 : i32
    %516 = arith.index_cast %c6_i32 : i32 to index
    %c0_220 = arith.constant 0 : index
    %c0_221 = arith.constant 0 : index
    %517 = vector.load %arg1[%516, %c0_220, %c0_221] : memref<8x8x16xf32, #tpu.memory_space<vmem>>, vector<1x8x16xf32>
    %518 = vector.shape_cast %517 : vector<1x8x16xf32> to vector<8x16xf32>
    %c7_i32_222 = arith.constant 7 : i32
    %519 = arith.subi %c7_i32_222, %c6_i32 : i32
    %520 = arith.index_cast %519 : i32 to index
    %c0_223 = arith.constant 0 : index
    %c0_224 = arith.constant 0 : index
    %521 = vector.load %arg1[%520, %c0_223, %c0_224] : memref<8x8x16xf32, #tpu.memory_space<vmem>>, vector<1x8x16xf32>
    %522 = vector.shape_cast %521 : vector<1x8x16xf32> to vector<8x16xf32>
    %c0_225 = arith.constant 0 : index
    %c0_226 = arith.constant 0 : index
    %523 = vector.load %arg9[%c0_225, %c0_226] : memref<8x32xf32, #tpu.memory_space<vmem>>, vector<8x32xf32>
    %524 = tpu.concatenate %518, %523 in 1 : vector<8x16xf32>, vector<8x32xf32> -> vector<8x48xf32>
    %525 = arith.truncf %524 : vector<8x48xf32> to vector<8x48xbf16>
    %c0_227 = arith.constant 0 : index
    %c0_228 = arith.constant 0 : index
    %526 = vector.load %arg11[%c0_227, %c0_228] : memref<8x32xf32, #tpu.memory_space<vmem>>, vector<8x32xf32>
    %527 = tpu.concatenate %522, %526 in 1 : vector<8x16xf32>, vector<8x32xf32> -> vector<8x48xf32>
    %528 = arith.truncf %527 : vector<8x48xf32> to vector<8x48xbf16>
    %cst_229 = arith.constant dense<0.000000e+00> : vector<8x128xf32>
    %529 = tpu.matmul %525, %8, %cst_229 {dimension_numbers = #tpu.dot_dimension_numbers<[1], [0], [0], [1], [0, 0, 1, 1], [], []>} : vector<8x48xbf16>, vector<48x128xbf16>, vector<8x128xf32> -> vector<8x128xf32>
    %530 = vector.broadcast %10 : vector<1x128xf32> to vector<8x128xf32>
    %531 = arith.addf %529, %530 : vector<8x128xf32>
    %cst_230 = arith.constant dense<0.000000e+00> : vector<8x128xf32>
    %532 = tpu.matmul %528, %9, %cst_230 {dimension_numbers = #tpu.dot_dimension_numbers<[1], [0], [0], [1], [0, 0, 1, 1], [], []>} : vector<8x48xbf16>, vector<48x128xbf16>, vector<8x128xf32> -> vector<8x128xf32>
    %533 = vector.broadcast %11 : vector<1x128xf32> to vector<8x128xf32>
    %534 = arith.addf %532, %533 : vector<8x128xf32>
    %c0_231 = arith.constant 0 : index
    %c0_232 = arith.constant 0 : index
    %535 = vector.load %arg10[%c0_231, %c0_232] : memref<8x32xf32, #tpu.memory_space<vmem>>, vector<8x32xf32>
    %536 = vector.extract_strided_slice %531 {offsets = [0, 0], sizes = [8, 32], strides = [1, 1]} : vector<8x128xf32> to vector<8x32xf32>
    %537 = arith.negf %536 : vector<8x32xf32>
    %538 = math.exp %537 : vector<8x32xf32>
    %cst_233 = arith.constant 1.000000e+00 : f32
    %539 = vector.broadcast %cst_233 : f32 to vector<8x32xf32>
    %540 = arith.addf %539, %538 : vector<8x32xf32>
    %541 = arith.divf %539, %540 : vector<8x32xf32>
    %542 = vector.extract_strided_slice %531 {offsets = [0, 32], sizes = [8, 32], strides = [1, 1]} : vector<8x128xf32> to vector<8x32xf32>
    %543 = arith.negf %542 : vector<8x32xf32>
    %544 = math.exp %543 : vector<8x32xf32>
    %cst_234 = arith.constant 1.000000e+00 : f32
    %545 = vector.broadcast %cst_234 : f32 to vector<8x32xf32>
    %546 = arith.addf %545, %544 : vector<8x32xf32>
    %547 = arith.divf %545, %546 : vector<8x32xf32>
    %548 = vector.extract_strided_slice %531 {offsets = [0, 64], sizes = [8, 32], strides = [1, 1]} : vector<8x128xf32> to vector<8x32xf32>
    %549 = math.tanh %548 : vector<8x32xf32>
    %550 = vector.extract_strided_slice %531 {offsets = [0, 96], sizes = [8, 32], strides = [1, 1]} : vector<8x128xf32> to vector<8x32xf32>
    %551 = arith.negf %550 : vector<8x32xf32>
    %552 = math.exp %551 : vector<8x32xf32>
    %cst_235 = arith.constant 1.000000e+00 : f32
    %553 = vector.broadcast %cst_235 : f32 to vector<8x32xf32>
    %554 = arith.addf %553, %552 : vector<8x32xf32>
    %555 = arith.divf %553, %554 : vector<8x32xf32>
    %556 = arith.mulf %547, %535 : vector<8x32xf32>
    %557 = arith.mulf %541, %549 : vector<8x32xf32>
    %558 = arith.addf %556, %557 : vector<8x32xf32>
    %559 = math.tanh %558 : vector<8x32xf32>
    %560 = arith.mulf %555, %559 : vector<8x32xf32>
    %c0_236 = arith.constant 0 : index
    %c0_237 = arith.constant 0 : index
    %561 = vector.load %arg12[%c0_236, %c0_237] : memref<8x32xf32, #tpu.memory_space<vmem>>, vector<8x32xf32>
    %562 = vector.extract_strided_slice %534 {offsets = [0, 0], sizes = [8, 32], strides = [1, 1]} : vector<8x128xf32> to vector<8x32xf32>
    %563 = arith.negf %562 : vector<8x32xf32>
    %564 = math.exp %563 : vector<8x32xf32>
    %cst_238 = arith.constant 1.000000e+00 : f32
    %565 = vector.broadcast %cst_238 : f32 to vector<8x32xf32>
    %566 = arith.addf %565, %564 : vector<8x32xf32>
    %567 = arith.divf %565, %566 : vector<8x32xf32>
    %568 = vector.extract_strided_slice %534 {offsets = [0, 32], sizes = [8, 32], strides = [1, 1]} : vector<8x128xf32> to vector<8x32xf32>
    %569 = arith.negf %568 : vector<8x32xf32>
    %570 = math.exp %569 : vector<8x32xf32>
    %cst_239 = arith.constant 1.000000e+00 : f32
    %571 = vector.broadcast %cst_239 : f32 to vector<8x32xf32>
    %572 = arith.addf %571, %570 : vector<8x32xf32>
    %573 = arith.divf %571, %572 : vector<8x32xf32>
    %574 = vector.extract_strided_slice %534 {offsets = [0, 64], sizes = [8, 32], strides = [1, 1]} : vector<8x128xf32> to vector<8x32xf32>
    %575 = math.tanh %574 : vector<8x32xf32>
    %576 = vector.extract_strided_slice %534 {offsets = [0, 96], sizes = [8, 32], strides = [1, 1]} : vector<8x128xf32> to vector<8x32xf32>
    %577 = arith.negf %576 : vector<8x32xf32>
    %578 = math.exp %577 : vector<8x32xf32>
    %cst_240 = arith.constant 1.000000e+00 : f32
    %579 = vector.broadcast %cst_240 : f32 to vector<8x32xf32>
    %580 = arith.addf %579, %578 : vector<8x32xf32>
    %581 = arith.divf %579, %580 : vector<8x32xf32>
    %582 = arith.mulf %573, %561 : vector<8x32xf32>
    %583 = arith.mulf %567, %575 : vector<8x32xf32>
    %584 = arith.addf %582, %583 : vector<8x32xf32>
    %585 = math.tanh %584 : vector<8x32xf32>
    %586 = arith.mulf %581, %585 : vector<8x32xf32>
    %c0_241 = arith.constant 0 : index
    %c0_242 = arith.constant 0 : index
    %587 = vector.load %arg9[%c0_241, %c0_242] : memref<8x32xf32, #tpu.memory_space<vmem>>, vector<8x32xf32>
    tpu.vector_store %arg9[%c0_241, %c0_242], %560 {strides = array<i32>} : memref<8x32xf32, #tpu.memory_space<vmem>>, vector<8x32xf32>,
    %c0_243 = arith.constant 0 : index
    %c0_244 = arith.constant 0 : index
    %588 = vector.load %arg10[%c0_243, %c0_244] : memref<8x32xf32, #tpu.memory_space<vmem>>, vector<8x32xf32>
    tpu.vector_store %arg10[%c0_243, %c0_244], %558 {strides = array<i32>} : memref<8x32xf32, #tpu.memory_space<vmem>>, vector<8x32xf32>,
    %c0_245 = arith.constant 0 : index
    %c0_246 = arith.constant 0 : index
    %589 = vector.load %arg11[%c0_245, %c0_246] : memref<8x32xf32, #tpu.memory_space<vmem>>, vector<8x32xf32>
    tpu.vector_store %arg11[%c0_245, %c0_246], %586 {strides = array<i32>} : memref<8x32xf32, #tpu.memory_space<vmem>>, vector<8x32xf32>,
    %c0_247 = arith.constant 0 : index
    %c0_248 = arith.constant 0 : index
    %590 = vector.load %arg12[%c0_247, %c0_248] : memref<8x32xf32, #tpu.memory_space<vmem>>, vector<8x32xf32>
    tpu.vector_store %arg12[%c0_247, %c0_248], %584 {strides = array<i32>} : memref<8x32xf32, #tpu.memory_space<vmem>>, vector<8x32xf32>,
    %591 = arith.index_cast %c6_i32 : i32 to index
    %c0_249 = arith.constant 0 : index
    %c0_250 = arith.constant 0 : index
    %592 = vector.load %arg6[%591, %c0_249, %c0_250] : memref<8x8x64xf32, #tpu.memory_space<vmem>>, vector<1x8x32xf32>
    %593 = vector.shape_cast %592 : vector<1x8x32xf32> to vector<8x32xf32>
    %594 = vector.shape_cast %560 : vector<8x32xf32> to vector<1x8x32xf32>
    tpu.vector_store %arg6[%591, %c0_249, %c0_250], %594 {strides = array<i32>} : memref<8x8x64xf32, #tpu.memory_space<vmem>>, vector<1x8x32xf32>,
    %c7_i32_251 = arith.constant 7 : i32
    %595 = arith.subi %c7_i32_251, %c6_i32 : i32
    %596 = arith.index_cast %595 : i32 to index
    %c0_252 = arith.constant 0 : index
    %c32_253 = arith.constant 32 : index
    %597 = vector.load %arg6[%596, %c0_252, %c32_253] : memref<8x8x64xf32, #tpu.memory_space<vmem>>, vector<1x8x32xf32>
    %598 = vector.shape_cast %597 : vector<1x8x32xf32> to vector<8x32xf32>
    %599 = vector.shape_cast %586 : vector<8x32xf32> to vector<1x8x32xf32>
    tpu.vector_store %arg6[%596, %c0_252, %c32_253], %599 {strides = array<i32>} : memref<8x8x64xf32, #tpu.memory_space<vmem>>, vector<1x8x32xf32>,
    %c7_i32_254 = arith.constant 7 : i32
    %600 = arith.index_cast %c7_i32_254 : i32 to index
    %c0_255 = arith.constant 0 : index
    %c0_256 = arith.constant 0 : index
    %601 = vector.load %arg1[%600, %c0_255, %c0_256] : memref<8x8x16xf32, #tpu.memory_space<vmem>>, vector<1x8x16xf32>
    %602 = vector.shape_cast %601 : vector<1x8x16xf32> to vector<8x16xf32>
    %c7_i32_257 = arith.constant 7 : i32
    %603 = arith.subi %c7_i32_257, %c7_i32_254 : i32
    %604 = arith.index_cast %603 : i32 to index
    %c0_258 = arith.constant 0 : index
    %c0_259 = arith.constant 0 : index
    %605 = vector.load %arg1[%604, %c0_258, %c0_259] : memref<8x8x16xf32, #tpu.memory_space<vmem>>, vector<1x8x16xf32>
    %606 = vector.shape_cast %605 : vector<1x8x16xf32> to vector<8x16xf32>
    %c0_260 = arith.constant 0 : index
    %c0_261 = arith.constant 0 : index
    %607 = vector.load %arg9[%c0_260, %c0_261] : memref<8x32xf32, #tpu.memory_space<vmem>>, vector<8x32xf32>
    %608 = tpu.concatenate %602, %607 in 1 : vector<8x16xf32>, vector<8x32xf32> -> vector<8x48xf32>
    %609 = arith.truncf %608 : vector<8x48xf32> to vector<8x48xbf16>
    %c0_262 = arith.constant 0 : index
    %c0_263 = arith.constant 0 : index
    %610 = vector.load %arg11[%c0_262, %c0_263] : memref<8x32xf32, #tpu.memory_space<vmem>>, vector<8x32xf32>
    %611 = tpu.concatenate %606, %610 in 1 : vector<8x16xf32>, vector<8x32xf32> -> vector<8x48xf32>
    %612 = arith.truncf %611 : vector<8x48xf32> to vector<8x48xbf16>
    %cst_264 = arith.constant dense<0.000000e+00> : vector<8x128xf32>
    %613 = tpu.matmul %609, %8, %cst_264 {dimension_numbers = #tpu.dot_dimension_numbers<[1], [0], [0], [1], [0, 0, 1, 1], [], []>} : vector<8x48xbf16>, vector<48x128xbf16>, vector<8x128xf32> -> vector<8x128xf32>
    %614 = vector.broadcast %10 : vector<1x128xf32> to vector<8x128xf32>
    %615 = arith.addf %613, %614 : vector<8x128xf32>
    %cst_265 = arith.constant dense<0.000000e+00> : vector<8x128xf32>
    %616 = tpu.matmul %612, %9, %cst_265 {dimension_numbers = #tpu.dot_dimension_numbers<[1], [0], [0], [1], [0, 0, 1, 1], [], []>} : vector<8x48xbf16>, vector<48x128xbf16>, vector<8x128xf32> -> vector<8x128xf32>
    %617 = vector.broadcast %11 : vector<1x128xf32> to vector<8x128xf32>
    %618 = arith.addf %616, %617 : vector<8x128xf32>
    %c0_266 = arith.constant 0 : index
    %c0_267 = arith.constant 0 : index
    %619 = vector.load %arg10[%c0_266, %c0_267] : memref<8x32xf32, #tpu.memory_space<vmem>>, vector<8x32xf32>
    %620 = vector.extract_strided_slice %615 {offsets = [0, 0], sizes = [8, 32], strides = [1, 1]} : vector<8x128xf32> to vector<8x32xf32>
    %621 = arith.negf %620 : vector<8x32xf32>
    %622 = math.exp %621 : vector<8x32xf32>
    %cst_268 = arith.constant 1.000000e+00 : f32
    %623 = vector.broadcast %cst_268 : f32 to vector<8x32xf32>
    %624 = arith.addf %623, %622 : vector<8x32xf32>
    %625 = arith.divf %623, %624 : vector<8x32xf32>
    %626 = vector.extract_strided_slice %615 {offsets = [0, 32], sizes = [8, 32], strides = [1, 1]} : vector<8x128xf32> to vector<8x32xf32>
    %627 = arith.negf %626 : vector<8x32xf32>
    %628 = math.exp %627 : vector<8x32xf32>
    %cst_269 = arith.constant 1.000000e+00 : f32
    %629 = vector.broadcast %cst_269 : f32 to vector<8x32xf32>
    %630 = arith.addf %629, %628 : vector<8x32xf32>
    %631 = arith.divf %629, %630 : vector<8x32xf32>
    %632 = vector.extract_strided_slice %615 {offsets = [0, 64], sizes = [8, 32], strides = [1, 1]} : vector<8x128xf32> to vector<8x32xf32>
    %633 = math.tanh %632 : vector<8x32xf32>
    %634 = vector.extract_strided_slice %615 {offsets = [0, 96], sizes = [8, 32], strides = [1, 1]} : vector<8x128xf32> to vector<8x32xf32>
    %635 = arith.negf %634 : vector<8x32xf32>
    %636 = math.exp %635 : vector<8x32xf32>
    %cst_270 = arith.constant 1.000000e+00 : f32
    %637 = vector.broadcast %cst_270 : f32 to vector<8x32xf32>
    %638 = arith.addf %637, %636 : vector<8x32xf32>
    %639 = arith.divf %637, %638 : vector<8x32xf32>
    %640 = arith.mulf %631, %619 : vector<8x32xf32>
    %641 = arith.mulf %625, %633 : vector<8x32xf32>
    %642 = arith.addf %640, %641 : vector<8x32xf32>
    %643 = math.tanh %642 : vector<8x32xf32>
    %644 = arith.mulf %639, %643 : vector<8x32xf32>
    %c0_271 = arith.constant 0 : index
    %c0_272 = arith.constant 0 : index
    %645 = vector.load %arg12[%c0_271, %c0_272] : memref<8x32xf32, #tpu.memory_space<vmem>>, vector<8x32xf32>
    %646 = vector.extract_strided_slice %618 {offsets = [0, 0], sizes = [8, 32], strides = [1, 1]} : vector<8x128xf32> to vector<8x32xf32>
    %647 = arith.negf %646 : vector<8x32xf32>
    %648 = math.exp %647 : vector<8x32xf32>
    %cst_273 = arith.constant 1.000000e+00 : f32
    %649 = vector.broadcast %cst_273 : f32 to vector<8x32xf32>
    %650 = arith.addf %649, %648 : vector<8x32xf32>
    %651 = arith.divf %649, %650 : vector<8x32xf32>
    %652 = vector.extract_strided_slice %618 {offsets = [0, 32], sizes = [8, 32], strides = [1, 1]} : vector<8x128xf32> to vector<8x32xf32>
    %653 = arith.negf %652 : vector<8x32xf32>
    %654 = math.exp %653 : vector<8x32xf32>
    %cst_274 = arith.constant 1.000000e+00 : f32
    %655 = vector.broadcast %cst_274 : f32 to vector<8x32xf32>
    %656 = arith.addf %655, %654 : vector<8x32xf32>
    %657 = arith.divf %655, %656 : vector<8x32xf32>
    %658 = vector.extract_strided_slice %618 {offsets = [0, 64], sizes = [8, 32], strides = [1, 1]} : vector<8x128xf32> to vector<8x32xf32>
    %659 = math.tanh %658 : vector<8x32xf32>
    %660 = vector.extract_strided_slice %618 {offsets = [0, 96], sizes = [8, 32], strides = [1, 1]} : vector<8x128xf32> to vector<8x32xf32>
    %661 = arith.negf %660 : vector<8x32xf32>
    %662 = math.exp %661 : vector<8x32xf32>
    %cst_275 = arith.constant 1.000000e+00 : f32
    %663 = vector.broadcast %cst_275 : f32 to vector<8x32xf32>
    %664 = arith.addf %663, %662 : vector<8x32xf32>
    %665 = arith.divf %663, %664 : vector<8x32xf32>
    %666 = arith.mulf %657, %645 : vector<8x32xf32>
    %667 = arith.mulf %651, %659 : vector<8x32xf32>
    %668 = arith.addf %666, %667 : vector<8x32xf32>
    %669 = math.tanh %668 : vector<8x32xf32>
    %670 = arith.mulf %665, %669 : vector<8x32xf32>
    %c0_276 = arith.constant 0 : index
    %c0_277 = arith.constant 0 : index
    %671 = vector.load %arg9[%c0_276, %c0_277] : memref<8x32xf32, #tpu.memory_space<vmem>>, vector<8x32xf32>
    tpu.vector_store %arg9[%c0_276, %c0_277], %644 {strides = array<i32>} : memref<8x32xf32, #tpu.memory_space<vmem>>, vector<8x32xf32>,
    %c0_278 = arith.constant 0 : index
    %c0_279 = arith.constant 0 : index
    %672 = vector.load %arg10[%c0_278, %c0_279] : memref<8x32xf32, #tpu.memory_space<vmem>>, vector<8x32xf32>
    tpu.vector_store %arg10[%c0_278, %c0_279], %642 {strides = array<i32>} : memref<8x32xf32, #tpu.memory_space<vmem>>, vector<8x32xf32>,
    %c0_280 = arith.constant 0 : index
    %c0_281 = arith.constant 0 : index
    %673 = vector.load %arg11[%c0_280, %c0_281] : memref<8x32xf32, #tpu.memory_space<vmem>>, vector<8x32xf32>
    tpu.vector_store %arg11[%c0_280, %c0_281], %670 {strides = array<i32>} : memref<8x32xf32, #tpu.memory_space<vmem>>, vector<8x32xf32>,
    %c0_282 = arith.constant 0 : index
    %c0_283 = arith.constant 0 : index
    %674 = vector.load %arg12[%c0_282, %c0_283] : memref<8x32xf32, #tpu.memory_space<vmem>>, vector<8x32xf32>
    tpu.vector_store %arg12[%c0_282, %c0_283], %668 {strides = array<i32>} : memref<8x32xf32, #tpu.memory_space<vmem>>, vector<8x32xf32>,
    %675 = arith.index_cast %c7_i32_254 : i32 to index
    %c0_284 = arith.constant 0 : index
    %c0_285 = arith.constant 0 : index
    %676 = vector.load %arg6[%675, %c0_284, %c0_285] : memref<8x8x64xf32, #tpu.memory_space<vmem>>, vector<1x8x32xf32>
    %677 = vector.shape_cast %676 : vector<1x8x32xf32> to vector<8x32xf32>
    %678 = vector.shape_cast %644 : vector<8x32xf32> to vector<1x8x32xf32>
    tpu.vector_store %arg6[%675, %c0_284, %c0_285], %678 {strides = array<i32>} : memref<8x8x64xf32, #tpu.memory_space<vmem>>, vector<1x8x32xf32>,
    %c7_i32_286 = arith.constant 7 : i32
    %679 = arith.subi %c7_i32_286, %c7_i32_254 : i32
    %680 = arith.index_cast %679 : i32 to index
    %c0_287 = arith.constant 0 : index
    %c32_288 = arith.constant 32 : index
    %681 = vector.load %arg6[%680, %c0_287, %c32_288] : memref<8x8x64xf32, #tpu.memory_space<vmem>>, vector<1x8x32xf32>
    %682 = vector.shape_cast %681 : vector<1x8x32xf32> to vector<8x32xf32>
    %683 = vector.shape_cast %670 : vector<8x32xf32> to vector<1x8x32xf32>
    tpu.vector_store %arg6[%680, %c0_287, %c32_288], %683 {strides = array<i32>} : memref<8x8x64xf32, #tpu.memory_space<vmem>>, vector<1x8x32xf32>,
    %c8_i32 = arith.constant 8 : i32
    %c0_289 = arith.constant 0 : index
    %c0_290 = arith.constant 0 : index
    %684 = vector.load %arg11[%c0_289, %c0_290] : memref<8x32xf32, #tpu.memory_space<vmem>>, vector<8x32xf32>
    %c0_291 = arith.constant 0 : index
    %c0_292 = arith.constant 0 : index
    %685 = vector.load %arg7[%c0_291, %c0_292] : memref<8x32xf32, #tpu.memory_space<vmem>>, vector<8x32xf32>
    tpu.vector_store %arg7[%c0_291, %c0_292], %684 {strides = array<i32>} : memref<8x32xf32, #tpu.memory_space<vmem>>, vector<8x32xf32>,
    %c0_293 = arith.constant 0 : index
    %c0_294 = arith.constant 0 : index
    %686 = vector.load %arg12[%c0_293, %c0_294] : memref<8x32xf32, #tpu.memory_space<vmem>>, vector<8x32xf32>
    %c0_295 = arith.constant 0 : index
    %c0_296 = arith.constant 0 : index
    %687 = vector.load %arg8[%c0_295, %c0_296] : memref<8x32xf32, #tpu.memory_space<vmem>>, vector<8x32xf32>
    tpu.vector_store %arg8[%c0_295, %c0_296], %686 {strides = array<i32>} : memref<8x32xf32, #tpu.memory_space<vmem>>, vector<8x32xf32>,
    return
  }
  func.func @transform_0(%arg0: i32) -> (i32, i32, i32) {
    %c0_i32 = arith.constant 0 : i32
    %c0_i32_0 = arith.constant 0 : i32
    %c0_i32_1 = arith.constant 0 : i32
    %c0_i32_2 = arith.constant 0 : i32
    return %c0_i32, %c0_i32_0, %c0_i32_1 : i32, i32, i32
  }
  func.func @transform_1(%arg0: i32) -> (i32, i32) {
    %c0_i32 = arith.constant 0 : i32
    %c0_i32_0 = arith.constant 0 : i32
    %c0_i32_1 = arith.constant 0 : i32
    return %c0_i32, %c0_i32_0 : i32, i32
  }
  func.func @transform_2(%arg0: i32) -> (i32, i32) {
    %c0_i32 = arith.constant 0 : i32
    %c0_i32_0 = arith.constant 0 : i32
    %c0_i32_1 = arith.constant 0 : i32
    return %c0_i32, %c0_i32_0 : i32, i32
  }
  func.func @transform_3(%arg0: i32) -> (i32, i32) {
    %c0_i32 = arith.constant 0 : i32
    %c0_i32_0 = arith.constant 0 : i32
    %c0_i32_1 = arith.constant 0 : i32
    return %c0_i32, %c0_i32_0 : i32, i32
  }
  func.func @transform_4(%arg0: i32) -> (i32, i32) {
    %c0_i32 = arith.constant 0 : i32
    %c0_i32_0 = arith.constant 0 : i32
    %c0_i32_1 = arith.constant 0 : i32
    return %c0_i32, %c0_i32_0 : i32, i32
  }
  func.func @transform_5(%arg0: i32) -> (i32, i32, i32) {
    %c0_i32 = arith.constant 0 : i32
    %c0_i32_0 = arith.constant 0 : i32
    %c0_i32_1 = arith.constant 0 : i32
    %c0_i32_2 = arith.constant 0 : i32
    return %c0_i32, %c0_i32_0, %c0_i32_1 : i32, i32, i32
  }
  func.func @transform_6(%arg0: i32) -> (i32, i32) {
    %c0_i32 = arith.constant 0 : i32
    %c0_i32_0 = arith.constant 0 : i32
    %c0_i32_1 = arith.constant 0 : i32
    return %c0_i32, %c0_i32_0 : i32, i32
  }
  func.func @transform_7(%arg0: i32) -> (i32, i32) {
    %c0_i32 = arith.constant 0 : i32
    %c0_i32_0 = arith.constant 0 : i32
    %c0_i32_1 = arith.constant 0 : i32
    return %c0_i32, %c0_i32_0 : i32, i32
  }
}

</mosaic_0001>

<bundles_post_ra>
// kernel: encoder_lstm_forward.3
= control target key start
LH: loop header
LB: loop body
LE: loop exit
PB: predicated region body
PF: predicated region fallthrough
CT: control target
= control target key end

     0   :  { %vm24_vm0 = vcmask 261120   ;;  %v2254_v0 = vmov 0.0   ;;  %vm2255_vm1 = vmmov 0   ;;  %s2256_s13 = smov 64   ;;  %s2257_s22 = smov 32   ;;  %vm63_vm2 = vcmask 523264   ;;  %s3035_s2 = inlined_call_operand.vmem [shape: bf16[96,128], index: 2, kind: input, shape index: {}]   ;;  %s3036_s1 = inlined_call_operand.vmem [shape: bf16[96,128], index: 1, kind: input, shape index: {}]   ;;  %s3037_s0 = inlined_call_operand.vmem [shape: f32[8,8,64], index: 0, kind: input, shape index: {}]   ;;  %s3038_s4 = inlined_call_operand.vmem [shape: f32[1,128], index: 4, kind: input, shape index: {}]   ;;  %s3039_s3 = inlined_call_operand.vmem [shape: f32[1,128], index: 3, kind: input, shape index: {}]   ;;  %s3040_s5 = inlined_call_operand.vmem [shape: f32[8,8,64], index: 5, kind: output, shape index: {0}]   ;;  %s3041_s7 = inlined_call_operand.vmem [shape: f32[8,32], index: 7, kind: output, shape index: {2}]   ;;  %s3042_s6 = inlined_call_operand.vmem [shape: f32[8,32], index: 6, kind: output, shape index: {1}]  }
   0x1   :  { %27 = vst.msk [vmem:[#allocation4] sm:$0xff] %vm24_vm0, %v2254_v0  ;;  %25 = vst.msk [vmem:[#allocation2] sm:$0xff] %vm24_vm0, %v2254_v0  ;;  %1854 = vmatprep.subr.bf16.mxu1 %v2254_v0  ;;  %v2311_v1 = vld [vmem:[%s3035_s2 + $0x28] sm:$0xff]   ;;  %1838 = vmatprep.subr.bf16.mxu0 %v2254_v0  ;;  %v2327_v3 = vld [vmem:[%s3035_s2 + $0x20] sm:$0xff]   ;;  %vm115_vm3 = vcmask 785408   ;;  %s2258_s15 = smov 96  }
   0x2   :  { %26 = vst.msk [vmem:[#allocation3] sm:$0xff] %vm24_vm0, %v2254_v0  ;;  %28 = vst.msk [vmem:[#allocation5] sm:$0xff] %vm24_vm0, %v2254_v0  ;;  %v2317_v2 = vld [vmem:[%s3036_s1 + $0x28] sm:$0xff]   ;;  %1866 = vmatprep.mubr.msk.bf16.mxu1 %vm2255_vm1, %v2254_v0  ;;  %1850 = vmatprep.mubr.msk.bf16.mxu0 %vm2255_vm1, %v2254_v0  ;;  %v2334_v4 = vld [vmem:[%s3036_s1 + $0x20] sm:$0xff]   ;;  %vm327_vm4 = vcmask 523520  }
   0x3   :  { %1855 = vmatpush3.bf16.msra.mxu1 %v2311_v1  ;;  %1839 = vmatpush3.bf16.msra.mxu0 %v2317_v2  ;;  %v2341_v5 = vld [vmem:[%s3035_s2 + $0x18] sm:$0xff]   ;;  %v2356_v9 = vld [vmem:[%s3035_s2 + $0x10] sm:$0xff]   ;;  %v2371_v12 = vld [vmem:[%s3035_s2 + $0x8] sm:$0xff]  }
   0x4   :  { %1856 = vmatprep.subr.bf16.mxu1 %v2254_v0  ;;  %1840 = vmatprep.subr.bf16.mxu0 %v2254_v0  ;;  %v2348_v7 = vld [vmem:[%s3036_s1 + $0x18] sm:$0xff]   ;;  %v2363_v10 = vld [vmem:[%s3036_s1 + $0x10] sm:$0xff]   ;;  %v2378_v13 = vld [vmem:[%s3036_s1 + $0x8] sm:$0xff]  }
   0x5   :  { %v2386_v15 = vld [vmem:[%s3035_s2] sm:$0xff]   ;;  %v1652_v17 = vld [vmem:[%s3037_s0 + $0x38] sm:$0xff] }
   0x6   :  { %v2393_v16 = vld [vmem:[%s3036_s1] sm:$0xff]  }
   0x7   :  { %1857 = vmatpush3.bf16.msra.mxu1 %v2327_v3  ;;  %1841 = vmatpush3.bf16.msra.mxu0 %v2334_v4  ;;  %v55_v21 = vld [vmem:[%s3037_s0] sm:$0xff] }
   0x8   :  { %v66_v6 = vld [vmem:[#allocation4] sm:$0xff]  ;;  %1858 = vmatprep.subr.bf16.mxu1 %v2254_v0  ;;  %1842 = vmatprep.subr.bf16.mxu0 %v2254_v0  ;;  %v58_v8 = vld [vmem:[#allocation2] sm:$0xff] }
   0x9   :  { %68 = vrot.lane.b32.xlu0 %v66_v6, %s2256_s13  ;;  %v273_v11 = vld [vmem:[#allocation5] sm:$0xff]  ;;  %v244_v14 = vld [vmem:[#allocation3] sm:$0xff]  ;;  %v2442_v25 = vld [vmem:[%s3038_s4] ss:$0 sm:$0xff] }
   0xa   :  { %v2448_v29 = vld [vmem:[%s3039_s3] ss:$0 sm:$0xff] }
   0xb   :  { %1859 = vmatpush3.bf16.msra.mxu1 %v2341_v5  ;;  %1843 = vmatpush3.bf16.msra.mxu0 %v2348_v7 }
   0xc   :  { %1860 = vmatprep.subr.bf16.mxu1 %v2254_v0  ;;  %1844 = vmatprep.subr.bf16.mxu0 %v2254_v0 }
   0xd   :  { %60 = vrot.lane.b32.xlu0 %v58_v8, %s2256_s13 }
   0xf   :  { %1861 = vmatpush3.bf16.msra.mxu1 %v2356_v9  ;;  %1845 = vmatpush3.bf16.msra.mxu0 %v2363_v10 }
  0x10   :  { %1862 = vmatprep.subr.bf16.mxu1 %v2254_v0  ;;  %1846 = vmatprep.subr.bf16.mxu0 %v2254_v0 }
  0x11   :  { %282 = vrot.lane.b32.xlu0 %v273_v11, %s2257_s22 }
  0x13   :  { %1863 = vmatpush3.bf16.msra.mxu1 %v2371_v12  ;;  %1847 = vmatpush3.bf16.msra.mxu0 %v2378_v13 }
  0x14   :  { %1864 = vmatprep.subr.bf16.mxu1 %v2254_v0  ;;  %1848 = vmatprep.subr.bf16.mxu0 %v2254_v0 }
  0x15   :  { %253 = vrot.lane.b32.xlu0 %v244_v14, %s2257_s22 }
  0x17   :  { %1865 = vmatpush3.bf16.msra.mxu1 %v2386_v15  ;;  %1849 = vmatpush3.bf16.msra.mxu0 %v2393_v16 }
  0x18   :  { %1886 = vmatprep.subr.bf16.mxu1 %v2254_v0  ;;  %1870 = vmatprep.subr.bf16.mxu0 %v2254_v0 }
  0x7b   :  { %v69_v18 = vpop.permute.xlu0 %68 }
  0x7c   :  { %v71_v19 = vsel %vm63_vm2, %v1652_v17, %v69_v18  ;;  %v1673_v18 = vld [vmem:[%s3037_s0 + $0x30] sm:$0xff] }
  0x7d   :  { %v72_v20 = vpack.c.bf16 %v71_v19, %v71_v19 }
  0x7f   :  { %v61_v22 = vpop.permute.xlu0 %60  ;;  %1867 = vmatmul.mubr.msk.bf16.vlgmr.msra.gmra.mxu1 %vm115_vm3, %v72_v20 }
  0x80   :  { %v64_v23 = vsel %vm63_vm2, %v55_v21, %v61_v22  ;;  %1887 = vmatpush3.bf16.msra.mxu1 %v2311_v1  ;;  %1898 = vmatprep.mubr.msk.bf16.mxu1 %vm2255_vm1, %v2254_v0  ;;  %v1672_v22 = vld [vmem:[%s3037_s0 + $0x8] sm:$0xff] }
  0x81   :  { %v65_v24 = vpack.c.bf16 %v64_v23, %v64_v23  ;;  %1888 = vmatprep.subr.bf16.mxu1 %v2254_v0 }
  0x83   :  { %1851 = vmatmul.mubr.msk.bf16.vlgmr.msra.gmra.mxu0 %vm115_vm3, %v65_v24  ;;  %v283_v51 = vpop.permute.xlu0 %282 }
  0x84   :  { %1871 = vmatpush3.bf16.msra.mxu0 %v2317_v2  ;;  %1889 = vmatpush3.bf16.msra.mxu1 %v2327_v3 }
  0x85   :  { %1872 = vmatprep.subr.bf16.mxu0 %v2254_v0  ;;  %1890 = vmatprep.subr.bf16.mxu1 %v2254_v0 }
  0x86   :  { %1882 = vmatprep.mubr.msk.bf16.mxu0 %vm2255_vm1, %v2254_v0 }
  0x87   :  { %v254_v53 = vpop.permute.xlu0 %253 }
  0x88   :  { %1873 = vmatpush3.bf16.msra.mxu0 %v2334_v4  ;;  %1891 = vmatpush3.bf16.msra.mxu1 %v2341_v5 }
  0x89   :  { %1874 = vmatprep.subr.bf16.mxu0 %v2254_v0  ;;  %1892 = vmatprep.subr.bf16.mxu1 %v2254_v0 }
  0x8c   :  { %1875 = vmatpush3.bf16.msra.mxu0 %v2348_v7  ;;  %1893 = vmatpush3.bf16.msra.mxu1 %v2356_v9 }
  0x8d   :  { %1876 = vmatprep.subr.bf16.mxu0 %v2254_v0  ;;  %1894 = vmatprep.subr.bf16.mxu1 %v2254_v0 }
  0x90   :  { %1877 = vmatpush3.bf16.msra.mxu0 %v2363_v10  ;;  %1895 = vmatpush3.bf16.msra.mxu1 %v2371_v12 }
  0x91   :  { %1878 = vmatprep.subr.bf16.mxu0 %v2254_v0  ;;  %1896 = vmatprep.subr.bf16.mxu1 %v2254_v0 }
  0x94   :  { %1879 = vmatpush3.bf16.msra.mxu0 %v2378_v13  ;;  %1897 = vmatpush3.bf16.msra.mxu1 %v2386_v15 }
  0x95   :  { %1880 = vmatprep.subr.bf16.mxu0 %v2254_v0  ;;  %1918 = vmatprep.subr.bf16.mxu1 %v2254_v0 }
  0x98   :  { %1881 = vmatpush3.bf16.msra.mxu0 %v2393_v16 }
  0x99   :  { %1902 = vmatprep.subr.bf16.mxu0 %v2254_v0 }
 0x13f   :  { %v238_v26 = vpop.f32.mrf.mxu1 }
 0x140   :  { %v239_v27 = vadd.f32 %v2442_v25, %v238_v26 }
 0x141   :  { %v1868_v28 = vpop.f32.mrf.mxu1 }
 0x142   :  { %2111 = vtanh.f32 %v239_v27  ;;  %v1670_v39 = vmul.f32 -1.442695, %v239_v27 }
 0x143   :  { %v153_v30 = vpop.f32.mrf.mxu0  ;;  %v241_v31 = vpop.f32.mrf.mxu1 }
 0x144   :  { %v154_v32 = vadd.f32 %v2448_v29, %v153_v30 }
 0x145   :  { %v1852_v33 = vpop.f32.mrf.mxu0  ;;  %v1869_v34 = vpop.f32.mrf.mxu1 }
 0x146   :  { %2113 = vtanh.f32 %v154_v32  ;;  %v1669_v40 = vmul.f32 -1.442695, %v154_v32 }
 0x147   :  { %v156_v35 = vpop.f32.mrf.mxu0  ;;  %2115 = vpow2.f32 %v1670_v39 }
 0x148   :  { %2117 = vpow2.f32 %v1669_v40 }
 0x149   :  { %v1853_v36 = vpop.f32.mrf.mxu0 }
 0x14f   :  { %v2112_v37 = vpop.eup %2111 }
 0x150   :  { %287 = vrot.lane.b32.xlu1 %v2112_v37, %s2256_s13 }
 0x153   :  { %v2114_v38 = vpop.eup %2113 }
 0x154   :  { %258 = vrot.lane.b32.xlu1 %v2114_v38, %s2256_s13  ;;  %v2116_v41 = vpop.eup %2115 }
 0x155   :  { %v277_v42 = vadd.f32 1.0, %v2116_v41  ;;  %v2118_v43 = vpop.eup %2117 }
 0x156   :  { %v248_v44 = vadd.f32 1.0, %v2118_v43 }
 0x157   :  { %2119 = vrcp.f32 %v277_v42 }
 0x158   :  { %2121 = vrcp.f32 %v248_v44 }
 0x164   :  { %v2120_v45 = vpop.eup %2119 }
 0x165   :  { %v2122_v48 = vpop.eup %2121  ;;  %v285_v52 = vmul.f32 %v2120_v45, %v283_v51 }
 0x166   :  { %v256_v56 = vmul.f32 %v2122_v48, %v254_v53 }
 0x1c2   :  { %v288_v46 = vpop.permute.xlu1 %287 }
 0x1c3   :  { %v290_v47 = vmul.f32 %v2120_v45, %v288_v46 }
 0x1c5   :  { %292 = vrot.lane.b32.xlu1 %v290_v47, %s2257_s22 }
 0x1c6   :  { %v259_v49 = vpop.permute.xlu1 %258 }
 0x1c7   :  { %v261_v50 = vmul.f32 %v2122_v48, %v259_v49 }
 0x1c9   :  { %263 = vrot.lane.b32.xlu1 %v261_v50, %s2257_s22 }
 0x237   :  { %v293_v54 = vpop.permute.xlu1 %292 }
 0x238   :  { %v295_v55 = vadd.f32 %v293_v54, %v285_v52 }
 0x23a   :  { %2123 = vtanh.f32 %v295_v55 }
 0x23b   :  { %v264_v57 = vpop.permute.xlu1 %263 }
 0x23c   :  { %v266_v58 = vadd.f32 %v264_v57, %v256_v56 }
 0x23e   :  { %2125 = vtanh.f32 %v266_v58 }
 0x247   :  { %v2124_v59 = vpop.eup %2123 }
 0x248   :  { %298 = vrot.lane.b32.xlu0 %v2124_v59, %s2256_s13 }
 0x24b   :  { %v2126_v60 = vpop.eup %2125 }
 0x24c   :  { %269 = vrot.lane.b32.xlu1 %v2126_v60, %s2256_s13 }
 0x2ba   :  { %v299_v61 = vpop.permute.xlu0 %298 }
 0x2bb   :  { %v2457_v62 = vmul.f32 %v2120_v45, %v299_v61 }
 0x2bd   :  { %313 = vrot.lane.b32.xlu0 %v2457_v62, %s2257_s22 }
 0x2be   :  { %v270_v63 = vpop.permute.xlu1 %269 }
 0x2bf   :  { %v272_v6 = vmul.f32 %v2122_v48, %v270_v63 }
 0x2c1   :  { %303 = vrot.lane.b32.xlu1 %v272_v6, %s2257_s22 }
 0x32f   :  { %v314_v8 = vpop.permute.xlu0 %313 }
 0x330   :  { %316 = vst.msk [vmem:[#allocation4] sm:$0xff] %vm24_vm0, %v314_v8 }
 0x333   :  { %v304_v11 = vpop.permute.xlu1 %303 }
 0x334   :  { %306 = vst.msk [vmem:[#allocation2] sm:$0xff] %vm24_vm0, %v304_v11  ;;  %322 = vst.msk [vmem:[%s3040_s5] sm:$0xff] %vm24_vm0, %v304_v11 }
 0x337   :  { %v340_v14 = vld [vmem:[#allocation4] sm:$0xff] }
 0x338   :  { %342 = vrot.lane.b32.xlu0 %v340_v14, %s2256_s13 }
 0x33b   :  { %v333_v17 = vld [vmem:[#allocation2] sm:$0xff] }
 0x33c   :  { %318 = vrot.lane.b32.xlu0 %v295_v55, %s2258_s15  ;;  %335 = vrot.lane.b32.xlu1 %v333_v17, %s2256_s13 }
 0x340   :  { %308 = vrot.lane.b32.xlu1 %v266_v58, %s2258_s15 }
 0x3aa   :  { %v343_v19 = vpop.permute.xlu0 %342 }
 0x3ab   :  { %v345_v20 = vsel %vm63_vm2, %v1673_v18, %v343_v19 }
 0x3ac   :  { %v346_v21 = vpack.c.bf16 %v345_v20, %v345_v20 }
 0x3ae   :  { %1899 = vmatmul.mubr.msk.bf16.vlgmr.msra.gmra.mxu1 %vm115_vm3, %v346_v21  ;;  %v319_v23 = vpop.permute.xlu0 %318  ;;  %v336_v24 = vpop.permute.xlu1 %335 }
 0x3af   :  { %321 = vst.msk [vmem:[#allocation5] sm:$0xff] %vm24_vm0, %v319_v23  ;;  %v338_v26 = vsel %vm63_vm2, %v1672_v22, %v336_v24  ;;  %1919 = vmatpush3.bf16.msra.mxu1 %v2311_v1  ;;  %1930 = vmatprep.mubr.msk.bf16.mxu1 %vm2255_vm1, %v2254_v0  ;;  %v2540_v24 = vld [vmem:[%s3037_s0 + $0x28] sm:$0xff] }
 0x3b0   :  { %v339_v27 = vpack.c.bf16 %v338_v26, %v338_v26  ;;  %1920 = vmatprep.subr.bf16.mxu1 %v2254_v0 }
 0x3b2   :  { %1883 = vmatmul.mubr.msk.bf16.vlgmr.msra.gmra.mxu0 %vm115_vm3, %v339_v27  ;;  %v309_v28 = vpop.permute.xlu1 %308 }
 0x3b3   :  { %311 = vst.msk [vmem:[#allocation3] sm:$0xff] %vm24_vm0, %v309_v28  ;;  %1903 = vmatpush3.bf16.msra.mxu0 %v2317_v2  ;;  %1921 = vmatpush3.bf16.msra.mxu1 %v2327_v3 }
 0x3b4   :  { %1904 = vmatprep.subr.bf16.mxu0 %v2254_v0  ;;  %1922 = vmatprep.subr.bf16.mxu1 %v2254_v0 }
 0x3b5   :  { %1914 = vmatprep.mubr.msk.bf16.mxu0 %vm2255_vm1, %v2254_v0 }
 0x3b6   :  { %v462_v42 = vld [vmem:[#allocation5] sm:$0xff] }
 0x3b7   :  { %1905 = vmatpush3.bf16.msra.mxu0 %v2334_v4  ;;  %1923 = vmatpush3.bf16.msra.mxu1 %v2341_v5 }
 0x3b8   :  { %1906 = vmatprep.subr.bf16.mxu0 %v2254_v0  ;;  %1924 = vmatprep.subr.bf16.mxu1 %v2254_v0 }
 0x3ba   :  { %v433_v43 = vld [vmem:[#allocation3] sm:$0xff] }
 0x3bb   :  { %1907 = vmatpush3.bf16.msra.mxu0 %v2348_v7  ;;  %1925 = vmatpush3.bf16.msra.mxu1 %v2356_v9 }
 0x3bc   :  { %1908 = vmatprep.subr.bf16.mxu0 %v2254_v0  ;;  %1926 = vmatprep.subr.bf16.mxu1 %v2254_v0 }
 0x3bf   :  { %1909 = vmatpush3.bf16.msra.mxu0 %v2363_v10  ;;  %1927 = vmatpush3.bf16.msra.mxu1 %v2371_v12 }
 0x3c0   :  { %1910 = vmatprep.subr.bf16.mxu0 %v2254_v0  ;;  %1928 = vmatprep.subr.bf16.mxu1 %v2254_v0 }
 0x3c3   :  { %1911 = vmatpush3.bf16.msra.mxu0 %v2378_v13  ;;  %1929 = vmatpush3.bf16.msra.mxu1 %v2386_v15 }
 0x3c4   :  { %1912 = vmatprep.subr.bf16.mxu0 %v2254_v0  ;;  %1950 = vmatprep.subr.bf16.mxu1 %v2254_v0 }
 0x3c7   :  { %1913 = vmatpush3.bf16.msra.mxu0 %v2393_v16 }
 0x3c8   :  { %1934 = vmatprep.subr.bf16.mxu0 %v2254_v0 }
 0x46e   :  { %v427_v30 = vpop.f32.mrf.mxu1 }
 0x46f   :  { %v428_v31 = vadd.f32 %v2442_v25, %v427_v30  ;;  %v2547_v30 = vld [vmem:[%s3037_s0 + $0x10] sm:$0xff] }
 0x470   :  { %v1900_v32 = vpop.f32.mrf.mxu1 }
 0x471   :  { %2127 = vtanh.f32 %v428_v31  ;;  %v1677_v44 = vmul.f32 -1.442695, %v428_v31 }
 0x472   :  { %v384_v33 = vpop.f32.mrf.mxu0  ;;  %v430_v34 = vpop.f32.mrf.mxu1 }
 0x473   :  { %v385_v35 = vadd.f32 %v2448_v29, %v384_v33 }
 0x474   :  { %v1884_v36 = vpop.f32.mrf.mxu0  ;;  %v1901_v37 = vpop.f32.mrf.mxu1 }
 0x475   :  { %2129 = vtanh.f32 %v385_v35  ;;  %v1676_v45 = vmul.f32 -1.442695, %v385_v35 }
 0x476   :  { %v387_v38 = vpop.f32.mrf.mxu0  ;;  %2131 = vpow2.f32 %v1677_v44 }
 0x477   :  { %2133 = vpow2.f32 %v1676_v45 }
 0x478   :  { %v1885_v39 = vpop.f32.mrf.mxu0 }
 0x47e   :  { %v2128_v40 = vpop.eup %2127 }
 0x47f   :  { %476 = vrot.lane.b32.xlu0 %v2128_v40, %s2256_s13 }
 0x482   :  { %v2130_v41 = vpop.eup %2129 }
 0x483   :  { %471 = vrot.lane.b32.xlu0 %v462_v42, %s2257_s22  ;;  %447 = vrot.lane.b32.xlu1 %v2130_v41, %s2256_s13  ;;  %v2132_v46 = vpop.eup %2131 }
 0x484   :  { %v466_v47 = vadd.f32 1.0, %v2132_v46  ;;  %v2134_v48 = vpop.eup %2133 }
 0x485   :  { %v437_v49 = vadd.f32 1.0, %v2134_v48 }
 0x486   :  { %2135 = vrcp.f32 %v466_v47 }
 0x487   :  { %442 = vrot.lane.b32.xlu0 %v433_v43, %s2257_s22  ;;  %2137 = vrcp.f32 %v437_v49 }
 0x493   :  { %v2136_v50 = vpop.eup %2135 }
 0x494   :  { %v2138_v53 = vpop.eup %2137 }
 0x4f1   :  { %v477_v51 = vpop.permute.xlu0 %476 }
 0x4f2   :  { %v479_v52 = vmul.f32 %v2136_v50, %v477_v51 }
 0x4f4   :  { %481 = vrot.lane.b32.xlu1 %v479_v52, %s2257_s22 }
 0x4f5   :  { %v448_v54 = vpop.permute.xlu1 %447  ;;  %v472_v56 = vpop.permute.xlu0 %471 }
 0x4f6   :  { %v450_v55 = vmul.f32 %v2138_v53, %v448_v54  ;;  %v474_v57 = vmul.f32 %v2136_v50, %v472_v56 }
 0x4f8   :  { %452 = vrot.lane.b32.xlu1 %v450_v55, %s2257_s22 }
 0x4f9   :  { %v443_v58 = vpop.permute.xlu0 %442 }
 0x4fa   :  { %v445_v61 = vmul.f32 %v2138_v53, %v443_v58 }
 0x566   :  { %v482_v59 = vpop.permute.xlu1 %481 }
 0x567   :  { %v484_v60 = vadd.f32 %v482_v59, %v474_v57 }
 0x569   :  { %2139 = vtanh.f32 %v484_v60 }
 0x56a   :  { %v453_v63 = vpop.permute.xlu1 %452 }
 0x56b   :  { %v455_v6 = vadd.f32 %v453_v63, %v445_v61 }
 0x56d   :  { %2141 = vtanh.f32 %v455_v6 }
 0x576   :  { %v2140_v8 = vpop.eup %2139 }
 0x577   :  { %487 = vrot.lane.b32.xlu0 %v2140_v8, %s2256_s13 }
 0x57a   :  { %v2142_v11 = vpop.eup %2141 }
 0x57b   :  { %458 = vrot.lane.b32.xlu1 %v2142_v11, %s2256_s13 }
 0x5e9   :  { %v488_v14 = vpop.permute.xlu0 %487 }
 0x5ea   :  { %v2522_v17 = vmul.f32 %v2136_v50, %v488_v14 }
 0x5ec   :  { %502 = vrot.lane.b32.xlu0 %v2522_v17, %s2257_s22 }
 0x5ed   :  { %v459_v18 = vpop.permute.xlu1 %458 }
 0x5ee   :  { %v461_v19 = vmul.f32 %v2138_v53, %v459_v18 }
 0x5f0   :  { %492 = vrot.lane.b32.xlu1 %v461_v19, %s2257_s22 }
 0x65e   :  { %v503_v20 = vpop.permute.xlu0 %502 }
 0x65f   :  { %505 = vst.msk [vmem:[#allocation4] sm:$0xff] %vm24_vm0, %v503_v20 }
 0x662   :  { %v493_v21 = vpop.permute.xlu1 %492 }
 0x663   :  { %495 = vst.msk [vmem:[#allocation2] sm:$0xff] %vm24_vm0, %v493_v21  ;;  %1678 = vst.msk [vmem:[%s3040_s5 + $0x8] sm:$0xff] %vm24_vm0, %v493_v21 }
 0x666   :  { %v529_v22 = vld [vmem:[#allocation4] sm:$0xff] }
 0x667   :  { %531 = vrot.lane.b32.xlu0 %v529_v22, %s2256_s13 }
 0x66a   :  { %v522_v23 = vld [vmem:[#allocation2] sm:$0xff] }
 0x66b   :  { %507 = vrot.lane.b32.xlu0 %v484_v60, %s2258_s15  ;;  %524 = vrot.lane.b32.xlu1 %v522_v23, %s2256_s13 }
 0x66f   :  { %497 = vrot.lane.b32.xlu1 %v455_v6, %s2258_s15 }
 0x6d9   :  { %v532_v26 = vpop.permute.xlu0 %531 }
 0x6da   :  { %v534_v27 = vsel %vm63_vm2, %v2540_v24, %v532_v26 }
 0x6db   :  { %v535_v28 = vpack.c.bf16 %v534_v27, %v534_v27 }
 0x6dd   :  { %1931 = vmatmul.mubr.msk.bf16.vlgmr.msra.gmra.mxu1 %vm115_vm3, %v535_v28  ;;  %v508_v31 = vpop.permute.xlu0 %507  ;;  %v525_v32 = vpop.permute.xlu1 %524 }
 0x6de   :  { %510 = vst.msk [vmem:[#allocation5] sm:$0xff] %vm24_vm0, %v508_v31  ;;  %v527_v33 = vsel %vm63_vm2, %v2547_v30, %v525_v32  ;;  %1951 = vmatpush3.bf16.msra.mxu1 %v2311_v1  ;;  %1962 = vmatprep.mubr.msk.bf16.mxu1 %vm2255_vm1, %v2254_v0 }
 0x6df   :  { %v528_v34 = vpack.c.bf16 %v527_v33, %v527_v33  ;;  %1952 = vmatprep.subr.bf16.mxu1 %v2254_v0 }
 0x6e1   :  { %1915 = vmatmul.mubr.msk.bf16.vlgmr.msra.gmra.mxu0 %vm115_vm3, %v528_v34  ;;  %v498_v35 = vpop.permute.xlu1 %497 }
 0x6e2   :  { %500 = vst.msk [vmem:[#allocation3] sm:$0xff] %vm24_vm0, %v498_v35  ;;  %1935 = vmatpush3.bf16.msra.mxu0 %v2317_v2  ;;  %1953 = vmatpush3.bf16.msra.mxu1 %v2327_v3  ;;  %v2611_v35 = vld [vmem:[%s3037_s0 + $0x20] sm:$0xff] }
 0x6e3   :  { %1936 = vmatprep.subr.bf16.mxu0 %v2254_v0  ;;  %1954 = vmatprep.subr.bf16.mxu1 %v2254_v0 }
 0x6e4   :  { %1946 = vmatprep.mubr.msk.bf16.mxu0 %vm2255_vm1, %v2254_v0 }
 0x6e5   :  { %v651_v48 = vld [vmem:[#allocation5] sm:$0xff] }
 0x6e6   :  { %1937 = vmatpush3.bf16.msra.mxu0 %v2334_v4  ;;  %1955 = vmatpush3.bf16.msra.mxu1 %v2341_v5 }
 0x6e7   :  { %1938 = vmatprep.subr.bf16.mxu0 %v2254_v0  ;;  %1956 = vmatprep.subr.bf16.mxu1 %v2254_v0 }
 0x6e9   :  { %v622_v49 = vld [vmem:[#allocation3] sm:$0xff] }
 0x6ea   :  { %1939 = vmatpush3.bf16.msra.mxu0 %v2348_v7  ;;  %1957 = vmatpush3.bf16.msra.mxu1 %v2356_v9 }
 0x6eb   :  { %1940 = vmatprep.subr.bf16.mxu0 %v2254_v0  ;;  %1958 = vmatprep.subr.bf16.mxu1 %v2254_v0 }
 0x6ee   :  { %1941 = vmatpush3.bf16.msra.mxu0 %v2363_v10  ;;  %1959 = vmatpush3.bf16.msra.mxu1 %v2371_v12 }
 0x6ef   :  { %1942 = vmatprep.subr.bf16.mxu0 %v2254_v0  ;;  %1960 = vmatprep.subr.bf16.mxu1 %v2254_v0 }
 0x6f2   :  { %1943 = vmatpush3.bf16.msra.mxu0 %v2378_v13  ;;  %1961 = vmatpush3.bf16.msra.mxu1 %v2386_v15 }
 0x6f3   :  { %1944 = vmatprep.subr.bf16.mxu0 %v2254_v0  ;;  %1982 = vmatprep.subr.bf16.mxu1 %v2254_v0 }
 0x6f6   :  { %1945 = vmatpush3.bf16.msra.mxu0 %v2393_v16 }
 0x6f7   :  { %1966 = vmatprep.subr.bf16.mxu0 %v2254_v0 }
 0x79d   :  { %v616_v36 = vpop.f32.mrf.mxu1 }
 0x79e   :  { %v617_v37 = vadd.f32 %v2442_v25, %v616_v36 }
 0x79f   :  { %v1932_v38 = vpop.f32.mrf.mxu1 }
 0x7a0   :  { %2143 = vtanh.f32 %v617_v37  ;;  %v1685_v50 = vmul.f32 -1.442695, %v617_v37 }
 0x7a1   :  { %v573_v39 = vpop.f32.mrf.mxu0  ;;  %v619_v40 = vpop.f32.mrf.mxu1 }
 0x7a2   :  { %v574_v41 = vadd.f32 %v2448_v29, %v573_v39  ;;  %v2618_v39 = vld [vmem:[%s3037_s0 + $0x18] sm:$0xff] }
 0x7a3   :  { %v1916_v42 = vpop.f32.mrf.mxu0  ;;  %v1933_v43 = vpop.f32.mrf.mxu1 }
 0x7a4   :  { %2145 = vtanh.f32 %v574_v41  ;;  %v1684_v51 = vmul.f32 -1.442695, %v574_v41 }
 0x7a5   :  { %v576_v44 = vpop.f32.mrf.mxu0  ;;  %2147 = vpow2.f32 %v1685_v50 }
 0x7a6   :  { %2149 = vpow2.f32 %v1684_v51 }
 0x7a7   :  { %v1917_v45 = vpop.f32.mrf.mxu0 }
 0x7ad   :  { %v2144_v46 = vpop.eup %2143 }
 0x7ae   :  { %665 = vrot.lane.b32.xlu0 %v2144_v46, %s2256_s13 }
 0x7b1   :  { %v2146_v47 = vpop.eup %2145 }
 0x7b2   :  { %660 = vrot.lane.b32.xlu0 %v651_v48, %s2257_s22  ;;  %636 = vrot.lane.b32.xlu1 %v2146_v47, %s2256_s13  ;;  %v2148_v52 = vpop.eup %2147 }
 0x7b3   :  { %v655_v53 = vadd.f32 1.0, %v2148_v52  ;;  %v2150_v54 = vpop.eup %2149 }
 0x7b4   :  { %v626_v55 = vadd.f32 1.0, %v2150_v54 }
 0x7b5   :  { %2151 = vrcp.f32 %v655_v53 }
 0x7b6   :  { %631 = vrot.lane.b32.xlu0 %v622_v49, %s2257_s22  ;;  %2153 = vrcp.f32 %v626_v55 }
 0x7c2   :  { %v2152_v56 = vpop.eup %2151 }
 0x7c3   :  { %v2154_v59 = vpop.eup %2153 }
 0x820   :  { %v666_v57 = vpop.permute.xlu0 %665 }
 0x821   :  { %v668_v58 = vmul.f32 %v2152_v56, %v666_v57 }
 0x823   :  { %670 = vrot.lane.b32.xlu1 %v668_v58, %s2257_s22 }
 0x824   :  { %v637_v60 = vpop.permute.xlu1 %636  ;;  %v661_v63 = vpop.permute.xlu0 %660 }
 0x825   :  { %v639_v61 = vmul.f32 %v2154_v59, %v637_v60  ;;  %v663_v6 = vmul.f32 %v2152_v56, %v661_v63 }
 0x827   :  { %641 = vrot.lane.b32.xlu1 %v639_v61, %s2257_s22 }
 0x828   :  { %v632_v8 = vpop.permute.xlu0 %631 }
 0x829   :  { %v634_v18 = vmul.f32 %v2154_v59, %v632_v8 }
 0x895   :  { %v671_v11 = vpop.permute.xlu1 %670 }
 0x896   :  { %v673_v14 = vadd.f32 %v671_v11, %v663_v6 }
 0x898   :  { %2155 = vtanh.f32 %v673_v14 }
 0x899   :  { %v642_v19 = vpop.permute.xlu1 %641 }
 0x89a   :  { %v644_v20 = vadd.f32 %v642_v19, %v634_v18 }
 0x89c   :  { %2157 = vtanh.f32 %v644_v20 }
 0x8a5   :  { %v2156_v21 = vpop.eup %2155 }
 0x8a6   :  { %676 = vrot.lane.b32.xlu0 %v2156_v21, %s2256_s13 }
 0x8a9   :  { %v2158_v22 = vpop.eup %2157 }
 0x8aa   :  { %647 = vrot.lane.b32.xlu1 %v2158_v22, %s2256_s13 }
 0x918   :  { %v677_v23 = vpop.permute.xlu0 %676 }
 0x919   :  { %v2593_v26 = vmul.f32 %v2152_v56, %v677_v23 }
 0x91b   :  { %691 = vrot.lane.b32.xlu0 %v2593_v26, %s2257_s22 }
 0x91c   :  { %v648_v27 = vpop.permute.xlu1 %647 }
 0x91d   :  { %v650_v28 = vmul.f32 %v2154_v59, %v648_v27 }
 0x91f   :  { %681 = vrot.lane.b32.xlu1 %v650_v28, %s2257_s22 }
 0x98d   :  { %v692_v31 = vpop.permute.xlu0 %691 }
 0x98e   :  { %694 = vst.msk [vmem:[#allocation4] sm:$0xff] %vm24_vm0, %v692_v31 }
 0x991   :  { %v682_v32 = vpop.permute.xlu1 %681 }
 0x992   :  { %684 = vst.msk [vmem:[#allocation2] sm:$0xff] %vm24_vm0, %v682_v32  ;;  %1686 = vst.msk [vmem:[%s3040_s5 + $0x10] sm:$0xff] %vm24_vm0, %v682_v32 }
 0x995   :  { %v718_v33 = vld [vmem:[#allocation4] sm:$0xff] }
 0x996   :  { %720 = vrot.lane.b32.xlu0 %v718_v33, %s2256_s13 }
 0x999   :  { %v711_v34 = vld [vmem:[#allocation2] sm:$0xff] }
 0x99a   :  { %696 = vrot.lane.b32.xlu0 %v673_v14, %s2258_s15  ;;  %713 = vrot.lane.b32.xlu1 %v711_v34, %s2256_s13 }
 0x99e   :  { %686 = vrot.lane.b32.xlu1 %v644_v20, %s2258_s15 }
 0xa08   :  { %v721_v36 = vpop.permute.xlu0 %720 }
 0xa09   :  { %v723_v37 = vsel %vm63_vm2, %v2611_v35, %v721_v36 }
 0xa0a   :  { %v724_v38 = vpack.c.bf16 %v723_v37, %v723_v37 }
 0xa0c   :  { %1963 = vmatmul.mubr.msk.bf16.vlgmr.msra.gmra.mxu1 %vm115_vm3, %v724_v38  ;;  %v697_v40 = vpop.permute.xlu0 %696  ;;  %v714_v41 = vpop.permute.xlu1 %713 }
 0xa0d   :  { %699 = vst.msk [vmem:[#allocation5] sm:$0xff] %vm24_vm0, %v697_v40  ;;  %v716_v42 = vsel %vm63_vm2, %v2618_v39, %v714_v41  ;;  %1983 = vmatpush3.bf16.msra.mxu1 %v2311_v1  ;;  %1994 = vmatprep.mubr.msk.bf16.mxu1 %vm2255_vm1, %v2254_v0 }
 0xa0e   :  { %v717_v43 = vpack.c.bf16 %v716_v42, %v716_v42  ;;  %1984 = vmatprep.subr.bf16.mxu1 %v2254_v0 }
 0xa10   :  { %1947 = vmatmul.mubr.msk.bf16.vlgmr.msra.gmra.mxu0 %vm115_vm3, %v717_v43  ;;  %v687_v44 = vpop.permute.xlu1 %686 }
 0xa11   :  { %689 = vst.msk [vmem:[#allocation3] sm:$0xff] %vm24_vm0, %v687_v44  ;;  %1967 = vmatpush3.bf16.msra.mxu0 %v2317_v2  ;;  %1985 = vmatpush3.bf16.msra.mxu1 %v2327_v3 }
 0xa12   :  { %1968 = vmatprep.subr.bf16.mxu0 %v2254_v0  ;;  %1986 = vmatprep.subr.bf16.mxu1 %v2254_v0 }
 0xa13   :  { %1978 = vmatprep.mubr.msk.bf16.mxu0 %vm2255_vm1, %v2254_v0 }
 0xa14   :  { %v840_v53 = vld [vmem:[#allocation5] sm:$0xff] }
 0xa15   :  { %1969 = vmatpush3.bf16.msra.mxu0 %v2334_v4  ;;  %1987 = vmatpush3.bf16.msra.mxu1 %v2341_v5 }
 0xa16   :  { %1970 = vmatprep.subr.bf16.mxu0 %v2254_v0  ;;  %1988 = vmatprep.subr.bf16.mxu1 %v2254_v0 }
 0xa18   :  { %v811_v54 = vld [vmem:[#allocation3] sm:$0xff] }
 0xa19   :  { %1971 = vmatpush3.bf16.msra.mxu0 %v2348_v7  ;;  %1989 = vmatpush3.bf16.msra.mxu1 %v2356_v9 }
 0xa1a   :  { %1972 = vmatprep.subr.bf16.mxu0 %v2254_v0  ;;  %1990 = vmatprep.subr.bf16.mxu1 %v2254_v0 }
 0xa1d   :  { %1973 = vmatpush3.bf16.msra.mxu0 %v2363_v10  ;;  %1991 = vmatpush3.bf16.msra.mxu1 %v2371_v12 }
 0xa1e   :  { %1974 = vmatprep.subr.bf16.mxu0 %v2254_v0  ;;  %1992 = vmatprep.subr.bf16.mxu1 %v2254_v0 }
 0xa21   :  { %1975 = vmatpush3.bf16.msra.mxu0 %v2378_v13  ;;  %1993 = vmatpush3.bf16.msra.mxu1 %v2386_v15 }
 0xa22   :  { %1976 = vmatprep.subr.bf16.mxu0 %v2254_v0  ;;  %2014 = vmatprep.subr.bf16.mxu1 %v2254_v0 }
 0xa25   :  { %1977 = vmatpush3.bf16.msra.mxu0 %v2393_v16 }
 0xa26   :  { %1998 = vmatprep.subr.bf16.mxu0 %v2254_v0 }
 0xacc   :  { %v805_v1 = vpop.f32.mrf.mxu1 }
 0xacd   :  { %v806_v2 = vadd.f32 %v2442_v25, %v805_v1 }
 0xace   :  { %v1964_v3 = vpop.f32.mrf.mxu1 }
 0xacf   :  { %2159 = vtanh.f32 %v806_v2  ;;  %v1693_v55 = vmul.f32 -1.442695, %v806_v2 }
 0xad0   :  { %v762_v4 = vpop.f32.mrf.mxu0  ;;  %v808_v45 = vpop.f32.mrf.mxu1 }
 0xad1   :  { %v763_v46 = vadd.f32 %v2448_v29, %v762_v4  ;;  %v2688_v45 = vld [vmem:[%s3035_s2 + $0x28] sm:$0xff]  }
 0xad2   :  { %v1948_v47 = vpop.f32.mrf.mxu0  ;;  %v1965_v48 = vpop.f32.mrf.mxu1 }
 0xad3   :  { %2161 = vtanh.f32 %v763_v46  ;;  %v1692_v56 = vmul.f32 -1.442695, %v763_v46  ;;  %v2705_v47 = vld [vmem:[%s3035_s2 + $0x20] sm:$0xff]  }
 0xad4   :  { %v765_v49 = vpop.f32.mrf.mxu0  ;;  %2163 = vpow2.f32 %v1693_v55  ;;  %v2715_v48 = vld [vmem:[%s3036_s1 + $0x20] sm:$0xff]  }
 0xad5   :  { %2165 = vpow2.f32 %v1692_v56 }
 0xad6   :  { %v1949_v50 = vpop.f32.mrf.mxu0 }
 0xadc   :  { %v2160_v51 = vpop.eup %2159 }
 0xadd   :  { %854 = vrot.lane.b32.xlu0 %v2160_v51, %s2256_s13 }
 0xae0   :  { %v2162_v52 = vpop.eup %2161 }
 0xae1   :  { %849 = vrot.lane.b32.xlu0 %v840_v53, %s2257_s22  ;;  %825 = vrot.lane.b32.xlu1 %v2162_v52, %s2256_s13  ;;  %v2164_v57 = vpop.eup %2163 }
 0xae2   :  { %v844_v58 = vadd.f32 1.0, %v2164_v57  ;;  %v2166_v59 = vpop.eup %2165 }
 0xae3   :  { %v815_v60 = vadd.f32 1.0, %v2166_v59 }
 0xae4   :  { %2167 = vrcp.f32 %v844_v58 }
 0xae5   :  { %820 = vrot.lane.b32.xlu0 %v811_v54, %s2257_s22  ;;  %2169 = vrcp.f32 %v815_v60 }
 0xaf1   :  { %v2168_v61 = vpop.eup %2167 }
 0xaf2   :  { %v2170_v8 = vpop.eup %2169 }
 0xb4f   :  { %v855_v63 = vpop.permute.xlu0 %854 }
 0xb50   :  { %v857_v6 = vmul.f32 %v2168_v61, %v855_v63 }
 0xb52   :  { %859 = vrot.lane.b32.xlu1 %v857_v6, %s2257_s22 }
 0xb53   :  { %v826_v11 = vpop.permute.xlu1 %825  ;;  %v850_v18 = vpop.permute.xlu0 %849 }
 0xb54   :  { %v828_v14 = vmul.f32 %v2170_v8, %v826_v11  ;;  %v852_v19 = vmul.f32 %v2168_v61, %v850_v18 }
 0xb56   :  { %830 = vrot.lane.b32.xlu1 %v828_v14, %s2257_s22 }
 0xb57   :  { %v821_v20 = vpop.permute.xlu0 %820 }
 0xb58   :  { %v823_v23 = vmul.f32 %v2170_v8, %v821_v20 }
 0xbc4   :  { %v860_v21 = vpop.permute.xlu1 %859 }
 0xbc5   :  { %v862_v22 = vadd.f32 %v860_v21, %v852_v19 }
 0xbc7   :  { %2171 = vtanh.f32 %v862_v22 }
 0xbc8   :  { %v831_v27 = vpop.permute.xlu1 %830 }
 0xbc9   :  { %v833_v28 = vadd.f32 %v831_v27, %v823_v23 }
 0xbcb   :  { %2173 = vtanh.f32 %v833_v28 }
 0xbd4   :  { %v2172_v31 = vpop.eup %2171 }
 0xbd5   :  { %865 = vrot.lane.b32.xlu0 %v2172_v31, %s2256_s13 }
 0xbd8   :  { %v2174_v32 = vpop.eup %2173 }
 0xbd9   :  { %836 = vrot.lane.b32.xlu1 %v2174_v32, %s2256_s13 }
 0xc47   :  { %v866_v33 = vpop.permute.xlu0 %865 }
 0xc48   :  { %v2664_v34 = vmul.f32 %v2168_v61, %v866_v33 }
 0xc4a   :  { %880 = vrot.lane.b32.xlu0 %v2664_v34, %s2257_s22 }
 0xc4b   :  { %v837_v36 = vpop.permute.xlu1 %836 }
 0xc4c   :  { %v839_v37 = vmul.f32 %v2170_v8, %v837_v36 }
 0xc4e   :  { %870 = vrot.lane.b32.xlu1 %v839_v37, %s2257_s22 }
 0xcbc   :  { %v881_v38 = vpop.permute.xlu0 %880 }
 0xcbd   :  { %883 = vst.msk [vmem:[#allocation4] sm:$0xff] %vm24_vm0, %v881_v38 }
 0xcc0   :  { %v871_v40 = vpop.permute.xlu1 %870 }
 0xcc1   :  { %873 = vst.msk [vmem:[#allocation2] sm:$0xff] %vm24_vm0, %v871_v40  ;;  %1694 = vst.msk [vmem:[%s3040_s5 + $0x18] sm:$0xff] %vm24_vm0, %v871_v40 }
 0xcc4   :  { %v905_v41 = vld [vmem:[#allocation4] sm:$0xff] }
 0xcc5   :  { %907 = vrot.lane.b32.xlu0 %v905_v41, %s2256_s13 }
 0xcc8   :  { %v898_v42 = vld [vmem:[#allocation2] sm:$0xff] }
 0xcc9   :  { %885 = vrot.lane.b32.xlu0 %v862_v22, %s2258_s15  ;;  %900 = vrot.lane.b32.xlu1 %v898_v42, %s2256_s13 }
 0xccd   :  { %875 = vrot.lane.b32.xlu1 %v833_v28, %s2258_s15 }
 0xd37   :  { %v908_v43 = vpop.permute.xlu0 %907 }
 0xd38   :  { %v910_v44 = vsel %vm63_vm2, %v2618_v39, %v908_v43 }
 0xd39   :  { %v911_v1 = vpack.c.bf16 %v910_v44, %v910_v44 }
 0xd3b   :  { %1995 = vmatmul.mubr.msk.bf16.vlgmr.msra.gmra.mxu1 %vm115_vm3, %v911_v1  ;;  %v886_v2 = vpop.permute.xlu0 %885  ;;  %v901_v3 = vpop.permute.xlu1 %900 }
 0xd3c   :  { %888 = vst.msk [vmem:[#allocation5] sm:$0xff] %vm24_vm0, %v886_v2  ;;  %v903_v4 = vsel %vm63_vm2, %v2611_v35, %v901_v3  ;;  %2015 = vmatpush3.bf16.msra.mxu1 %v2688_v45  ;;  %2026 = vmatprep.mubr.msk.bf16.mxu1 %vm2255_vm1, %v2254_v0  ;;  %v2699_v35 = vld [vmem:[%s3036_s1 + $0x28] sm:$0xff]  }
 0xd3d   :  { %v904_v39 = vpack.c.bf16 %v903_v4, %v903_v4  ;;  %2016 = vmatprep.subr.bf16.mxu1 %v2254_v0 }
 0xd3f   :  { %1979 = vmatmul.mubr.msk.bf16.vlgmr.msra.gmra.mxu0 %vm115_vm3, %v904_v39  ;;  %v876_v46 = vpop.permute.xlu1 %875  ;;  %v2789_v39 = vld [vmem:[%s3036_s1 + $0x18] sm:$0xff]  }
 0xd40   :  { %878 = vst.msk [vmem:[#allocation3] sm:$0xff] %vm24_vm0, %v876_v46  ;;  %1999 = vmatpush3.bf16.msra.mxu0 %v2699_v35  ;;  %2017 = vmatpush3.bf16.msra.mxu1 %v2705_v47  ;;  %v2795_v46 = vld [vmem:[%s3035_s2 + $0x10] sm:$0xff]  }
 0xd41   :  { %2000 = vmatprep.subr.bf16.mxu0 %v2254_v0  ;;  %2018 = vmatprep.subr.bf16.mxu1 %v2254_v0 }
 0xd42   :  { %2010 = vmatprep.mubr.msk.bf16.mxu0 %vm2255_vm1, %v2254_v0 }
 0xd43   :  { %v1027_v53 = vld [vmem:[#allocation5] sm:$0xff] }
 0xd44   :  { %2001 = vmatpush3.bf16.msra.mxu0 %v2715_v48  ;;  %2019 = vmatpush3.bf16.msra.mxu1 %v2341_v5 }
 0xd45   :  { %2002 = vmatprep.subr.bf16.mxu0 %v2254_v0  ;;  %2020 = vmatprep.subr.bf16.mxu1 %v2254_v0 }
 0xd48   :  { %2003 = vmatpush3.bf16.msra.mxu0 %v2348_v7  ;;  %2021 = vmatpush3.bf16.msra.mxu1 %v2356_v9 }
 0xd49   :  { %2004 = vmatprep.subr.bf16.mxu0 %v2254_v0  ;;  %2022 = vmatprep.subr.bf16.mxu1 %v2254_v0 }
 0xd4c   :  { %2005 = vmatpush3.bf16.msra.mxu0 %v2363_v10  ;;  %2023 = vmatpush3.bf16.msra.mxu1 %v2371_v12 }
 0xd4d   :  { %2006 = vmatprep.subr.bf16.mxu0 %v2254_v0  ;;  %2024 = vmatprep.subr.bf16.mxu1 %v2254_v0 }
 0xd50   :  { %2007 = vmatpush3.bf16.msra.mxu0 %v2378_v13  ;;  %2025 = vmatpush3.bf16.msra.mxu1 %v2386_v15 }
 0xd51   :  { %2008 = vmatprep.subr.bf16.mxu0 %v2254_v0  ;;  %2046 = vmatprep.subr.bf16.mxu1 %v2254_v0 }
 0xd54   :  { %2009 = vmatpush3.bf16.msra.mxu0 %v2393_v16 }
 0xd55   :  { %2030 = vmatprep.subr.bf16.mxu0 %v2254_v0 }
 0xdfb   :  { %v992_v5 = vpop.f32.mrf.mxu1 }
 0xdfc   :  { %v993_v7 = vadd.f32 %v2442_v25, %v992_v5  ;;  %v998_v25 = vld [vmem:[#allocation3] sm:$0xff]  ;;  %v2803_v5 = vld [vmem:[%s3036_s1 + $0x10] sm:$0xff]  }
 0xdfd   :  { %v1996_v9 = vpop.f32.mrf.mxu1 }
 0xdfe   :  { %2175 = vtanh.f32 %v993_v7  ;;  %v1701_v54 = vmul.f32 -1.442695, %v993_v7  ;;  %v2809_v7 = vld [vmem:[%s3035_s2 + $0x8] sm:$0xff]  }
 0xdff   :  { %v949_v10 = vpop.f32.mrf.mxu0  ;;  %v995_v12 = vpop.f32.mrf.mxu1  ;;  %v2817_v9 = vld [vmem:[%s3036_s1 + $0x8] sm:$0xff]  }
 0xe00   :  { %v950_v49 = vadd.f32 %v2448_v29, %v949_v10  ;;  %v2823_v10 = vld [vmem:[%s3035_s2] sm:$0xff]  }
 0xe01   :  { %v1980_v13 = vpop.f32.mrf.mxu0  ;;  %v1997_v50 = vpop.f32.mrf.mxu1  ;;  %v2831_v12 = vld [vmem:[%s3036_s1] sm:$0xff]  }
 0xe02   :  { %2177 = vtanh.f32 %v950_v49  ;;  %v1700_v29 = vmul.f32 -1.442695, %v950_v49  ;;  %v2838_v13 = vld [vmem:[%s3038_s4] ss:$0 sm:$0xff] }
 0xe03   :  { %v952_v15 = vpop.f32.mrf.mxu0  ;;  %2179 = vpow2.f32 %v1701_v54 }
 0xe04   :  { %2181 = vpow2.f32 %v1700_v29 }
 0xe05   :  { %v1981_v51 = vpop.f32.mrf.mxu0 }
 0xe0b   :  { %v2176_v52 = vpop.eup %2175 }
 0xe0c   :  { %1041 = vrot.lane.b32.xlu0 %v2176_v52, %s2256_s13 }
 0xe0f   :  { %v2178_v16 = vpop.eup %2177 }
 0xe10   :  { %1036 = vrot.lane.b32.xlu0 %v1027_v53, %s2257_s22  ;;  %1012 = vrot.lane.b32.xlu1 %v2178_v16, %s2256_s13  ;;  %v2180_v55 = vpop.eup %2179  ;;  %v2844_v16 = vld [vmem:[%s3039_s3] ss:$0 sm:$0xff] }
 0xe11   :  { %v1031_v56 = vadd.f32 1.0, %v2180_v55  ;;  %v2182_v57 = vpop.eup %2181 }
 0xe12   :  { %v1002_v58 = vadd.f32 1.0, %v2182_v57 }
 0xe13   :  { %2183 = vrcp.f32 %v1031_v56 }
 0xe14   :  { %1007 = vrot.lane.b32.xlu0 %v998_v25, %s2257_s22  ;;  %2185 = vrcp.f32 %v1002_v58 }
 0xe20   :  { %v2184_v59 = vpop.eup %2183 }
 0xe21   :  { %v2186_v63 = vpop.eup %2185 }
 0xe7e   :  { %v1042_v60 = vpop.permute.xlu0 %1041 }
 0xe7f   :  { %v1044_v61 = vmul.f32 %v2184_v59, %v1042_v60 }
 0xe81   :  { %1046 = vrot.lane.b32.xlu1 %v1044_v61, %s2257_s22 }
 0xe82   :  { %v1013_v6 = vpop.permute.xlu1 %1012  ;;  %v1037_v11 = vpop.permute.xlu0 %1036 }
 0xe83   :  { %v1015_v8 = vmul.f32 %v2186_v63, %v1013_v6  ;;  %v1039_v14 = vmul.f32 %v2184_v59, %v1037_v11 }
 0xe85   :  { %1017 = vrot.lane.b32.xlu1 %v1015_v8, %s2257_s22 }
 0xe86   :  { %v1008_v18 = vpop.permute.xlu0 %1007 }
 0xe87   :  { %v1010_v21 = vmul.f32 %v2186_v63, %v1008_v18 }
 0xef3   :  { %v1047_v19 = vpop.permute.xlu1 %1046 }
 0xef4   :  { %v1049_v20 = vadd.f32 %v1047_v19, %v1039_v14 }
 0xef6   :  { %2187 = vtanh.f32 %v1049_v20 }
 0xef7   :  { %v1018_v22 = vpop.permute.xlu1 %1017 }
 0xef8   :  { %v1020_v23 = vadd.f32 %v1018_v22, %v1010_v21 }
 0xefa   :  { %2189 = vtanh.f32 %v1020_v23 }
 0xf03   :  { %v2188_v27 = vpop.eup %2187 }
 0xf04   :  { %1052 = vrot.lane.b32.xlu0 %v2188_v27, %s2256_s13 }
 0xf07   :  { %v2190_v28 = vpop.eup %2189 }
 0xf08   :  { %1023 = vrot.lane.b32.xlu1 %v2190_v28, %s2256_s13 }
 0xf76   :  { %v1053_v31 = vpop.permute.xlu0 %1052 }
 0xf77   :  { %v2745_v32 = vmul.f32 %v2184_v59, %v1053_v31 }
 0xf79   :  { %1067 = vrot.lane.b32.xlu0 %v2745_v32, %s2257_s22 }
 0xf7a   :  { %v1024_v33 = vpop.permute.xlu1 %1023 }
 0xf7b   :  { %v1026_v36 = vmul.f32 %v2186_v63, %v1024_v33 }
 0xf7d   :  { %1057 = vrot.lane.b32.xlu1 %v1026_v36, %s2257_s22 }
 0xfeb   :  { %v1068_v37 = vpop.permute.xlu0 %1067 }
 0xfec   :  { %1070 = vst.msk [vmem:[#allocation4] sm:$0xff] %vm24_vm0, %v1068_v37 }
 0xfef   :  { %v2751_v38 = vpop.permute.xlu1 %1057 }
 0xff0   :  { %1060 = vst.msk [vmem:[#allocation2] sm:$0xff] %vm24_vm0, %v2751_v38 }
 0xff3   :  { %v1090_v40 = vld [vmem:[#allocation4] sm:$0xff] }
 0xff4   :  { %1092 = vrot.lane.b32.xlu0 %v1090_v40, %s2256_s13 }
 0xff7   :  { %v1083_v41 = vld [vmem:[#allocation2] sm:$0xff] }
 0xff8   :  { %1072 = vrot.lane.b32.xlu0 %v1049_v20, %s2258_s15  ;;  %1085 = vrot.lane.b32.xlu1 %v1083_v41, %s2256_s13 }
 0xffc   :  { %1062 = vrot.lane.b32.xlu1 %v1020_v23, %s2258_s15 }
0x1066   :  { %v1093_v42 = vpop.permute.xlu0 %1092 }
0x1067   :  { %v1095_v43 = vsel %vm63_vm2, %v2547_v30, %v1093_v42 }
0x1068   :  { %v1096_v44 = vpack.c.bf16 %v1095_v43, %v1095_v43 }
0x106a   :  { %2027 = vmatmul.mubr.msk.bf16.vlgmr.msra.gmra.mxu1 %vm115_vm3, %v1096_v44  ;;  %v1073_v1 = vpop.permute.xlu0 %1072  ;;  %v1086_v2 = vpop.permute.xlu1 %1085 }
0x106b   :  { %1075 = vst.msk [vmem:[#allocation5] sm:$0xff] %vm24_vm0, %v1073_v1  ;;  %v1088_v3 = vsel %vm63_vm2, %v2540_v24, %v1086_v2  ;;  %2047 = vmatpush3.bf16.msra.mxu1 %v2688_v45  ;;  %2058 = vmatprep.mubr.msk.bf16.mxu1 %vm2255_vm1, %v2254_v0  ;;  %v2781_v24 = vld [vmem:[%s3035_s2 + $0x18] sm:$0xff]  }
0x106c   :  { %v1089_v4 = vpack.c.bf16 %v1088_v3, %v1088_v3  ;;  %2048 = vmatprep.subr.bf16.mxu1 %v2254_v0 }
0x106e   :  { %2011 = vmatmul.mubr.msk.bf16.vlgmr.msra.gmra.mxu0 %vm115_vm3, %v1089_v4  ;;  %v1063_v30 = vpop.permute.xlu1 %1062 }
0x106f   :  { %1065 = vst.msk [vmem:[#allocation3] sm:$0xff] %vm24_vm0, %v1063_v30  ;;  %2031 = vmatpush3.bf16.msra.mxu0 %v2699_v35  ;;  %2049 = vmatpush3.bf16.msra.mxu1 %v2705_v47 }
0x1070   :  { %2032 = vmatprep.subr.bf16.mxu0 %v2254_v0  ;;  %2050 = vmatprep.subr.bf16.mxu1 %v2254_v0 }
0x1071   :  { %2042 = vmatprep.mubr.msk.bf16.mxu0 %vm2255_vm1, %v2254_v0 }
0x1072   :  { %v1212_v58 = vld [vmem:[#allocation5] sm:$0xff] }
0x1073   :  { %2033 = vmatpush3.bf16.msra.mxu0 %v2715_v48  ;;  %2051 = vmatpush3.bf16.msra.mxu1 %v2781_v24 }
0x1074   :  { %2034 = vmatprep.subr.bf16.mxu0 %v2254_v0  ;;  %2052 = vmatprep.subr.bf16.mxu1 %v2254_v0 }
0x1076   :  { %v1183_v59 = vld [vmem:[#allocation3] sm:$0xff] }
0x1077   :  { %2035 = vmatpush3.bf16.msra.mxu0 %v2789_v39  ;;  %2053 = vmatpush3.bf16.msra.mxu1 %v2795_v46 }
0x1078   :  { %2036 = vmatprep.subr.bf16.mxu0 %v2254_v0  ;;  %2054 = vmatprep.subr.bf16.mxu1 %v2254_v0 }
0x107b   :  { %2037 = vmatpush3.bf16.msra.mxu0 %v2803_v5  ;;  %2055 = vmatpush3.bf16.msra.mxu1 %v2809_v7 }
0x107c   :  { %2038 = vmatprep.subr.bf16.mxu0 %v2254_v0  ;;  %2056 = vmatprep.subr.bf16.mxu1 %v2254_v0 }
0x107f   :  { %2039 = vmatpush3.bf16.msra.mxu0 %v2817_v9  ;;  %2057 = vmatpush3.bf16.msra.mxu1 %v2823_v10 }
0x1080   :  { %2040 = vmatprep.subr.bf16.mxu0 %v2254_v0  ;;  %2078 = vmatprep.subr.bf16.mxu1 %v2254_v0 }
0x1083   :  { %2041 = vmatpush3.bf16.msra.mxu0 %v2831_v12 }
0x1084   :  { %2062 = vmatprep.subr.bf16.mxu0 %v2254_v0 }
0x112a   :  { %v1177_v49 = vpop.f32.mrf.mxu1 }
0x112b   :  { %v1178_v50 = vadd.f32 %v2838_v13, %v1177_v49 }
0x112c   :  { %v2028_v15 = vpop.f32.mrf.mxu1 }
0x112d   :  { %2191 = vtanh.f32 %v1178_v50  ;;  %v1709_v60 = vmul.f32 -1.442695, %v1178_v50  ;;  %v2253_v15 = vld [vmem:[%s3037_s0 + $0x8] sm:$0xff] }
0x112e   :  { %v1134_v51 = vpop.f32.mrf.mxu0  ;;  %v1180_v52 = vpop.f32.mrf.mxu1 }
0x112f   :  { %v1135_v53 = vadd.f32 %v2844_v16, %v1134_v51 }
0x1130   :  { %v2012_v25 = vpop.f32.mrf.mxu0  ;;  %v2029_v54 = vpop.f32.mrf.mxu1 }
0x1131   :  { %2193 = vtanh.f32 %v1135_v53  ;;  %v1708_v61 = vmul.f32 -1.442695, %v1135_v53  ;;  %v1712_v53 = vld [vmem:[%s3037_s0 + $0x30] sm:$0xff] }
0x1132   :  { %v1137_v29 = vpop.f32.mrf.mxu0  ;;  %2195 = vpow2.f32 %v1709_v60 }
0x1133   :  { %2197 = vpow2.f32 %v1708_v61 }
0x1134   :  { %v2013_v55 = vpop.f32.mrf.mxu0 }
0x113a   :  { %v2192_v56 = vpop.eup %2191 }
0x113b   :  { %1226 = vrot.lane.b32.xlu0 %v2192_v56, %s2256_s13 }
0x113e   :  { %v2194_v57 = vpop.eup %2193 }
0x113f   :  { %1221 = vrot.lane.b32.xlu0 %v1212_v58, %s2257_s22  ;;  %1197 = vrot.lane.b32.xlu1 %v2194_v57, %s2256_s13  ;;  %v2196_v63 = vpop.eup %2195 }
0x1140   :  { %v1216_v6 = vadd.f32 1.0, %v2196_v63  ;;  %v2198_v8 = vpop.eup %2197 }
0x1141   :  { %v1187_v11 = vadd.f32 1.0, %v2198_v8 }
0x1142   :  { %2199 = vrcp.f32 %v1216_v6 }
0x1143   :  { %1192 = vrot.lane.b32.xlu0 %v1183_v59, %s2257_s22  ;;  %2201 = vrcp.f32 %v1187_v11 }
0x114f   :  { %v2200_v14 = vpop.eup %2199 }
0x1150   :  { %v2202_v20 = vpop.eup %2201 }
0x11ad   :  { %v1227_v18 = vpop.permute.xlu0 %1226 }
0x11ae   :  { %v1229_v19 = vmul.f32 %v2200_v14, %v1227_v18 }
0x11b0   :  { %1231 = vrot.lane.b32.xlu1 %v1229_v19, %s2257_s22 }
0x11b1   :  { %v1198_v21 = vpop.permute.xlu1 %1197  ;;  %v1222_v23 = vpop.permute.xlu0 %1221 }
0x11b2   :  { %v1200_v22 = vmul.f32 %v2202_v20, %v1198_v21  ;;  %v1224_v27 = vmul.f32 %v2200_v14, %v1222_v23 }
0x11b4   :  { %1202 = vrot.lane.b32.xlu1 %v1200_v22, %s2257_s22 }
0x11b5   :  { %v1193_v28 = vpop.permute.xlu0 %1192 }
0x11b6   :  { %v1195_v36 = vmul.f32 %v2202_v20, %v1193_v28 }
0x1222   :  { %v1232_v31 = vpop.permute.xlu1 %1231 }
0x1223   :  { %v1234_v33 = vadd.f32 %v1232_v31, %v1224_v27 }
0x1225   :  { %2203 = vtanh.f32 %v1234_v33 }
0x1226   :  { %v1203_v37 = vpop.permute.xlu1 %1202 }
0x1227   :  { %v1205_v40 = vadd.f32 %v1203_v37, %v1195_v36 }
0x1229   :  { %2205 = vtanh.f32 %v1205_v40 }
0x1232   :  { %v2204_v41 = vpop.eup %2203 }
0x1233   :  { %1237 = vrot.lane.b32.xlu0 %v2204_v41, %s2256_s13 }
0x1236   :  { %v2206_v42 = vpop.eup %2205 }
0x1237   :  { %1208 = vrot.lane.b32.xlu1 %v2206_v42, %s2256_s13 }
0x12a5   :  { %v1238_v43 = vpop.permute.xlu0 %1237 }
0x12a6   :  { %v2855_v44 = vmul.f32 %v2200_v14, %v1238_v43 }
0x12a8   :  { %1252 = vrot.lane.b32.xlu0 %v2855_v44, %s2257_s22 }
0x12a9   :  { %v1209_v1 = vpop.permute.xlu1 %1208 }
0x12aa   :  { %v1211_v2 = vmul.f32 %v2202_v20, %v1209_v1 }
0x12ac   :  { %1242 = vrot.lane.b32.xlu1 %v1211_v2, %s2257_s22 }
0x131a   :  { %v1253_v3 = vpop.permute.xlu0 %1252 }
0x131b   :  { %1255 = vst.msk [vmem:[#allocation4] sm:$0xff] %vm24_vm0, %v1253_v3 }
0x131e   :  { %v2861_v4 = vpop.permute.xlu1 %1242 }
0x131f   :  { %1245 = vst.msk [vmem:[#allocation2] sm:$0xff] %vm24_vm0, %v2861_v4 }
0x1322   :  { %v1275_v30 = vld [vmem:[#allocation4] sm:$0xff] }
0x1323   :  { %1277 = vrot.lane.b32.xlu0 %v1275_v30, %s2256_s13 }
0x1326   :  { %v1268_v49 = vld [vmem:[#allocation2] sm:$0xff] }
0x1327   :  { %1257 = vrot.lane.b32.xlu0 %v1234_v33, %s2258_s15  ;;  %1270 = vrot.lane.b32.xlu1 %v1268_v49, %s2256_s13 }
0x132b   :  { %1247 = vrot.lane.b32.xlu1 %v1205_v40, %s2258_s15 }
0x1395   :  { %v1278_v50 = vpop.permute.xlu0 %1277 }
0x1396   :  { %v1280_v51 = vsel %vm63_vm2, %v2253_v15, %v1278_v50  ;;  %v1452_v50 = vld [vmem:[%s3037_s0] sm:$0xff] }
0x1397   :  { %v1281_v52 = vpack.c.bf16 %v1280_v51, %v1280_v51 }
0x1399   :  { %2059 = vmatmul.mubr.msk.bf16.vlgmr.msra.gmra.mxu1 %vm115_vm3, %v1281_v52  ;;  %v1258_v25 = vpop.permute.xlu0 %1257  ;;  %v1271_v54 = vpop.permute.xlu1 %1270 }
0x139a   :  { %1260 = vst.msk [vmem:[#allocation5] sm:$0xff] %vm24_vm0, %v1258_v25  ;;  %v1273_v29 = vsel %vm63_vm2, %v1712_v53, %v1271_v54  ;;  %2079 = vmatpush3.bf16.msra.mxu1 %v2688_v45  ;;  %2090 = vmatprep.mubr.msk.bf16.mxu1 %vm2255_vm1, %v2254_v0  ;;  %v1720_v53 = vld [vmem:[%s3037_s0 + $0x38] sm:$0xff] }
0x139b   :  { %v1274_v55 = vpack.c.bf16 %v1273_v29, %v1273_v29  ;;  %2080 = vmatprep.subr.bf16.mxu1 %v2254_v0 }
0x139d   :  { %2043 = vmatmul.mubr.msk.bf16.vlgmr.msra.gmra.mxu0 %vm115_vm3, %v1274_v55  ;;  %v1248_v56 = vpop.permute.xlu1 %1247 }
0x139e   :  { %1250 = vst.msk [vmem:[#allocation3] sm:$0xff] %vm24_vm0, %v1248_v56  ;;  %2063 = vmatpush3.bf16.msra.mxu0 %v2699_v35  ;;  %2081 = vmatpush3.bf16.msra.mxu1 %v2705_v47 }
0x139f   :  { %2064 = vmatprep.subr.bf16.mxu0 %v2254_v0  ;;  %2082 = vmatprep.subr.bf16.mxu1 %v2254_v0 }
0x13a0   :  { %2074 = vmatprep.mubr.msk.bf16.mxu0 %vm2255_vm1, %v2254_v0 }
0x13a2   :  { %2065 = vmatpush3.bf16.msra.mxu0 %v2715_v48  ;;  %2083 = vmatpush3.bf16.msra.mxu1 %v2781_v24 }
0x13a3   :  { %2066 = vmatprep.subr.bf16.mxu0 %v2254_v0  ;;  %2084 = vmatprep.subr.bf16.mxu1 %v2254_v0 }
0x13a6   :  { %2067 = vmatpush3.bf16.msra.mxu0 %v2789_v39  ;;  %2085 = vmatpush3.bf16.msra.mxu1 %v2795_v46 }
0x13a7   :  { %2068 = vmatprep.subr.bf16.mxu0 %v2254_v0  ;;  %2086 = vmatprep.subr.bf16.mxu1 %v2254_v0 }
0x13aa   :  { %2069 = vmatpush3.bf16.msra.mxu0 %v2803_v5  ;;  %2087 = vmatpush3.bf16.msra.mxu1 %v2809_v7 }
0x13ab   :  { %2070 = vmatprep.subr.bf16.mxu0 %v2254_v0  ;;  %2088 = vmatprep.subr.bf16.mxu1 %v2254_v0 }
0x13ae   :  { %2071 = vmatpush3.bf16.msra.mxu0 %v2817_v9  ;;  %2089 = vmatpush3.bf16.msra.mxu1 %v2823_v10  ;;  %v1397_v10 = vld [vmem:[#allocation5] sm:$0xff] }
0x13af   :  { %2072 = vmatprep.subr.bf16.mxu0 %v2254_v0 }
0x13b2   :  { %2073 = vmatpush3.bf16.msra.mxu0 %v2831_v12  ;;  %v1368_v12 = vld [vmem:[#allocation3] sm:$0xff] }
0x1459   :  { %v1362_v45 = vpop.f32.mrf.mxu1 }
0x145a   :  { %v1363_v35 = vadd.f32 %v2838_v13, %v1362_v45 }
0x145b   :  { %v2060_v47 = vpop.f32.mrf.mxu1 }
0x145c   :  { %2207 = vtanh.f32 %v1363_v35  ;;  %v1717_v58 = vmul.f32 -1.442695, %v1363_v35 }
0x145d   :  { %v1319_v48 = vpop.f32.mrf.mxu0  ;;  %v1365_v24 = vpop.f32.mrf.mxu1 }
0x145e   :  { %v1320_v39 = vadd.f32 %v2844_v16, %v1319_v48 }
0x145f   :  { %v2044_v46 = vpop.f32.mrf.mxu0  ;;  %v2061_v5 = vpop.f32.mrf.mxu1 }
0x1460   :  { %2209 = vtanh.f32 %v1320_v39  ;;  %v1716_v59 = vmul.f32 -1.442695, %v1320_v39 }
0x1461   :  { %v1322_v7 = vpop.f32.mrf.mxu0  ;;  %2211 = vpow2.f32 %v1717_v58 }
0x1462   :  { %2213 = vpow2.f32 %v1716_v59 }
0x1463   :  { %v2045_v9 = vpop.f32.mrf.mxu0 }
0x1469   :  { %v2208_v57 = vpop.eup %2207 }
0x146a   :  { %1411 = vrot.lane.b32.xlu0 %v2208_v57, %s2256_s13 }
0x146d   :  { %v2210_v0 = vpop.eup %2209 }
0x146e   :  { %1406 = vrot.lane.b32.xlu0 %v1397_v10, %s2257_s22  ;;  %1382 = vrot.lane.b32.xlu1 %v2210_v0, %s2256_s13  ;;  %v2212_v60 = vpop.eup %2211 }
0x146f   :  { %v1401_v61 = vadd.f32 1.0, %v2212_v60  ;;  %v2214_v63 = vpop.eup %2213 }
0x1470   :  { %v1372_v6 = vadd.f32 1.0, %v2214_v63 }
0x1471   :  { %2215 = vrcp.f32 %v1401_v61 }
0x1472   :  { %1377 = vrot.lane.b32.xlu0 %v1368_v12, %s2257_s22  ;;  %2217 = vrcp.f32 %v1372_v6 }
0x147e   :  { %v2216_v8 = vpop.eup %2215 }
0x147f   :  { %v2218_v18 = vpop.eup %2217 }
0x14dc   :  { %v1412_v11 = vpop.permute.xlu0 %1411 }
0x14dd   :  { %v1414_v14 = vmul.f32 %v2216_v8, %v1412_v11 }
0x14df   :  { %1416 = vrot.lane.b32.xlu1 %v1414_v14, %s2257_s22 }
0x14e0   :  { %v1383_v19 = vpop.permute.xlu1 %1382  ;;  %v1407_v21 = vpop.permute.xlu0 %1406 }
0x14e1   :  { %v1385_v20 = vmul.f32 %v2218_v18, %v1383_v19  ;;  %v1409_v22 = vmul.f32 %v2216_v8, %v1407_v21 }
0x14e3   :  { %1387 = vrot.lane.b32.xlu1 %v1385_v20, %s2257_s22 }
0x14e4   :  { %v1378_v23 = vpop.permute.xlu0 %1377 }
0x14e5   :  { %v1380_v31 = vmul.f32 %v2218_v18, %v1378_v23 }
0x1551   :  { %v1417_v27 = vpop.permute.xlu1 %1416 }
0x1552   :  { %v1419_v28 = vadd.f32 %v1417_v27, %v1409_v22 }
0x1554   :  { %2219 = vtanh.f32 %v1419_v28 }
0x1555   :  { %v1388_v33 = vpop.permute.xlu1 %1387 }
0x1556   :  { %v1390_v36 = vadd.f32 %v1388_v33, %v1380_v31 }
0x1558   :  { %2221 = vtanh.f32 %v1390_v36 }
0x1561   :  { %v2220_v37 = vpop.eup %2219 }
0x1562   :  { %1422 = vrot.lane.b32.xlu0 %v2220_v37, %s2256_s13 }
0x1565   :  { %v2222_v40 = vpop.eup %2221 }
0x1566   :  { %1393 = vrot.lane.b32.xlu1 %v2222_v40, %s2256_s13 }
0x15d4   :  { %v1423_v41 = vpop.permute.xlu0 %1422 }
0x15d5   :  { %v2917_v42 = vmul.f32 %v2216_v8, %v1423_v41 }
0x15d7   :  { %1437 = vrot.lane.b32.xlu0 %v2917_v42, %s2257_s22 }
0x15d8   :  { %v1394_v43 = vpop.permute.xlu1 %1393 }
0x15d9   :  { %v1396_v1 = vmul.f32 %v2218_v18, %v1394_v43 }
0x15db   :  { %1427 = vrot.lane.b32.xlu1 %v1396_v1, %s2257_s22 }
0x1649   :  { %v1438_v2 = vpop.permute.xlu0 %1437 }
0x164a   :  { %1440 = vst.msk [vmem:[#allocation4] sm:$0xff] %vm24_vm0, %v1438_v2 }
0x164d   :  { %v2923_v3 = vpop.permute.xlu1 %1427 }
0x164e   :  { %1430 = vst.msk [vmem:[#allocation2] sm:$0xff] %vm24_vm0, %v2923_v3 }
0x1651   :  { %v1460_v30 = vld [vmem:[#allocation4] sm:$0xff] }
0x1652   :  { %1462 = vrot.lane.b32.xlu0 %v1460_v30, %s2256_s13 }
0x1655   :  { %v1453_v49 = vld [vmem:[#allocation2] sm:$0xff] }
0x1656   :  { %1442 = vrot.lane.b32.xlu0 %v1419_v28, %s2258_s15  ;;  %1455 = vrot.lane.b32.xlu1 %v1453_v49, %s2256_s13 }
0x165a   :  { %1432 = vrot.lane.b32.xlu1 %v1390_v36, %s2258_s15 }
0x16c4   :  { %v1463_v15 = vpop.permute.xlu0 %1462 }
0x16c5   :  { %v1465_v51 = vsel %vm63_vm2, %v1452_v50, %v1463_v15 }
0x16c6   :  { %v1466_v52 = vpack.c.bf16 %v1465_v51, %v1465_v51 }
0x16c8   :  { %2091 = vmatmul.mubr.msk.bf16.vlgmr.msra.gmra.mxu1 %vm115_vm3, %v1466_v52  ;;  %v1443_v25 = vpop.permute.xlu0 %1442  ;;  %v1456_v54 = vpop.permute.xlu1 %1455 }
0x16c9   :  { %1445 = vst.msk [vmem:[#allocation5] sm:$0xff] %vm24_vm0, %v1443_v25  ;;  %v1458_v29 = vsel %vm63_vm2, %v1720_v53, %v1456_v54 }
0x16ca   :  { %v1459_v55 = vpack.c.bf16 %v1458_v29, %v1458_v29 }
0x16cc   :  { %2075 = vmatmul.mubr.msk.bf16.vlgmr.msra.gmra.mxu0 %vm115_vm3, %v1459_v55  ;;  %v1433_v56 = vpop.permute.xlu1 %1432 }
0x16cd   :  { %1435 = vst.msk [vmem:[#allocation3] sm:$0xff] %vm24_vm0, %v1433_v56 }
0x16d0   :  { %v1582_v10 = vld [vmem:[#allocation5] sm:$0xff] }
0x1788   :  { %v1547_v45 = vpop.f32.mrf.mxu1 }
0x1789   :  { %v1548_v35 = vadd.f32 %v2838_v13, %v1547_v45  ;;  %v1553_v13 = vld [vmem:[#allocation3] sm:$0xff] }
0x178a   :  { %v2092_v47 = vpop.f32.mrf.mxu1 }
0x178b   :  { %2223 = vtanh.f32 %v1548_v35  ;;  %v1724_v12 = vmul.f32 -1.442695, %v1548_v35 }
0x178c   :  { %v1504_v48 = vpop.f32.mrf.mxu0  ;;  %v1550_v24 = vpop.f32.mrf.mxu1 }
0x178d   :  { %v1505_v39 = vadd.f32 %v2844_v16, %v1504_v48 }
0x178e   :  { %v2076_v46 = vpop.f32.mrf.mxu0  ;;  %v2093_v5 = vpop.f32.mrf.mxu1 }
0x178f   :  { %2225 = vtanh.f32 %v1505_v39  ;;  %v1723_v16 = vmul.f32 -1.442695, %v1505_v39 }
0x1790   :  { %v1507_v7 = vpop.f32.mrf.mxu0  ;;  %2227 = vpow2.f32 %v1724_v12 }
0x1791   :  { %2229 = vpow2.f32 %v1723_v16 }
0x1792   :  { %v2077_v9 = vpop.f32.mrf.mxu0 }
0x1798   :  { %v2224_v57 = vpop.eup %2223 }
0x1799   :  { %1596 = vrot.lane.b32.xlu0 %v2224_v57, %s2256_s13 }
0x179c   :  { %v2226_v0 = vpop.eup %2225 }
0x179d   :  { %1591 = vrot.lane.b32.xlu0 %v1582_v10, %s2257_s22  ;;  %1567 = vrot.lane.b32.xlu1 %v2226_v0, %s2256_s13  ;;  %v2228_v58 = vpop.eup %2227 }
0x179e   :  { %v1586_v59 = vadd.f32 1.0, %v2228_v58  ;;  %v2230_v60 = vpop.eup %2229 }
0x179f   :  { %v1557_v61 = vadd.f32 1.0, %v2230_v60 }
0x17a0   :  { %2231 = vrcp.f32 %v1586_v59 }
0x17a1   :  { %1562 = vrot.lane.b32.xlu0 %v1553_v13, %s2257_s22  ;;  %2233 = vrcp.f32 %v1557_v61 }
0x17ad   :  { %v2232_v63 = vpop.eup %2231 }
0x17ae   :  { %v2234_v11 = vpop.eup %2233 }
0x180b   :  { %v1597_v6 = vpop.permute.xlu0 %1596 }
0x180c   :  { %v1599_v8 = vmul.f32 %v2232_v63, %v1597_v6 }
0x180e   :  { %1601 = vrot.lane.b32.xlu1 %v1599_v8, %s2257_s22 }
0x180f   :  { %v1568_v14 = vpop.permute.xlu1 %1567  ;;  %v1592_v19 = vpop.permute.xlu0 %1591 }
0x1810   :  { %v1570_v18 = vmul.f32 %v2234_v11, %v1568_v14  ;;  %v1594_v20 = vmul.f32 %v2232_v63, %v1592_v19 }
0x1812   :  { %1572 = vrot.lane.b32.xlu1 %v1570_v18, %s2257_s22 }
0x1813   :  { %v1563_v21 = vpop.permute.xlu0 %1562 }
0x1814   :  { %v1565_v27 = vmul.f32 %v2234_v11, %v1563_v21 }
0x1880   :  { %v1602_v22 = vpop.permute.xlu1 %1601 }
0x1881   :  { %v1604_v23 = vadd.f32 %v1602_v22, %v1594_v20 }
0x1883   :  { %2235 = vtanh.f32 %v1604_v23 }
0x1884   :  { %v1573_v28 = vpop.permute.xlu1 %1572 }
0x1885   :  { %v1575_v31 = vadd.f32 %v1573_v28, %v1565_v27 }
0x1887   :  { %2237 = vtanh.f32 %v1575_v31 }
0x1890   :  { %v2236_v33 = vpop.eup %2235 }
0x1891   :  { %1607 = vrot.lane.b32.xlu0 %v2236_v33, %s2256_s13 }
0x1894   :  { %v2238_v36 = vpop.eup %2237 }
0x1895   :  { %323 = vrot.lane.b32.xlu0 %v2457_v62, %s2256_s13  ;;  %1578 = vrot.lane.b32.xlu1 %v2238_v36, %s2256_s13 }
0x1899   :  { %702 = vrot.lane.b32.xlu0 %v2593_v26, %s2256_s13  ;;  %1627 = vrot.lane.b32.xlu1 %v1604_v23, %s2258_s15 }
0x189d   :  { %1077 = vrot.lane.b32.xlu0 %v2745_v32, %s2256_s13  ;;  %513 = vrot.lane.b32.xlu1 %v2522_v17, %s2256_s13 }
0x18a1   :  { %891 = vrot.lane.b32.xlu1 %v2664_v34, %s2256_s13 }
0x18a5   :  { %1262 = vrot.lane.b32.xlu1 %v2855_v44, %s2256_s13 }
0x1903   :  { %v1608_v62 = vpop.permute.xlu0 %1607 }
0x1904   :  { %v1610_v37 = vmul.f32 %v2232_v63, %v1608_v62 }
0x1906   :  { %1622 = vrot.lane.b32.xlu0 %v1610_v37, %s2257_s22 }
0x1907   :  { %v324_v26 = vpop.permute.xlu0 %323  ;;  %v1579_v40 = vpop.permute.xlu1 %1578 }
0x1908   :  { %1671 = vst.msk [vmem:[%s3040_s5 + $0x38] sm:$0xff] %vm327_vm4, %v324_v26  ;;  %v1581_v32 = vmul.f32 %v2234_v11, %v1579_v40 }
0x190a   :  { %1447 = vrot.lane.b32.xlu0 %v2917_v42, %s2256_s13  ;;  %1612 = vrot.lane.b32.xlu1 %v1581_v32, %s2257_s22 }
0x190b   :  { %v703_v17 = vpop.permute.xlu0 %702  ;;  %v1628_v34 = vpop.permute.xlu1 %1627 }
0x190c   :  { %1687 = vst.msk [vmem:[%s3040_s5 + $0x28] sm:$0xff] %vm327_vm4, %v703_v17 }
0x190d   :  { %1630 = vst.msk [vmem:[#allocation5] sm:$0xff] %vm24_vm0, %v1628_v34  ;;  %1710 = vst.msk [vmem:[%s3040_s5 + $0x28] sm:$0xff] %vm24_vm0, %v2861_v4 }
0x190e   :  { %1617 = vrot.lane.b32.xlu0 %v1575_v31, %s2258_s15  ;;  %1632 = vrot.lane.b32.xlu1 %v1610_v37, %s2256_s13 }
0x190f   :  { %v1078_v44 = vpop.permute.xlu0 %1077  ;;  %v514_v41 = vpop.permute.xlu1 %513 }
0x1910   :  { %1703 = vst.msk [vmem:[%s3040_s5 + $0x18] sm:$0xff] %vm327_vm4, %v1078_v44  ;;  %1679 = vst.msk [vmem:[%s3040_s5 + $0x30] sm:$0xff] %vm327_vm4, %v514_v41 }
0x1911   :  { %1718 = vst.msk [vmem:[%s3040_s5 + $0x30] sm:$0xff] %vm24_vm0, %v2923_v3 }
0x1913   :  { %v892_v42 = vpop.permute.xlu1 %891 }
0x1914   :  { %v1638_v4 = vld [vmem:[#allocation5] sm:$0xff]  ;;  %1695 = vst.msk [vmem:[%s3040_s5 + $0x20] sm:$0xff] %vm327_vm4, %v892_v42 }
0x1915   :  { %1639 = vst.msk [vmem:[%s3041_s7] sm:$0xff] %vm24_vm0, %v1638_v4  ;;  %1702 = vst.msk [vmem:[%s3040_s5 + $0x20] sm:$0xff] %vm24_vm0, %v2751_v38 }
0x1917   :  { %v1263_v43 = vpop.permute.xlu1 %1262 }
0x1918   :  { %1711 = vst.msk [vmem:[%s3040_s5 + $0x10] sm:$0xff] %vm327_vm4, %v1263_v43 }
0x1978   :  { %v1623_v1 = vpop.permute.xlu0 %1622 }
0x1979   :  { %1625 = vst.msk [vmem:[#allocation4] sm:$0xff] %vm24_vm0, %v1623_v1 }
0x197c   :  { %v1448_v2 = vpop.permute.xlu0 %1447  ;;  %v1613_v3 = vpop.permute.xlu1 %1612 }
0x197d   :  { %1719 = vst.msk [vmem:[%s3040_s5 + $0x8] sm:$0xff] %vm327_vm4, %v1448_v2 }
0x197e   :  { %1615 = vst.msk [vmem:[#allocation2] sm:$0xff] %vm24_vm0, %v1613_v3  ;;  %1725 = vst.msk [vmem:[%s3040_s5 + $0x38] sm:$0xff] %vm24_vm0, %v1613_v3 }
0x1980   :  { %v1636_v38 = vld [vmem:[#allocation4] sm:$0xff]  ;;  %v1618_v30 = vpop.permute.xlu0 %1617  ;;  %v1633_v49 = vpop.permute.xlu1 %1632 }
0x1981   :  { %1637 = vst.msk [vmem:[%s3042_s6] sm:$0xff] %vm24_vm0, %v1636_v38  ;;  %1620 = vst.msk [vmem:[#allocation3] sm:$0xff] %vm24_vm0, %v1618_v30 }
0x1982   :  { %1635 = vst.msk [vmem:[%s3040_s5] sm:$0xff] %vm327_vm4, %v1633_v49 }

// kernel: encoder_lstm_forward.2
= control target key start
LH: loop header
LB: loop body
LE: loop exit
PB: predicated region body
PF: predicated region fallthrough
CT: control target
= control target key end

     0   :  { %vm24_vm0 = vcmask 261120   ;;  %v2044_v0 = vmov 0.0   ;;  %vm2045_vm1 = vmmov 0   ;;  %s2046_s13 = smov 16   ;;  %s2047_s14 = smov 32   ;;  %vm51_vm2 = vcmask 130048   ;;  %s2672_s2 = inlined_call_operand.vmem [shape: bf16[48,128], index: 2, kind: input, shape index: {}]   ;;  %s2673_s1 = inlined_call_operand.vmem [shape: bf16[48,128], index: 1, kind: input, shape index: {}]   ;;  %s2674_s0 = inlined_call_operand.vmem [shape: f32[8,8,16], index: 0, kind: input, shape index: {}]   ;;  %s2675_s4 = inlined_call_operand.vmem [shape: f32[1,128], index: 4, kind: input, shape index: {}]   ;;  %s2676_s3 = inlined_call_operand.vmem [shape: f32[1,128], index: 3, kind: input, shape index: {}]   ;;  %s2677_s5 = inlined_call_operand.vmem [shape: f32[8,8,64], index: 5, kind: output, shape index: {0}]   ;;  %s2678_s7 = inlined_call_operand.vmem [shape: f32[8,32], index: 7, kind: output, shape index: {2}]   ;;  %s2679_s6 = inlined_call_operand.vmem [shape: f32[8,32], index: 6, kind: output, shape index: {1}]  }
   0x1   :  { %27 = vst.msk [vmem:[#allocation4] sm:$0xff] %vm24_vm0, %v2044_v0  ;;  %25 = vst.msk [vmem:[#allocation2] sm:$0xff] %vm24_vm0, %v2044_v0  ;;  %1746 = vmatprep.subr.bf16.mxu1 %v2044_v0  ;;  %v2102_v1 = vld [vmem:[%s2672_s2 + $0x10] sm:$0xff]   ;;  %1736 = vmatprep.subr.bf16.mxu0 %v2044_v0  ;;  %v2118_v3 = vld [vmem:[%s2672_s2 + $0x8] sm:$0xff]   ;;  %vm85_vm3 = vcmask 392192   ;;  %s2048_s23 = smov 64  }
   0x2   :  { %26 = vst.msk [vmem:[#allocation3] sm:$0xff] %vm24_vm0, %v2044_v0  ;;  %28 = vst.msk [vmem:[#allocation5] sm:$0xff] %vm24_vm0, %v2044_v0  ;;  %v2108_v2 = vld [vmem:[%s2673_s1 + $0x10] sm:$0xff]   ;;  %1752 = vmatprep.mubr.msk.bf16.mxu1 %vm2045_vm1, %v2044_v0  ;;  %1742 = vmatprep.mubr.msk.bf16.mxu0 %vm2045_vm1, %v2044_v0  ;;  %v2126_v4 = vld [vmem:[%s2673_s1 + $0x8] sm:$0xff]   ;;  %s2049_s26 = smov 96   ;;  %vm279_vm4 = vcmask 523520  }
   0x3   :  { %1747 = vmatpush3.bf16.msra.mxu1 %v2102_v1  ;;  %1737 = vmatpush3.bf16.msra.mxu0 %v2108_v2  ;;  %v2132_v5 = vld [vmem:[%s2672_s2] sm:$0xff]   ;;  %v1604_v11 = vld [vmem:[%s2674_s0 + $0x38] sm:$0xff]  ;;  %v2212_v63 = vld [vmem:[%s2674_s0 + $0x30] sm:$0xff] }
   0x4   :  { %1748 = vmatprep.subr.bf16.mxu1 %v2044_v0  ;;  %1738 = vmatprep.subr.bf16.mxu0 %v2044_v0  ;;  %v2139_v7 = vld [vmem:[%s2673_s1] sm:$0xff]  }
   0x5   :  { %v43_v15 = vld [vmem:[%s2674_s0] sm:$0xff] }
   0x6   :  { %v2179_v19 = vld [vmem:[%s2675_s4] ss:$0 sm:$0xff] }
   0x7   :  { %1749 = vmatpush3.bf16.msra.mxu1 %v2118_v3  ;;  %1739 = vmatpush3.bf16.msra.mxu0 %v2126_v4  ;;  %v2185_v23 = vld [vmem:[%s2676_s3] ss:$0 sm:$0xff] }
   0x8   :  { %v54_v6 = vld [vmem:[#allocation4] sm:$0xff]  ;;  %1750 = vmatprep.subr.bf16.mxu1 %v2044_v0  ;;  %1740 = vmatprep.subr.bf16.mxu0 %v2044_v0  ;;  %v46_v8 = vld [vmem:[#allocation2] sm:$0xff] }
   0x9   :  { %56 = vrot.lane.b32.xlu0 %v54_v6, %s2046_s13  ;;  %v225_v9 = vld [vmem:[#allocation5] sm:$0xff]  ;;  %v196_v10 = vld [vmem:[#allocation3] sm:$0xff] }
   0xb   :  { %1751 = vmatpush3.bf16.msra.mxu1 %v2132_v5  ;;  %1741 = vmatpush3.bf16.msra.mxu0 %v2139_v7 }
   0xc   :  { %1766 = vmatprep.subr.bf16.mxu1 %v2044_v0  ;;  %1756 = vmatprep.subr.bf16.mxu0 %v2044_v0 }
   0xd   :  { %48 = vrot.lane.b32.xlu0 %v46_v8, %s2046_s13 }
  0x11   :  { %234 = vrot.lane.b32.xlu0 %v225_v9, %s2047_s14 }
  0x15   :  { %205 = vrot.lane.b32.xlu0 %v196_v10, %s2047_s14  ;;  %v2219_v10 = vld [vmem:[%s2674_s0 + $0x8] sm:$0xff] }
  0x7b   :  { %v57_v12 = vpop.permute.xlu0 %56 }
  0x7c   :  { %v59_v13 = vsel %vm51_vm2, %v1604_v11, %v57_v12 }
  0x7d   :  { %v60_v14 = vpack.c.bf16 %v59_v13, %v59_v13 }
  0x7f   :  { %v49_v16 = vpop.permute.xlu0 %48  ;;  %1753 = vmatmul.mubr.msk.bf16.vlgmr.msra.gmra.mxu1 %vm85_vm3, %v60_v14 }
  0x80   :  { %v52_v17 = vsel %vm51_vm2, %v43_v15, %v49_v16  ;;  %1767 = vmatpush3.bf16.msra.mxu1 %v2102_v1  ;;  %1772 = vmatprep.mubr.msk.bf16.mxu1 %vm2045_vm1, %v2044_v0 }
  0x81   :  { %v53_v18 = vpack.c.bf16 %v52_v17, %v52_v17  ;;  %1768 = vmatprep.subr.bf16.mxu1 %v2044_v0 }
  0x83   :  { %1743 = vmatmul.mubr.msk.bf16.vlgmr.msra.gmra.mxu0 %vm85_vm3, %v53_v18  ;;  %v235_v45 = vpop.permute.xlu0 %234 }
  0x84   :  { %1757 = vmatpush3.bf16.msra.mxu0 %v2108_v2  ;;  %1769 = vmatpush3.bf16.msra.mxu1 %v2118_v3 }
  0x85   :  { %1758 = vmatprep.subr.bf16.mxu0 %v2044_v0  ;;  %1770 = vmatprep.subr.bf16.mxu1 %v2044_v0 }
  0x86   :  { %1762 = vmatprep.mubr.msk.bf16.mxu0 %vm2045_vm1, %v2044_v0 }
  0x87   :  { %v206_v47 = vpop.permute.xlu0 %205 }
  0x88   :  { %1759 = vmatpush3.bf16.msra.mxu0 %v2126_v4  ;;  %1771 = vmatpush3.bf16.msra.mxu1 %v2132_v5 }
  0x89   :  { %1760 = vmatprep.subr.bf16.mxu0 %v2044_v0  ;;  %1786 = vmatprep.subr.bf16.mxu1 %v2044_v0 }
  0x8c   :  { %1761 = vmatpush3.bf16.msra.mxu0 %v2139_v7 }
  0x8d   :  { %1776 = vmatprep.subr.bf16.mxu0 %v2044_v0 }
 0x13f   :  { %v190_v20 = vpop.f32.mrf.mxu1 }
 0x140   :  { %v191_v21 = vadd.f32 %v2179_v19, %v190_v20 }
 0x141   :  { %v1754_v22 = vpop.f32.mrf.mxu1 }
 0x142   :  { %1908 = vtanh.f32 %v191_v21  ;;  %v1616_v33 = vmul.f32 -1.442695, %v191_v21 }
 0x143   :  { %v123_v24 = vpop.f32.mrf.mxu0  ;;  %v193_v25 = vpop.f32.mrf.mxu1 }
 0x144   :  { %v124_v26 = vadd.f32 %v2185_v23, %v123_v24 }
 0x145   :  { %v1744_v27 = vpop.f32.mrf.mxu0  ;;  %v1755_v28 = vpop.f32.mrf.mxu1 }
 0x146   :  { %1910 = vtanh.f32 %v124_v26  ;;  %v1615_v34 = vmul.f32 -1.442695, %v124_v26 }
 0x147   :  { %v126_v29 = vpop.f32.mrf.mxu0  ;;  %1912 = vpow2.f32 %v1616_v33 }
 0x148   :  { %1914 = vpow2.f32 %v1615_v34 }
 0x149   :  { %v1745_v30 = vpop.f32.mrf.mxu0 }
 0x14f   :  { %v1909_v31 = vpop.eup %1908 }
 0x150   :  { %239 = vrot.lane.b32.xlu1 %v1909_v31, %s2048_s23 }
 0x153   :  { %v1911_v32 = vpop.eup %1910 }
 0x154   :  { %210 = vrot.lane.b32.xlu1 %v1911_v32, %s2048_s23  ;;  %v1913_v35 = vpop.eup %1912 }
 0x155   :  { %v229_v36 = vadd.f32 1.0, %v1913_v35  ;;  %v1915_v37 = vpop.eup %1914 }
 0x156   :  { %v200_v38 = vadd.f32 1.0, %v1915_v37 }
 0x157   :  { %1916 = vrcp.f32 %v229_v36 }
 0x158   :  { %1918 = vrcp.f32 %v200_v38 }
 0x164   :  { %v1917_v39 = vpop.eup %1916 }
 0x165   :  { %v1919_v42 = vpop.eup %1918  ;;  %v237_v46 = vmul.f32 %v1917_v39, %v235_v45 }
 0x166   :  { %v208_v50 = vmul.f32 %v1919_v42, %v206_v47 }
 0x1c2   :  { %v240_v40 = vpop.permute.xlu1 %239 }
 0x1c3   :  { %v242_v41 = vmul.f32 %v1917_v39, %v240_v40 }
 0x1c5   :  { %244 = vrot.lane.b32.xlu1 %v242_v41, %s2047_s14 }
 0x1c6   :  { %v211_v43 = vpop.permute.xlu1 %210 }
 0x1c7   :  { %v213_v44 = vmul.f32 %v1919_v42, %v211_v43 }
 0x1c9   :  { %215 = vrot.lane.b32.xlu1 %v213_v44, %s2047_s14 }
 0x237   :  { %v245_v48 = vpop.permute.xlu1 %244 }
 0x238   :  { %v247_v49 = vadd.f32 %v245_v48, %v237_v46 }
 0x23a   :  { %1920 = vtanh.f32 %v247_v49 }
 0x23b   :  { %v216_v51 = vpop.permute.xlu1 %215 }
 0x23c   :  { %v218_v52 = vadd.f32 %v216_v51, %v208_v50 }
 0x23e   :  { %1922 = vtanh.f32 %v218_v52 }
 0x247   :  { %v1921_v53 = vpop.eup %1920 }
 0x248   :  { %250 = vrot.lane.b32.xlu0 %v1921_v53, %s2048_s23 }
 0x24b   :  { %v1923_v54 = vpop.eup %1922 }
 0x24c   :  { %221 = vrot.lane.b32.xlu1 %v1923_v54, %s2048_s23 }
 0x2ba   :  { %v251_v55 = vpop.permute.xlu0 %250 }
 0x2bb   :  { %v2194_v56 = vmul.f32 %v1917_v39, %v251_v55 }
 0x2bd   :  { %265 = vrot.lane.b32.xlu0 %v2194_v56, %s2047_s14 }
 0x2be   :  { %v222_v57 = vpop.permute.xlu1 %221 }
 0x2bf   :  { %v224_v58 = vmul.f32 %v1919_v42, %v222_v57 }
 0x2c1   :  { %255 = vrot.lane.b32.xlu1 %v224_v58, %s2047_s14 }
 0x32f   :  { %v266_v59 = vpop.permute.xlu0 %265 }
 0x330   :  { %268 = vst.msk [vmem:[#allocation4] sm:$0xff] %vm24_vm0, %v266_v59 }
 0x333   :  { %v256_v60 = vpop.permute.xlu1 %255 }
 0x334   :  { %258 = vst.msk [vmem:[#allocation2] sm:$0xff] %vm24_vm0, %v256_v60  ;;  %274 = vst.msk [vmem:[%s2677_s5] sm:$0xff] %vm24_vm0, %v256_v60 }
 0x337   :  { %v292_v61 = vld [vmem:[#allocation4] sm:$0xff] }
 0x338   :  { %294 = vrot.lane.b32.xlu0 %v292_v61, %s2046_s13 }
 0x33b   :  { %v285_v62 = vld [vmem:[#allocation2] sm:$0xff] }
 0x33c   :  { %270 = vrot.lane.b32.xlu0 %v247_v49, %s2049_s26  ;;  %287 = vrot.lane.b32.xlu1 %v285_v62, %s2046_s13 }
 0x340   :  { %260 = vrot.lane.b32.xlu1 %v218_v52, %s2049_s26 }
 0x3aa   :  { %v295_v6 = vpop.permute.xlu0 %294 }
 0x3ab   :  { %v297_v8 = vsel %vm51_vm2, %v2212_v63, %v295_v6  ;;  %v2271_v6 = vld [vmem:[%s2674_s0 + $0x28] sm:$0xff] }
 0x3ac   :  { %v298_v9 = vpack.c.bf16 %v297_v8, %v297_v8 }
 0x3ae   :  { %1773 = vmatmul.mubr.msk.bf16.vlgmr.msra.gmra.mxu1 %vm85_vm3, %v298_v9  ;;  %v271_v11 = vpop.permute.xlu0 %270  ;;  %v288_v12 = vpop.permute.xlu1 %287 }
 0x3af   :  { %273 = vst.msk [vmem:[#allocation5] sm:$0xff] %vm24_vm0, %v271_v11  ;;  %v290_v13 = vsel %vm51_vm2, %v2219_v10, %v288_v12  ;;  %1787 = vmatpush3.bf16.msra.mxu1 %v2102_v1  ;;  %1792 = vmatprep.mubr.msk.bf16.mxu1 %vm2045_vm1, %v2044_v0  ;;  %v2278_v12 = vld [vmem:[%s2674_s0 + $0x10] sm:$0xff] }
 0x3b0   :  { %v291_v14 = vpack.c.bf16 %v290_v13, %v290_v13  ;;  %1788 = vmatprep.subr.bf16.mxu1 %v2044_v0 }
 0x3b2   :  { %1763 = vmatmul.mubr.msk.bf16.vlgmr.msra.gmra.mxu0 %vm85_vm3, %v291_v14  ;;  %v261_v15 = vpop.permute.xlu1 %260 }
 0x3b3   :  { %263 = vst.msk [vmem:[#allocation3] sm:$0xff] %vm24_vm0, %v261_v15  ;;  %1777 = vmatpush3.bf16.msra.mxu0 %v2108_v2  ;;  %1789 = vmatpush3.bf16.msra.mxu1 %v2118_v3 }
 0x3b4   :  { %1778 = vmatprep.subr.bf16.mxu0 %v2044_v0  ;;  %1790 = vmatprep.subr.bf16.mxu1 %v2044_v0 }
 0x3b5   :  { %1782 = vmatprep.mubr.msk.bf16.mxu0 %vm2045_vm1, %v2044_v0 }
 0x3b6   :  { %v414_v30 = vld [vmem:[#allocation5] sm:$0xff] }
 0x3b7   :  { %1779 = vmatpush3.bf16.msra.mxu0 %v2126_v4  ;;  %1791 = vmatpush3.bf16.msra.mxu1 %v2132_v5 }
 0x3b8   :  { %1780 = vmatprep.subr.bf16.mxu0 %v2044_v0  ;;  %1806 = vmatprep.subr.bf16.mxu1 %v2044_v0 }
 0x3ba   :  { %v385_v31 = vld [vmem:[#allocation3] sm:$0xff] }
 0x3bb   :  { %1781 = vmatpush3.bf16.msra.mxu0 %v2139_v7 }
 0x3bc   :  { %1796 = vmatprep.subr.bf16.mxu0 %v2044_v0 }
 0x46e   :  { %v379_v16 = vpop.f32.mrf.mxu1 }
 0x46f   :  { %v380_v17 = vadd.f32 %v2179_v19, %v379_v16 }
 0x470   :  { %v1774_v18 = vpop.f32.mrf.mxu1 }
 0x471   :  { %1924 = vtanh.f32 %v380_v17  ;;  %v1623_v32 = vmul.f32 -1.442695, %v380_v17 }
 0x472   :  { %v336_v20 = vpop.f32.mrf.mxu0  ;;  %v382_v21 = vpop.f32.mrf.mxu1 }
 0x473   :  { %v337_v22 = vadd.f32 %v2185_v23, %v336_v20 }
 0x474   :  { %v1764_v24 = vpop.f32.mrf.mxu0  ;;  %v1775_v25 = vpop.f32.mrf.mxu1 }
 0x475   :  { %1926 = vtanh.f32 %v337_v22  ;;  %v1622_v33 = vmul.f32 -1.442695, %v337_v22 }
 0x476   :  { %v339_v26 = vpop.f32.mrf.mxu0  ;;  %1928 = vpow2.f32 %v1623_v32 }
 0x477   :  { %1930 = vpow2.f32 %v1622_v33 }
 0x478   :  { %v1765_v27 = vpop.f32.mrf.mxu0 }
 0x47e   :  { %v1925_v28 = vpop.eup %1924 }
 0x47f   :  { %428 = vrot.lane.b32.xlu0 %v1925_v28, %s2048_s23 }
 0x482   :  { %v1927_v29 = vpop.eup %1926 }
 0x483   :  { %423 = vrot.lane.b32.xlu0 %v414_v30, %s2047_s14  ;;  %399 = vrot.lane.b32.xlu1 %v1927_v29, %s2048_s23  ;;  %v1929_v34 = vpop.eup %1928 }
 0x484   :  { %v418_v35 = vadd.f32 1.0, %v1929_v34  ;;  %v1931_v36 = vpop.eup %1930 }
 0x485   :  { %v389_v37 = vadd.f32 1.0, %v1931_v36 }
 0x486   :  { %1932 = vrcp.f32 %v418_v35 }
 0x487   :  { %394 = vrot.lane.b32.xlu0 %v385_v31, %s2047_s14  ;;  %1934 = vrcp.f32 %v389_v37 }
 0x493   :  { %v1933_v38 = vpop.eup %1932 }
 0x494   :  { %v1935_v41 = vpop.eup %1934 }
 0x4f1   :  { %v429_v39 = vpop.permute.xlu0 %428 }
 0x4f2   :  { %v431_v40 = vmul.f32 %v1933_v38, %v429_v39 }
 0x4f4   :  { %433 = vrot.lane.b32.xlu1 %v431_v40, %s2047_s14 }
 0x4f5   :  { %v400_v42 = vpop.permute.xlu1 %399  ;;  %v424_v44 = vpop.permute.xlu0 %423 }
 0x4f6   :  { %v402_v43 = vmul.f32 %v1935_v41, %v400_v42  ;;  %v426_v45 = vmul.f32 %v1933_v38, %v424_v44 }
 0x4f8   :  { %404 = vrot.lane.b32.xlu1 %v402_v43, %s2047_s14 }
 0x4f9   :  { %v395_v46 = vpop.permute.xlu0 %394 }
 0x4fa   :  { %v397_v49 = vmul.f32 %v1935_v41, %v395_v46 }
 0x566   :  { %v434_v47 = vpop.permute.xlu1 %433 }
 0x567   :  { %v436_v48 = vadd.f32 %v434_v47, %v426_v45 }
 0x569   :  { %1936 = vtanh.f32 %v436_v48 }
 0x56a   :  { %v405_v50 = vpop.permute.xlu1 %404 }
 0x56b   :  { %v407_v51 = vadd.f32 %v405_v50, %v397_v49 }
 0x56d   :  { %1938 = vtanh.f32 %v407_v51 }
 0x576   :  { %v1937_v52 = vpop.eup %1936 }
 0x577   :  { %439 = vrot.lane.b32.xlu0 %v1937_v52, %s2048_s23 }
 0x57a   :  { %v1939_v53 = vpop.eup %1938 }
 0x57b   :  { %410 = vrot.lane.b32.xlu1 %v1939_v53, %s2048_s23 }
 0x5e9   :  { %v440_v54 = vpop.permute.xlu0 %439 }
 0x5ea   :  { %v2253_v55 = vmul.f32 %v1933_v38, %v440_v54 }
 0x5ec   :  { %454 = vrot.lane.b32.xlu0 %v2253_v55, %s2047_s14 }
 0x5ed   :  { %v411_v57 = vpop.permute.xlu1 %410 }
 0x5ee   :  { %v413_v58 = vmul.f32 %v1935_v41, %v411_v57 }
 0x5f0   :  { %444 = vrot.lane.b32.xlu1 %v413_v58, %s2047_s14 }
 0x65e   :  { %v455_v59 = vpop.permute.xlu0 %454 }
 0x65f   :  { %457 = vst.msk [vmem:[#allocation4] sm:$0xff] %vm24_vm0, %v455_v59 }
 0x662   :  { %v445_v60 = vpop.permute.xlu1 %444 }
 0x663   :  { %447 = vst.msk [vmem:[#allocation2] sm:$0xff] %vm24_vm0, %v445_v60  ;;  %1624 = vst.msk [vmem:[%s2677_s5 + $0x8] sm:$0xff] %vm24_vm0, %v445_v60 }
 0x666   :  { %v481_v61 = vld [vmem:[#allocation4] sm:$0xff] }
 0x667   :  { %483 = vrot.lane.b32.xlu0 %v481_v61, %s2046_s13 }
 0x66a   :  { %v474_v62 = vld [vmem:[#allocation2] sm:$0xff] }
 0x66b   :  { %459 = vrot.lane.b32.xlu0 %v436_v48, %s2049_s26  ;;  %476 = vrot.lane.b32.xlu1 %v474_v62, %s2046_s13 }
 0x66f   :  { %449 = vrot.lane.b32.xlu1 %v407_v51, %s2049_s26 }
 0x6d9   :  { %v484_v8 = vpop.permute.xlu0 %483 }
 0x6da   :  { %v486_v9 = vsel %vm51_vm2, %v2271_v6, %v484_v8 }
 0x6db   :  { %v487_v11 = vpack.c.bf16 %v486_v9, %v486_v9 }
 0x6dd   :  { %1793 = vmatmul.mubr.msk.bf16.vlgmr.msra.gmra.mxu1 %vm85_vm3, %v487_v11  ;;  %v460_v13 = vpop.permute.xlu0 %459  ;;  %v477_v14 = vpop.permute.xlu1 %476 }
 0x6de   :  { %462 = vst.msk [vmem:[#allocation5] sm:$0xff] %vm24_vm0, %v460_v13  ;;  %v479_v15 = vsel %vm51_vm2, %v2278_v12, %v477_v14  ;;  %1807 = vmatpush3.bf16.msra.mxu1 %v2102_v1  ;;  %1812 = vmatprep.mubr.msk.bf16.mxu1 %vm2045_vm1, %v2044_v0  ;;  %v2330_v13 = vld [vmem:[%s2674_s0 + $0x20] sm:$0xff] }
 0x6df   :  { %v480_v16 = vpack.c.bf16 %v479_v15, %v479_v15  ;;  %1808 = vmatprep.subr.bf16.mxu1 %v2044_v0 }
 0x6e1   :  { %1783 = vmatmul.mubr.msk.bf16.vlgmr.msra.gmra.mxu0 %vm85_vm3, %v480_v16  ;;  %v450_v17 = vpop.permute.xlu1 %449 }
 0x6e2   :  { %452 = vst.msk [vmem:[#allocation3] sm:$0xff] %vm24_vm0, %v450_v17  ;;  %1797 = vmatpush3.bf16.msra.mxu0 %v2108_v2  ;;  %1809 = vmatpush3.bf16.msra.mxu1 %v2118_v3  ;;  %v2337_v17 = vld [vmem:[%s2674_s0 + $0x18] sm:$0xff] }
 0x6e3   :  { %1798 = vmatprep.subr.bf16.mxu0 %v2044_v0  ;;  %1810 = vmatprep.subr.bf16.mxu1 %v2044_v0 }
 0x6e4   :  { %1802 = vmatprep.mubr.msk.bf16.mxu0 %vm2045_vm1, %v2044_v0 }
 0x6e5   :  { %v603_v32 = vld [vmem:[#allocation5] sm:$0xff] }
 0x6e6   :  { %1799 = vmatpush3.bf16.msra.mxu0 %v2126_v4  ;;  %1811 = vmatpush3.bf16.msra.mxu1 %v2132_v5 }
 0x6e7   :  { %1800 = vmatprep.subr.bf16.mxu0 %v2044_v0  ;;  %1826 = vmatprep.subr.bf16.mxu1 %v2044_v0 }
 0x6e9   :  { %v574_v33 = vld [vmem:[#allocation3] sm:$0xff] }
 0x6ea   :  { %1801 = vmatpush3.bf16.msra.mxu0 %v2139_v7 }
 0x6eb   :  { %1816 = vmatprep.subr.bf16.mxu0 %v2044_v0 }
 0x79d   :  { %v568_v18 = vpop.f32.mrf.mxu1 }
 0x79e   :  { %v569_v20 = vadd.f32 %v2179_v19, %v568_v18 }
 0x79f   :  { %v1794_v21 = vpop.f32.mrf.mxu1 }
 0x7a0   :  { %1940 = vtanh.f32 %v569_v20  ;;  %v1631_v34 = vmul.f32 -1.442695, %v569_v20 }
 0x7a1   :  { %v525_v22 = vpop.f32.mrf.mxu0  ;;  %v571_v24 = vpop.f32.mrf.mxu1 }
 0x7a2   :  { %v526_v25 = vadd.f32 %v2185_v23, %v525_v22 }
 0x7a3   :  { %v1784_v26 = vpop.f32.mrf.mxu0  ;;  %v1795_v27 = vpop.f32.mrf.mxu1 }
 0x7a4   :  { %1942 = vtanh.f32 %v526_v25  ;;  %v1630_v35 = vmul.f32 -1.442695, %v526_v25 }
 0x7a5   :  { %v528_v28 = vpop.f32.mrf.mxu0  ;;  %1944 = vpow2.f32 %v1631_v34 }
 0x7a6   :  { %1946 = vpow2.f32 %v1630_v35 }
 0x7a7   :  { %v1785_v29 = vpop.f32.mrf.mxu0 }
 0x7ad   :  { %v1941_v30 = vpop.eup %1940 }
 0x7ae   :  { %617 = vrot.lane.b32.xlu0 %v1941_v30, %s2048_s23 }
 0x7b1   :  { %v1943_v31 = vpop.eup %1942 }
 0x7b2   :  { %612 = vrot.lane.b32.xlu0 %v603_v32, %s2047_s14  ;;  %588 = vrot.lane.b32.xlu1 %v1943_v31, %s2048_s23  ;;  %v1945_v36 = vpop.eup %1944 }
 0x7b3   :  { %v607_v37 = vadd.f32 1.0, %v1945_v36  ;;  %v1947_v38 = vpop.eup %1946 }
 0x7b4   :  { %v578_v39 = vadd.f32 1.0, %v1947_v38 }
 0x7b5   :  { %1948 = vrcp.f32 %v607_v37 }
 0x7b6   :  { %583 = vrot.lane.b32.xlu0 %v574_v33, %s2047_s14  ;;  %1950 = vrcp.f32 %v578_v39 }
 0x7c2   :  { %v1949_v40 = vpop.eup %1948 }
 0x7c3   :  { %v1951_v43 = vpop.eup %1950 }
 0x820   :  { %v618_v41 = vpop.permute.xlu0 %617 }
 0x821   :  { %v620_v42 = vmul.f32 %v1949_v40, %v618_v41 }
 0x823   :  { %622 = vrot.lane.b32.xlu1 %v620_v42, %s2047_s14 }
 0x824   :  { %v589_v44 = vpop.permute.xlu1 %588  ;;  %v613_v46 = vpop.permute.xlu0 %612 }
 0x825   :  { %v591_v45 = vmul.f32 %v1951_v43, %v589_v44  ;;  %v615_v47 = vmul.f32 %v1949_v40, %v613_v46 }
 0x827   :  { %593 = vrot.lane.b32.xlu1 %v591_v45, %s2047_s14 }
 0x828   :  { %v584_v48 = vpop.permute.xlu0 %583 }
 0x829   :  { %v586_v51 = vmul.f32 %v1951_v43, %v584_v48 }
 0x895   :  { %v623_v49 = vpop.permute.xlu1 %622 }
 0x896   :  { %v625_v50 = vadd.f32 %v623_v49, %v615_v47 }
 0x898   :  { %1952 = vtanh.f32 %v625_v50 }
 0x899   :  { %v594_v52 = vpop.permute.xlu1 %593 }
 0x89a   :  { %v596_v53 = vadd.f32 %v594_v52, %v586_v51 }
 0x89c   :  { %1954 = vtanh.f32 %v596_v53 }
 0x8a5   :  { %v1953_v54 = vpop.eup %1952 }
 0x8a6   :  { %628 = vrot.lane.b32.xlu0 %v1953_v54, %s2048_s23 }
 0x8a9   :  { %v1955_v57 = vpop.eup %1954 }
 0x8aa   :  { %599 = vrot.lane.b32.xlu1 %v1955_v57, %s2048_s23 }
 0x918   :  { %v629_v58 = vpop.permute.xlu0 %628 }
 0x919   :  { %v2312_v59 = vmul.f32 %v1949_v40, %v629_v58 }
 0x91b   :  { %643 = vrot.lane.b32.xlu0 %v2312_v59, %s2047_s14 }
 0x91c   :  { %v600_v60 = vpop.permute.xlu1 %599 }
 0x91d   :  { %v602_v61 = vmul.f32 %v1951_v43, %v600_v60 }
 0x91f   :  { %633 = vrot.lane.b32.xlu1 %v602_v61, %s2047_s14 }
 0x98d   :  { %v644_v62 = vpop.permute.xlu0 %643 }
 0x98e   :  { %646 = vst.msk [vmem:[#allocation4] sm:$0xff] %vm24_vm0, %v644_v62 }
 0x991   :  { %v634_v8 = vpop.permute.xlu1 %633 }
 0x992   :  { %636 = vst.msk [vmem:[#allocation2] sm:$0xff] %vm24_vm0, %v634_v8  ;;  %1632 = vst.msk [vmem:[%s2677_s5 + $0x10] sm:$0xff] %vm24_vm0, %v634_v8 }
 0x995   :  { %v670_v9 = vld [vmem:[#allocation4] sm:$0xff] }
 0x996   :  { %672 = vrot.lane.b32.xlu0 %v670_v9, %s2046_s13 }
 0x999   :  { %v663_v11 = vld [vmem:[#allocation2] sm:$0xff] }
 0x99a   :  { %648 = vrot.lane.b32.xlu0 %v625_v50, %s2049_s26  ;;  %665 = vrot.lane.b32.xlu1 %v663_v11, %s2046_s13 }
 0x99e   :  { %638 = vrot.lane.b32.xlu1 %v596_v53, %s2049_s26 }
 0xa08   :  { %v673_v14 = vpop.permute.xlu0 %672 }
 0xa09   :  { %v675_v15 = vsel %vm51_vm2, %v2330_v13, %v673_v14 }
 0xa0a   :  { %v676_v16 = vpack.c.bf16 %v675_v15, %v675_v15 }
 0xa0c   :  { %1813 = vmatmul.mubr.msk.bf16.vlgmr.msra.gmra.mxu1 %vm85_vm3, %v676_v16  ;;  %v649_v18 = vpop.permute.xlu0 %648  ;;  %v666_v20 = vpop.permute.xlu1 %665 }
 0xa0d   :  { %651 = vst.msk [vmem:[#allocation5] sm:$0xff] %vm24_vm0, %v649_v18  ;;  %v668_v21 = vsel %vm51_vm2, %v2337_v17, %v666_v20  ;;  %1827 = vmatpush3.bf16.msra.mxu1 %v2102_v1  ;;  %1832 = vmatprep.mubr.msk.bf16.mxu1 %vm2045_vm1, %v2044_v0 }
 0xa0e   :  { %v669_v22 = vpack.c.bf16 %v668_v21, %v668_v21  ;;  %1828 = vmatprep.subr.bf16.mxu1 %v2044_v0 }
 0xa10   :  { %1803 = vmatmul.mubr.msk.bf16.vlgmr.msra.gmra.mxu0 %vm85_vm3, %v669_v22  ;;  %v639_v24 = vpop.permute.xlu1 %638 }
 0xa11   :  { %641 = vst.msk [vmem:[#allocation3] sm:$0xff] %vm24_vm0, %v639_v24  ;;  %1817 = vmatpush3.bf16.msra.mxu0 %v2108_v2  ;;  %1829 = vmatpush3.bf16.msra.mxu1 %v2118_v3 }
 0xa12   :  { %1818 = vmatprep.subr.bf16.mxu0 %v2044_v0  ;;  %1830 = vmatprep.subr.bf16.mxu1 %v2044_v0 }
 0xa13   :  { %1822 = vmatprep.mubr.msk.bf16.mxu0 %vm2045_vm1, %v2044_v0 }
 0xa14   :  { %v792_v37 = vld [vmem:[#allocation5] sm:$0xff] }
 0xa15   :  { %1819 = vmatpush3.bf16.msra.mxu0 %v2126_v4  ;;  %1831 = vmatpush3.bf16.msra.mxu1 %v2132_v5 }
 0xa16   :  { %1820 = vmatprep.subr.bf16.mxu0 %v2044_v0  ;;  %1846 = vmatprep.subr.bf16.mxu1 %v2044_v0 }
 0xa18   :  { %v763_v38 = vld [vmem:[#allocation3] sm:$0xff] }
 0xa19   :  { %1821 = vmatpush3.bf16.msra.mxu0 %v2139_v7 }
 0xa1a   :  { %1836 = vmatprep.subr.bf16.mxu0 %v2044_v0 }
 0xacc   :  { %v757_v25 = vpop.f32.mrf.mxu1 }
 0xacd   :  { %v758_v26 = vadd.f32 %v2179_v19, %v757_v25 }
 0xace   :  { %v1814_v27 = vpop.f32.mrf.mxu1 }
 0xacf   :  { %1956 = vtanh.f32 %v758_v26  ;;  %v1639_v39 = vmul.f32 -1.442695, %v758_v26 }
 0xad0   :  { %v714_v28 = vpop.f32.mrf.mxu0  ;;  %v760_v29 = vpop.f32.mrf.mxu1 }
 0xad1   :  { %v715_v30 = vadd.f32 %v2185_v23, %v714_v28 }
 0xad2   :  { %v1804_v31 = vpop.f32.mrf.mxu0  ;;  %v1815_v32 = vpop.f32.mrf.mxu1 }
 0xad3   :  { %1958 = vtanh.f32 %v715_v30  ;;  %v1638_v40 = vmul.f32 -1.442695, %v715_v30 }
 0xad4   :  { %v717_v33 = vpop.f32.mrf.mxu0  ;;  %1960 = vpow2.f32 %v1639_v39 }
 0xad5   :  { %1962 = vpow2.f32 %v1638_v40 }
 0xad6   :  { %v1805_v34 = vpop.f32.mrf.mxu0 }
 0xadc   :  { %v1957_v35 = vpop.eup %1956 }
 0xadd   :  { %806 = vrot.lane.b32.xlu0 %v1957_v35, %s2048_s23 }
 0xae0   :  { %v1959_v36 = vpop.eup %1958 }
 0xae1   :  { %801 = vrot.lane.b32.xlu0 %v792_v37, %s2047_s14  ;;  %777 = vrot.lane.b32.xlu1 %v1959_v36, %s2048_s23  ;;  %v1961_v41 = vpop.eup %1960 }
 0xae2   :  { %v796_v42 = vadd.f32 1.0, %v1961_v41  ;;  %v1963_v43 = vpop.eup %1962 }
 0xae3   :  { %v767_v44 = vadd.f32 1.0, %v1963_v43 }
 0xae4   :  { %1964 = vrcp.f32 %v796_v42 }
 0xae5   :  { %772 = vrot.lane.b32.xlu0 %v763_v38, %s2047_s14  ;;  %1966 = vrcp.f32 %v767_v44 }
 0xaf1   :  { %v1965_v45 = vpop.eup %1964 }
 0xaf2   :  { %v1967_v48 = vpop.eup %1966 }
 0xb4f   :  { %v807_v46 = vpop.permute.xlu0 %806 }
 0xb50   :  { %v809_v47 = vmul.f32 %v1965_v45, %v807_v46 }
 0xb52   :  { %811 = vrot.lane.b32.xlu1 %v809_v47, %s2047_s14 }
 0xb53   :  { %v778_v49 = vpop.permute.xlu1 %777  ;;  %v802_v51 = vpop.permute.xlu0 %801 }
 0xb54   :  { %v780_v50 = vmul.f32 %v1967_v48, %v778_v49  ;;  %v804_v52 = vmul.f32 %v1965_v45, %v802_v51 }
 0xb56   :  { %782 = vrot.lane.b32.xlu1 %v780_v50, %s2047_s14 }
 0xb57   :  { %v773_v53 = vpop.permute.xlu0 %772 }
 0xb58   :  { %v775_v58 = vmul.f32 %v1967_v48, %v773_v53 }
 0xbc4   :  { %v812_v54 = vpop.permute.xlu1 %811 }
 0xbc5   :  { %v814_v57 = vadd.f32 %v812_v54, %v804_v52 }
 0xbc7   :  { %1968 = vtanh.f32 %v814_v57 }
 0xbc8   :  { %v783_v60 = vpop.permute.xlu1 %782 }
 0xbc9   :  { %v785_v61 = vadd.f32 %v783_v60, %v775_v58 }
 0xbcb   :  { %1970 = vtanh.f32 %v785_v61 }
 0xbd4   :  { %v1969_v62 = vpop.eup %1968 }
 0xbd5   :  { %817 = vrot.lane.b32.xlu0 %v1969_v62, %s2048_s23 }
 0xbd8   :  { %v1971_v8 = vpop.eup %1970 }
 0xbd9   :  { %788 = vrot.lane.b32.xlu1 %v1971_v8, %s2048_s23 }
 0xc47   :  { %v818_v9 = vpop.permute.xlu0 %817 }
 0xc48   :  { %v2371_v11 = vmul.f32 %v1965_v45, %v818_v9 }
 0xc4a   :  { %832 = vrot.lane.b32.xlu0 %v2371_v11, %s2047_s14 }
 0xc4b   :  { %v789_v14 = vpop.permute.xlu1 %788 }
 0xc4c   :  { %v791_v15 = vmul.f32 %v1967_v48, %v789_v14 }
 0xc4e   :  { %822 = vrot.lane.b32.xlu1 %v791_v15, %s2047_s14 }
 0xcbc   :  { %v833_v16 = vpop.permute.xlu0 %832 }
 0xcbd   :  { %835 = vst.msk [vmem:[#allocation4] sm:$0xff] %vm24_vm0, %v833_v16 }
 0xcc0   :  { %v823_v18 = vpop.permute.xlu1 %822 }
 0xcc1   :  { %825 = vst.msk [vmem:[#allocation2] sm:$0xff] %vm24_vm0, %v823_v18  ;;  %1640 = vst.msk [vmem:[%s2677_s5 + $0x18] sm:$0xff] %vm24_vm0, %v823_v18 }
 0xcc4   :  { %v857_v20 = vld [vmem:[#allocation4] sm:$0xff] }
 0xcc5   :  { %859 = vrot.lane.b32.xlu0 %v857_v20, %s2046_s13 }
 0xcc8   :  { %v850_v21 = vld [vmem:[#allocation2] sm:$0xff] }
 0xcc9   :  { %837 = vrot.lane.b32.xlu0 %v814_v57, %s2049_s26  ;;  %852 = vrot.lane.b32.xlu1 %v850_v21, %s2046_s13 }
 0xccd   :  { %827 = vrot.lane.b32.xlu1 %v785_v61, %s2049_s26 }
 0xd37   :  { %v860_v22 = vpop.permute.xlu0 %859 }
 0xd38   :  { %v862_v24 = vsel %vm51_vm2, %v2337_v17, %v860_v22 }
 0xd39   :  { %v863_v25 = vpack.c.bf16 %v862_v24, %v862_v24 }
 0xd3b   :  { %1833 = vmatmul.mubr.msk.bf16.vlgmr.msra.gmra.mxu1 %vm85_vm3, %v863_v25  ;;  %v838_v26 = vpop.permute.xlu0 %837  ;;  %v853_v27 = vpop.permute.xlu1 %852 }
 0xd3c   :  { %840 = vst.msk [vmem:[#allocation5] sm:$0xff] %vm24_vm0, %v838_v26  ;;  %v855_v28 = vsel %vm51_vm2, %v2330_v13, %v853_v27  ;;  %1847 = vmatpush3.bf16.msra.mxu1 %v2102_v1  ;;  %1852 = vmatprep.mubr.msk.bf16.mxu1 %vm2045_vm1, %v2044_v0 }
 0xd3d   :  { %v856_v29 = vpack.c.bf16 %v855_v28, %v855_v28  ;;  %1848 = vmatprep.subr.bf16.mxu1 %v2044_v0  ;;  %v2443_v28 = vld [vmem:[%s2672_s2 + $0x10] sm:$0xff]  }
 0xd3f   :  { %1823 = vmatmul.mubr.msk.bf16.vlgmr.msra.gmra.mxu0 %vm85_vm3, %v856_v29  ;;  %v828_v17 = vpop.permute.xlu1 %827 }
 0xd40   :  { %830 = vst.msk [vmem:[#allocation3] sm:$0xff] %vm24_vm0, %v828_v17  ;;  %1837 = vmatpush3.bf16.msra.mxu0 %v2108_v2  ;;  %1849 = vmatpush3.bf16.msra.mxu1 %v2118_v3  ;;  %v2460_v17 = vld [vmem:[%s2672_s2 + $0x8] sm:$0xff]  }
 0xd41   :  { %1838 = vmatprep.subr.bf16.mxu0 %v2044_v0  ;;  %1850 = vmatprep.subr.bf16.mxu1 %v2044_v0 }
 0xd42   :  { %1842 = vmatprep.mubr.msk.bf16.mxu0 %vm2045_vm1, %v2044_v0 }
 0xd43   :  { %v979_v35 = vld [vmem:[#allocation5] sm:$0xff] }
 0xd44   :  { %1839 = vmatpush3.bf16.msra.mxu0 %v2126_v4  ;;  %1851 = vmatpush3.bf16.msra.mxu1 %v2132_v5 }
 0xd45   :  { %1840 = vmatprep.subr.bf16.mxu0 %v2044_v0  ;;  %1866 = vmatprep.subr.bf16.mxu1 %v2044_v0 }
 0xd47   :  { %v950_v36 = vld [vmem:[#allocation3] sm:$0xff] }
 0xd48   :  { %1841 = vmatpush3.bf16.msra.mxu0 %v2139_v7 }
 0xd49   :  { %1856 = vmatprep.subr.bf16.mxu0 %v2044_v0 }
 0xdfb   :  { %v944_v1 = vpop.f32.mrf.mxu1 }
 0xdfc   :  { %v945_v2 = vadd.f32 %v2179_v19, %v944_v1  ;;  %v2470_v1 = vld [vmem:[%s2673_s1 + $0x8] sm:$0xff]  }
 0xdfd   :  { %v1834_v3 = vpop.f32.mrf.mxu1 }
 0xdfe   :  { %1972 = vtanh.f32 %v945_v2  ;;  %v1647_v37 = vmul.f32 -1.442695, %v945_v2  ;;  %v2476_v2 = vld [vmem:[%s2672_s2] sm:$0xff]  }
 0xdff   :  { %v901_v13 = vpop.f32.mrf.mxu0  ;;  %v947_v30 = vpop.f32.mrf.mxu1  ;;  %v2484_v3 = vld [vmem:[%s2673_s1] sm:$0xff]  }
 0xe00   :  { %v902_v31 = vadd.f32 %v2185_v23, %v901_v13 }
 0xe01   :  { %v1824_v4 = vpop.f32.mrf.mxu0  ;;  %v1835_v32 = vpop.f32.mrf.mxu1 }
 0xe02   :  { %1974 = vtanh.f32 %v902_v31  ;;  %v1646_v38 = vmul.f32 -1.442695, %v902_v31 }
 0xe03   :  { %v904_v5 = vpop.f32.mrf.mxu0  ;;  %1976 = vpow2.f32 %v1647_v37 }
 0xe04   :  { %1978 = vpow2.f32 %v1646_v38 }
 0xe05   :  { %v1825_v33 = vpop.f32.mrf.mxu0 }
 0xe0b   :  { %v1973_v34 = vpop.eup %1972 }
 0xe0c   :  { %993 = vrot.lane.b32.xlu0 %v1973_v34, %s2048_s23 }
 0xe0f   :  { %v1975_v7 = vpop.eup %1974 }
 0xe10   :  { %988 = vrot.lane.b32.xlu0 %v979_v35, %s2047_s14  ;;  %964 = vrot.lane.b32.xlu1 %v1975_v7, %s2048_s23  ;;  %v1977_v39 = vpop.eup %1976 }
 0xe11   :  { %v983_v40 = vadd.f32 1.0, %v1977_v39  ;;  %v1979_v41 = vpop.eup %1978 }
 0xe12   :  { %v954_v42 = vadd.f32 1.0, %v1979_v41 }
 0xe13   :  { %1980 = vrcp.f32 %v983_v40 }
 0xe14   :  { %959 = vrot.lane.b32.xlu0 %v950_v36, %s2047_s14  ;;  %1982 = vrcp.f32 %v954_v42 }
 0xe20   :  { %v1981_v43 = vpop.eup %1980 }
 0xe21   :  { %v1983_v46 = vpop.eup %1982 }
 0xe7e   :  { %v994_v44 = vpop.permute.xlu0 %993 }
 0xe7f   :  { %v996_v45 = vmul.f32 %v1981_v43, %v994_v44 }
 0xe81   :  { %998 = vrot.lane.b32.xlu1 %v996_v45, %s2047_s14 }
 0xe82   :  { %v965_v47 = vpop.permute.xlu1 %964  ;;  %v989_v49 = vpop.permute.xlu0 %988 }
 0xe83   :  { %v967_v48 = vmul.f32 %v1983_v46, %v965_v47  ;;  %v991_v50 = vmul.f32 %v1981_v43, %v989_v49 }
 0xe85   :  { %969 = vrot.lane.b32.xlu1 %v967_v48, %s2047_s14 }
 0xe86   :  { %v960_v51 = vpop.permute.xlu0 %959 }
 0xe87   :  { %v962_v54 = vmul.f32 %v1983_v46, %v960_v51 }
 0xef3   :  { %v999_v52 = vpop.permute.xlu1 %998 }
 0xef4   :  { %v1001_v53 = vadd.f32 %v999_v52, %v991_v50 }
 0xef6   :  { %1984 = vtanh.f32 %v1001_v53 }
 0xef7   :  { %v970_v57 = vpop.permute.xlu1 %969 }
 0xef8   :  { %v972_v58 = vadd.f32 %v970_v57, %v962_v54 }
 0xefa   :  { %1986 = vtanh.f32 %v972_v58 }
 0xf03   :  { %v1985_v60 = vpop.eup %1984 }
 0xf04   :  { %1004 = vrot.lane.b32.xlu0 %v1985_v60, %s2048_s23 }
 0xf07   :  { %v1987_v61 = vpop.eup %1986 }
 0xf08   :  { %975 = vrot.lane.b32.xlu1 %v1987_v61, %s2048_s23 }
 0xf76   :  { %v1005_v62 = vpop.permute.xlu0 %1004 }
 0xf77   :  { %v2420_v8 = vmul.f32 %v1981_v43, %v1005_v62 }
 0xf79   :  { %1019 = vrot.lane.b32.xlu0 %v2420_v8, %s2047_s14 }
 0xf7a   :  { %v976_v9 = vpop.permute.xlu1 %975 }
 0xf7b   :  { %v978_v14 = vmul.f32 %v1983_v46, %v976_v9 }
 0xf7d   :  { %1009 = vrot.lane.b32.xlu1 %v978_v14, %s2047_s14 }
 0xfeb   :  { %v1020_v15 = vpop.permute.xlu0 %1019 }
 0xfec   :  { %1022 = vst.msk [vmem:[#allocation4] sm:$0xff] %vm24_vm0, %v1020_v15 }
 0xfef   :  { %v2426_v16 = vpop.permute.xlu1 %1009 }
 0xff0   :  { %1012 = vst.msk [vmem:[#allocation2] sm:$0xff] %vm24_vm0, %v2426_v16 }
 0xff3   :  { %v1042_v18 = vld [vmem:[#allocation4] sm:$0xff] }
 0xff4   :  { %1044 = vrot.lane.b32.xlu0 %v1042_v18, %s2046_s13 }
 0xff7   :  { %v1035_v20 = vld [vmem:[#allocation2] sm:$0xff] }
 0xff8   :  { %1024 = vrot.lane.b32.xlu0 %v1001_v53, %s2049_s26  ;;  %1037 = vrot.lane.b32.xlu1 %v1035_v20, %s2046_s13 }
 0xffc   :  { %1014 = vrot.lane.b32.xlu1 %v972_v58, %s2049_s26 }
0x1066   :  { %v1045_v21 = vpop.permute.xlu0 %1044 }
0x1067   :  { %v1047_v22 = vsel %vm51_vm2, %v2278_v12, %v1045_v21 }
0x1068   :  { %v1048_v24 = vpack.c.bf16 %v1047_v22, %v1047_v22 }
0x106a   :  { %1853 = vmatmul.mubr.msk.bf16.vlgmr.msra.gmra.mxu1 %vm85_vm3, %v1048_v24  ;;  %v1025_v25 = vpop.permute.xlu0 %1024  ;;  %v1038_v26 = vpop.permute.xlu1 %1037 }
0x106b   :  { %1027 = vst.msk [vmem:[#allocation5] sm:$0xff] %vm24_vm0, %v1025_v25  ;;  %v1040_v27 = vsel %vm51_vm2, %v2271_v6, %v1038_v26  ;;  %1867 = vmatpush3.bf16.msra.mxu1 %v2443_v28  ;;  %1872 = vmatprep.mubr.msk.bf16.mxu1 %vm2045_vm1, %v2044_v0  ;;  %v2454_v6 = vld [vmem:[%s2673_s1 + $0x10] sm:$0xff]  }
0x106c   :  { %v1041_v12 = vpack.c.bf16 %v1040_v27, %v1040_v27  ;;  %1868 = vmatprep.subr.bf16.mxu1 %v2044_v0 }
0x106e   :  { %1843 = vmatmul.mubr.msk.bf16.vlgmr.msra.gmra.mxu0 %vm85_vm3, %v1041_v12  ;;  %v1015_v29 = vpop.permute.xlu1 %1014 }
0x106f   :  { %1017 = vst.msk [vmem:[#allocation3] sm:$0xff] %vm24_vm0, %v1015_v29  ;;  %1857 = vmatpush3.bf16.msra.mxu0 %v2454_v6  ;;  %1869 = vmatpush3.bf16.msra.mxu1 %v2460_v17 }
0x1070   :  { %1858 = vmatprep.subr.bf16.mxu0 %v2044_v0  ;;  %1870 = vmatprep.subr.bf16.mxu1 %v2044_v0 }
0x1071   :  { %1862 = vmatprep.mubr.msk.bf16.mxu0 %vm2045_vm1, %v2044_v0 }
0x1072   :  { %v1164_v38 = vld [vmem:[#allocation5] sm:$0xff] }
0x1073   :  { %1859 = vmatpush3.bf16.msra.mxu0 %v2470_v1  ;;  %1871 = vmatpush3.bf16.msra.mxu1 %v2476_v2 }
0x1074   :  { %1860 = vmatprep.subr.bf16.mxu0 %v2044_v0  ;;  %1886 = vmatprep.subr.bf16.mxu1 %v2044_v0 }
0x1077   :  { %1861 = vmatpush3.bf16.msra.mxu0 %v2484_v3 }
0x1078   :  { %1876 = vmatprep.subr.bf16.mxu0 %v2044_v0 }
0x112a   :  { %v1129_v13 = vpop.f32.mrf.mxu1 }
0x112b   :  { %v1130_v30 = vadd.f32 %v2179_v19, %v1129_v13  ;;  %v1135_v19 = vld [vmem:[#allocation3] sm:$0xff] }
0x112c   :  { %v1854_v31 = vpop.f32.mrf.mxu1 }
0x112d   :  { %1988 = vtanh.f32 %v1130_v30  ;;  %v1655_v39 = vmul.f32 -1.442695, %v1130_v30 }
0x112e   :  { %v1086_v4 = vpop.f32.mrf.mxu0  ;;  %v1132_v32 = vpop.f32.mrf.mxu1 }
0x112f   :  { %v1087_v5 = vadd.f32 %v2185_v23, %v1086_v4 }
0x1130   :  { %v1844_v33 = vpop.f32.mrf.mxu0  ;;  %v1855_v34 = vpop.f32.mrf.mxu1 }
0x1131   :  { %1990 = vtanh.f32 %v1087_v5  ;;  %v1654_v23 = vmul.f32 -1.442695, %v1087_v5 }
0x1132   :  { %v1089_v7 = vpop.f32.mrf.mxu0  ;;  %1992 = vpow2.f32 %v1655_v39 }
0x1133   :  { %1994 = vpow2.f32 %v1654_v23 }
0x1134   :  { %v1845_v35 = vpop.f32.mrf.mxu0 }
0x113a   :  { %v1989_v36 = vpop.eup %1988 }
0x113b   :  { %1178 = vrot.lane.b32.xlu0 %v1989_v36, %s2048_s23 }
0x113e   :  { %v1991_v37 = vpop.eup %1990 }
0x113f   :  { %1173 = vrot.lane.b32.xlu0 %v1164_v38, %s2047_s14  ;;  %1149 = vrot.lane.b32.xlu1 %v1991_v37, %s2048_s23  ;;  %v1993_v40 = vpop.eup %1992 }
0x1140   :  { %v1168_v41 = vadd.f32 1.0, %v1993_v40  ;;  %v1995_v42 = vpop.eup %1994 }
0x1141   :  { %v1139_v43 = vadd.f32 1.0, %v1995_v42 }
0x1142   :  { %1996 = vrcp.f32 %v1168_v41 }
0x1143   :  { %1144 = vrot.lane.b32.xlu0 %v1135_v19, %s2047_s14  ;;  %1998 = vrcp.f32 %v1139_v43 }
0x114f   :  { %v1997_v44 = vpop.eup %1996 }
0x1150   :  { %v1999_v47 = vpop.eup %1998 }
0x11ad   :  { %v1179_v45 = vpop.permute.xlu0 %1178 }
0x11ae   :  { %v1181_v46 = vmul.f32 %v1997_v44, %v1179_v45 }
0x11b0   :  { %1183 = vrot.lane.b32.xlu1 %v1181_v46, %s2047_s14 }
0x11b1   :  { %v1150_v48 = vpop.permute.xlu1 %1149  ;;  %v1174_v50 = vpop.permute.xlu0 %1173 }
0x11b2   :  { %v1152_v49 = vmul.f32 %v1999_v47, %v1150_v48  ;;  %v1176_v51 = vmul.f32 %v1997_v44, %v1174_v50 }
0x11b4   :  { %1154 = vrot.lane.b32.xlu1 %v1152_v49, %s2047_s14 }
0x11b5   :  { %v1145_v52 = vpop.permute.xlu0 %1144 }
0x11b6   :  { %v1147_v57 = vmul.f32 %v1999_v47, %v1145_v52 }
0x1222   :  { %v1184_v53 = vpop.permute.xlu1 %1183 }
0x1223   :  { %v1186_v54 = vadd.f32 %v1184_v53, %v1176_v51 }
0x1225   :  { %2000 = vtanh.f32 %v1186_v54 }
0x1226   :  { %v1155_v58 = vpop.permute.xlu1 %1154 }
0x1227   :  { %v1157_v60 = vadd.f32 %v1155_v58, %v1147_v57 }
0x1229   :  { %2002 = vtanh.f32 %v1157_v60 }
0x1232   :  { %v2001_v61 = vpop.eup %2000 }
0x1233   :  { %1189 = vrot.lane.b32.xlu0 %v2001_v61, %s2048_s23 }
0x1236   :  { %v2003_v62 = vpop.eup %2002 }
0x1237   :  { %1160 = vrot.lane.b32.xlu1 %v2003_v62, %s2048_s23 }
0x12a5   :  { %v1190_v9 = vpop.permute.xlu0 %1189 }
0x12a6   :  { %v2498_v14 = vmul.f32 %v1997_v44, %v1190_v9 }
0x12a8   :  { %1204 = vrot.lane.b32.xlu0 %v2498_v14, %s2047_s14 }
0x12a9   :  { %v1161_v15 = vpop.permute.xlu1 %1160 }
0x12aa   :  { %v1163_v18 = vmul.f32 %v1999_v47, %v1161_v15 }
0x12ac   :  { %1194 = vrot.lane.b32.xlu1 %v1163_v18, %s2047_s14 }
0x131a   :  { %v1205_v20 = vpop.permute.xlu0 %1204 }
0x131b   :  { %1207 = vst.msk [vmem:[#allocation4] sm:$0xff] %vm24_vm0, %v1205_v20 }
0x131e   :  { %v2504_v21 = vpop.permute.xlu1 %1194 }
0x131f   :  { %1197 = vst.msk [vmem:[#allocation2] sm:$0xff] %vm24_vm0, %v2504_v21 }
0x1322   :  { %v1227_v22 = vld [vmem:[#allocation4] sm:$0xff] }
0x1323   :  { %1229 = vrot.lane.b32.xlu0 %v1227_v22, %s2046_s13  ;;  %v1404_v22 = vld [vmem:[%s2674_s0] sm:$0xff] }
0x1326   :  { %v1220_v24 = vld [vmem:[#allocation2] sm:$0xff] }
0x1327   :  { %1209 = vrot.lane.b32.xlu0 %v1186_v54, %s2049_s26  ;;  %1222 = vrot.lane.b32.xlu1 %v1220_v24, %s2046_s13 }
0x132b   :  { %1199 = vrot.lane.b32.xlu1 %v1157_v60, %s2049_s26 }
0x1395   :  { %v1230_v25 = vpop.permute.xlu0 %1229 }
0x1396   :  { %v1232_v26 = vsel %vm51_vm2, %v2219_v10, %v1230_v25 }
0x1397   :  { %v1233_v27 = vpack.c.bf16 %v1232_v26, %v1232_v26 }
0x1399   :  { %1873 = vmatmul.mubr.msk.bf16.vlgmr.msra.gmra.mxu1 %vm85_vm3, %v1233_v27  ;;  %v1210_v12 = vpop.permute.xlu0 %1209  ;;  %v1223_v29 = vpop.permute.xlu1 %1222  ;;  %v1666_v27 = vld [vmem:[%s2674_s0 + $0x38] sm:$0xff] }
0x139a   :  { %1212 = vst.msk [vmem:[#allocation5] sm:$0xff] %vm24_vm0, %v1210_v12  ;;  %v1225_v13 = vsel %vm51_vm2, %v2212_v63, %v1223_v29  ;;  %1887 = vmatpush3.bf16.msra.mxu1 %v2443_v28  ;;  %1892 = vmatprep.mubr.msk.bf16.mxu1 %vm2045_vm1, %v2044_v0  ;;  %v2537_v28 = vld [vmem:[%s2675_s4] ss:$0 sm:$0xff] }
0x139b   :  { %v1226_v30 = vpack.c.bf16 %v1225_v13, %v1225_v13  ;;  %1888 = vmatprep.subr.bf16.mxu1 %v2044_v0 }
0x139d   :  { %1863 = vmatmul.mubr.msk.bf16.vlgmr.msra.gmra.mxu0 %vm85_vm3, %v1226_v30  ;;  %v1200_v10 = vpop.permute.xlu1 %1199 }
0x139e   :  { %1202 = vst.msk [vmem:[#allocation3] sm:$0xff] %vm24_vm0, %v1200_v10  ;;  %1877 = vmatpush3.bf16.msra.mxu0 %v2454_v6  ;;  %1889 = vmatpush3.bf16.msra.mxu1 %v2460_v17 }
0x139f   :  { %1878 = vmatprep.subr.bf16.mxu0 %v2044_v0  ;;  %1890 = vmatprep.subr.bf16.mxu1 %v2044_v0 }
0x13a0   :  { %1882 = vmatprep.mubr.msk.bf16.mxu0 %vm2045_vm1, %v2044_v0 }
0x13a1   :  { %v1349_v7 = vld [vmem:[#allocation5] sm:$0xff] }
0x13a2   :  { %1879 = vmatpush3.bf16.msra.mxu0 %v2470_v1  ;;  %1891 = vmatpush3.bf16.msra.mxu1 %v2476_v2  ;;  %v2543_v1 = vld [vmem:[%s2676_s3] ss:$0 sm:$0xff] }
0x13a3   :  { %1880 = vmatprep.subr.bf16.mxu0 %v2044_v0 }
0x13a5   :  { %v1320_v35 = vld [vmem:[#allocation3] sm:$0xff] }
0x13a6   :  { %1881 = vmatpush3.bf16.msra.mxu0 %v2484_v3 }
0x1459   :  { %v1314_v63 = vpop.f32.mrf.mxu1 }
0x145a   :  { %v1315_v6 = vadd.f32 %v2537_v28, %v1314_v63 }
0x145b   :  { %v1874_v17 = vpop.f32.mrf.mxu1 }
0x145c   :  { %2004 = vtanh.f32 %v1315_v6  ;;  %v1663_v36 = vmul.f32 -1.442695, %v1315_v6 }
0x145d   :  { %v1271_v31 = vpop.f32.mrf.mxu0  ;;  %v1317_v4 = vpop.f32.mrf.mxu1 }
0x145e   :  { %v1272_v0 = vadd.f32 %v2543_v1, %v1271_v31 }
0x145f   :  { %v1864_v2 = vpop.f32.mrf.mxu0  ;;  %v1875_v3 = vpop.f32.mrf.mxu1 }
0x1460   :  { %2006 = vtanh.f32 %v1272_v0  ;;  %v1662_v37 = vmul.f32 -1.442695, %v1272_v0 }
0x1461   :  { %v1274_v32 = vpop.f32.mrf.mxu0  ;;  %2008 = vpow2.f32 %v1663_v36 }
0x1462   :  { %2010 = vpow2.f32 %v1662_v37 }
0x1463   :  { %v1865_v5 = vpop.f32.mrf.mxu0 }
0x1469   :  { %v2005_v33 = vpop.eup %2004 }
0x146a   :  { %1363 = vrot.lane.b32.xlu0 %v2005_v33, %s2048_s23 }
0x146d   :  { %v2007_v34 = vpop.eup %2006 }
0x146e   :  { %1358 = vrot.lane.b32.xlu0 %v1349_v7, %s2047_s14  ;;  %1334 = vrot.lane.b32.xlu1 %v2007_v34, %s2048_s23  ;;  %v2009_v38 = vpop.eup %2008 }
0x146f   :  { %v1353_v19 = vadd.f32 1.0, %v2009_v38  ;;  %v2011_v39 = vpop.eup %2010 }
0x1470   :  { %v1324_v23 = vadd.f32 1.0, %v2011_v39 }
0x1471   :  { %2012 = vrcp.f32 %v1353_v19 }
0x1472   :  { %1329 = vrot.lane.b32.xlu0 %v1320_v35, %s2047_s14  ;;  %2014 = vrcp.f32 %v1324_v23 }
0x147e   :  { %v2013_v40 = vpop.eup %2012 }
0x147f   :  { %v2015_v43 = vpop.eup %2014 }
0x14dc   :  { %v1364_v41 = vpop.permute.xlu0 %1363 }
0x14dd   :  { %v1366_v42 = vmul.f32 %v2013_v40, %v1364_v41 }
0x14df   :  { %1368 = vrot.lane.b32.xlu1 %v1366_v42, %s2047_s14 }
0x14e0   :  { %v1335_v44 = vpop.permute.xlu1 %1334  ;;  %v1359_v46 = vpop.permute.xlu0 %1358 }
0x14e1   :  { %v1337_v45 = vmul.f32 %v2015_v43, %v1335_v44  ;;  %v1361_v47 = vmul.f32 %v2013_v40, %v1359_v46 }
0x14e3   :  { %1339 = vrot.lane.b32.xlu1 %v1337_v45, %s2047_s14 }
0x14e4   :  { %v1330_v48 = vpop.permute.xlu0 %1329 }
0x14e5   :  { %v1332_v51 = vmul.f32 %v2015_v43, %v1330_v48 }
0x1551   :  { %v1369_v49 = vpop.permute.xlu1 %1368 }
0x1552   :  { %v1371_v50 = vadd.f32 %v1369_v49, %v1361_v47 }
0x1554   :  { %2016 = vtanh.f32 %v1371_v50 }
0x1555   :  { %v1340_v52 = vpop.permute.xlu1 %1339 }
0x1556   :  { %v1342_v53 = vadd.f32 %v1340_v52, %v1332_v51 }
0x1558   :  { %2018 = vtanh.f32 %v1342_v53 }
0x1561   :  { %v2017_v54 = vpop.eup %2016 }
0x1562   :  { %1374 = vrot.lane.b32.xlu0 %v2017_v54, %s2048_s23 }
0x1565   :  { %v2019_v57 = vpop.eup %2018 }
0x1566   :  { %1345 = vrot.lane.b32.xlu1 %v2019_v57, %s2048_s23 }
0x15d4   :  { %v1375_v58 = vpop.permute.xlu0 %1374 }
0x15d5   :  { %v2554_v60 = vmul.f32 %v2013_v40, %v1375_v58 }
0x15d7   :  { %1389 = vrot.lane.b32.xlu0 %v2554_v60, %s2047_s14 }
0x15d8   :  { %v1346_v61 = vpop.permute.xlu1 %1345 }
0x15d9   :  { %v1348_v62 = vmul.f32 %v2015_v43, %v1346_v61 }
0x15db   :  { %1379 = vrot.lane.b32.xlu1 %v1348_v62, %s2047_s14 }
0x1649   :  { %v1390_v9 = vpop.permute.xlu0 %1389 }
0x164a   :  { %1392 = vst.msk [vmem:[#allocation4] sm:$0xff] %vm24_vm0, %v1390_v9 }
0x164d   :  { %v2560_v15 = vpop.permute.xlu1 %1379 }
0x164e   :  { %1382 = vst.msk [vmem:[#allocation2] sm:$0xff] %vm24_vm0, %v2560_v15 }
0x1651   :  { %v1412_v18 = vld [vmem:[#allocation4] sm:$0xff] }
0x1652   :  { %1414 = vrot.lane.b32.xlu0 %v1412_v18, %s2046_s13 }
0x1655   :  { %v1405_v20 = vld [vmem:[#allocation2] sm:$0xff] }
0x1656   :  { %1394 = vrot.lane.b32.xlu0 %v1371_v50, %s2049_s26  ;;  %1407 = vrot.lane.b32.xlu1 %v1405_v20, %s2046_s13 }
0x165a   :  { %1384 = vrot.lane.b32.xlu1 %v1342_v53, %s2049_s26 }
0x16c4   :  { %v1415_v24 = vpop.permute.xlu0 %1414 }
0x16c5   :  { %v1417_v25 = vsel %vm51_vm2, %v1404_v22, %v1415_v24 }
0x16c6   :  { %v1418_v26 = vpack.c.bf16 %v1417_v25, %v1417_v25 }
0x16c8   :  { %1893 = vmatmul.mubr.msk.bf16.vlgmr.msra.gmra.mxu1 %vm85_vm3, %v1418_v26  ;;  %v1395_v12 = vpop.permute.xlu0 %1394  ;;  %v1408_v29 = vpop.permute.xlu1 %1407 }
0x16c9   :  { %1397 = vst.msk [vmem:[#allocation5] sm:$0xff] %vm24_vm0, %v1395_v12  ;;  %v1410_v13 = vsel %vm51_vm2, %v1666_v27, %v1408_v29 }
0x16ca   :  { %v1411_v30 = vpack.c.bf16 %v1410_v13, %v1410_v13 }
0x16cc   :  { %1883 = vmatmul.mubr.msk.bf16.vlgmr.msra.gmra.mxu0 %vm85_vm3, %v1411_v30  ;;  %v1385_v10 = vpop.permute.xlu1 %1384 }
0x16cd   :  { %1387 = vst.msk [vmem:[#allocation3] sm:$0xff] %vm24_vm0, %v1385_v10 }
0x16d0   :  { %v1534_v7 = vld [vmem:[#allocation5] sm:$0xff] }
0x1788   :  { %v1499_v63 = vpop.f32.mrf.mxu1 }
0x1789   :  { %v1500_v6 = vadd.f32 %v2537_v28, %v1499_v63  ;;  %v1505_v28 = vld [vmem:[#allocation3] sm:$0xff] }
0x178a   :  { %v1894_v17 = vpop.f32.mrf.mxu1 }
0x178b   :  { %2020 = vtanh.f32 %v1500_v6  ;;  %v1670_v35 = vmul.f32 -1.442695, %v1500_v6 }
0x178c   :  { %v1456_v31 = vpop.f32.mrf.mxu0  ;;  %v1502_v4 = vpop.f32.mrf.mxu1 }
0x178d   :  { %v1457_v0 = vadd.f32 %v2543_v1, %v1456_v31 }
0x178e   :  { %v1884_v2 = vpop.f32.mrf.mxu0  ;;  %v1895_v3 = vpop.f32.mrf.mxu1 }
0x178f   :  { %2022 = vtanh.f32 %v1457_v0  ;;  %v1669_v1 = vmul.f32 -1.442695, %v1457_v0 }
0x1790   :  { %v1459_v32 = vpop.f32.mrf.mxu0  ;;  %2024 = vpow2.f32 %v1670_v35 }
0x1791   :  { %2026 = vpow2.f32 %v1669_v1 }
0x1792   :  { %v1885_v5 = vpop.f32.mrf.mxu0 }
0x1798   :  { %v2021_v33 = vpop.eup %2020 }
0x1799   :  { %1548 = vrot.lane.b32.xlu0 %v2021_v33, %s2048_s23 }
0x179c   :  { %v2023_v34 = vpop.eup %2022 }
0x179d   :  { %1543 = vrot.lane.b32.xlu0 %v1534_v7, %s2047_s14  ;;  %1519 = vrot.lane.b32.xlu1 %v2023_v34, %s2048_s23  ;;  %v2025_v36 = vpop.eup %2024 }
0x179e   :  { %v1538_v37 = vadd.f32 1.0, %v2025_v36  ;;  %v2027_v38 = vpop.eup %2026 }
0x179f   :  { %v1509_v19 = vadd.f32 1.0, %v2027_v38 }
0x17a0   :  { %2028 = vrcp.f32 %v1538_v37 }
0x17a1   :  { %1514 = vrot.lane.b32.xlu0 %v1505_v28, %s2047_s14  ;;  %2030 = vrcp.f32 %v1509_v19 }
0x17ad   :  { %v2029_v39 = vpop.eup %2028 }
0x17ae   :  { %v2031_v41 = vpop.eup %2030 }
0x180b   :  { %v1549_v23 = vpop.permute.xlu0 %1548 }
0x180c   :  { %v1551_v40 = vmul.f32 %v2029_v39, %v1549_v23 }
0x180e   :  { %1553 = vrot.lane.b32.xlu1 %v1551_v40, %s2047_s14 }
0x180f   :  { %v1520_v42 = vpop.permute.xlu1 %1519  ;;  %v1544_v44 = vpop.permute.xlu0 %1543 }
0x1810   :  { %v1522_v43 = vmul.f32 %v2031_v41, %v1520_v42  ;;  %v1546_v45 = vmul.f32 %v2029_v39, %v1544_v44 }
0x1812   :  { %1524 = vrot.lane.b32.xlu1 %v1522_v43, %s2047_s14 }
0x1813   :  { %v1515_v46 = vpop.permute.xlu0 %1514 }
0x1814   :  { %v1517_v49 = vmul.f32 %v2031_v41, %v1515_v46 }
0x1880   :  { %v1554_v47 = vpop.permute.xlu1 %1553 }
0x1881   :  { %v1556_v48 = vadd.f32 %v1554_v47, %v1546_v45 }
0x1883   :  { %2032 = vtanh.f32 %v1556_v48 }
0x1884   :  { %v1525_v50 = vpop.permute.xlu1 %1524 }
0x1885   :  { %v1527_v51 = vadd.f32 %v1525_v50, %v1517_v49 }
0x1887   :  { %2034 = vtanh.f32 %v1527_v51 }
0x1890   :  { %v2033_v52 = vpop.eup %2032 }
0x1891   :  { %1559 = vrot.lane.b32.xlu0 %v2033_v52, %s2048_s23 }
0x1894   :  { %v2035_v53 = vpop.eup %2034 }
0x1895   :  { %275 = vrot.lane.b32.xlu0 %v2194_v56, %s2048_s23  ;;  %1530 = vrot.lane.b32.xlu1 %v2035_v53, %s2048_s23 }
0x1899   :  { %654 = vrot.lane.b32.xlu0 %v2312_v59, %s2048_s23  ;;  %1579 = vrot.lane.b32.xlu1 %v1556_v48, %s2049_s26 }
0x189d   :  { %1029 = vrot.lane.b32.xlu0 %v2420_v8, %s2048_s23  ;;  %465 = vrot.lane.b32.xlu1 %v2253_v55, %s2048_s23 }
0x18a1   :  { %843 = vrot.lane.b32.xlu1 %v2371_v11, %s2048_s23 }
0x18a5   :  { %1214 = vrot.lane.b32.xlu1 %v2498_v14, %s2048_s23 }
0x1903   :  { %v1560_v56 = vpop.permute.xlu0 %1559 }
0x1904   :  { %v1562_v54 = vmul.f32 %v2029_v39, %v1560_v56 }
0x1906   :  { %1574 = vrot.lane.b32.xlu0 %v1562_v54, %s2047_s14 }
0x1907   :  { %v276_v59 = vpop.permute.xlu0 %275  ;;  %v1531_v57 = vpop.permute.xlu1 %1530 }
0x1908   :  { %1617 = vst.msk [vmem:[%s2677_s5 + $0x38] sm:$0xff] %vm279_vm4, %v276_v59  ;;  %v1533_v8 = vmul.f32 %v2031_v41, %v1531_v57 }
0x190a   :  { %1399 = vrot.lane.b32.xlu0 %v2554_v60, %s2048_s23  ;;  %1564 = vrot.lane.b32.xlu1 %v1533_v8, %s2047_s14 }
0x190b   :  { %v655_v55 = vpop.permute.xlu0 %654  ;;  %v1580_v11 = vpop.permute.xlu1 %1579 }
0x190c   :  { %1633 = vst.msk [vmem:[%s2677_s5 + $0x28] sm:$0xff] %vm279_vm4, %v655_v55 }
0x190d   :  { %1582 = vst.msk [vmem:[#allocation5] sm:$0xff] %vm24_vm0, %v1580_v11  ;;  %1656 = vst.msk [vmem:[%s2677_s5 + $0x28] sm:$0xff] %vm24_vm0, %v2504_v21 }
0x190e   :  { %1569 = vrot.lane.b32.xlu0 %v1527_v51, %s2049_s26  ;;  %1584 = vrot.lane.b32.xlu1 %v1562_v54, %s2048_s23 }
0x190f   :  { %v1030_v14 = vpop.permute.xlu0 %1029  ;;  %v466_v58 = vpop.permute.xlu1 %465 }
0x1910   :  { %1649 = vst.msk [vmem:[%s2677_s5 + $0x18] sm:$0xff] %vm279_vm4, %v1030_v14  ;;  %1625 = vst.msk [vmem:[%s2677_s5 + $0x30] sm:$0xff] %vm279_vm4, %v466_v58 }
0x1911   :  { %1664 = vst.msk [vmem:[%s2677_s5 + $0x30] sm:$0xff] %vm24_vm0, %v2560_v15 }
0x1913   :  { %v844_v60 = vpop.permute.xlu1 %843 }
0x1914   :  { %v1590_v21 = vld [vmem:[#allocation5] sm:$0xff]  ;;  %1641 = vst.msk [vmem:[%s2677_s5 + $0x20] sm:$0xff] %vm279_vm4, %v844_v60 }
0x1915   :  { %1591 = vst.msk [vmem:[%s2678_s7] sm:$0xff] %vm24_vm0, %v1590_v21  ;;  %1648 = vst.msk [vmem:[%s2677_s5 + $0x20] sm:$0xff] %vm24_vm0, %v2426_v16 }
0x1917   :  { %v1215_v61 = vpop.permute.xlu1 %1214 }
0x1918   :  { %1657 = vst.msk [vmem:[%s2677_s5 + $0x10] sm:$0xff] %vm279_vm4, %v1215_v61 }
0x1978   :  { %v1575_v62 = vpop.permute.xlu0 %1574 }
0x1979   :  { %1577 = vst.msk [vmem:[#allocation4] sm:$0xff] %vm24_vm0, %v1575_v62 }
0x197c   :  { %v1400_v9 = vpop.permute.xlu0 %1399  ;;  %v1565_v15 = vpop.permute.xlu1 %1564 }
0x197d   :  { %1665 = vst.msk [vmem:[%s2677_s5 + $0x8] sm:$0xff] %vm279_vm4, %v1400_v9 }
0x197e   :  { %1567 = vst.msk [vmem:[#allocation2] sm:$0xff] %vm24_vm0, %v1565_v15  ;;  %1671 = vst.msk [vmem:[%s2677_s5 + $0x38] sm:$0xff] %vm24_vm0, %v1565_v15 }
0x1980   :  { %v1588_v16 = vld [vmem:[#allocation4] sm:$0xff]  ;;  %v1570_v18 = vpop.permute.xlu0 %1569  ;;  %v1585_v20 = vpop.permute.xlu1 %1584 }
0x1981   :  { %1589 = vst.msk [vmem:[%s2679_s6] sm:$0xff] %vm24_vm0, %v1588_v16  ;;  %1572 = vst.msk [vmem:[#allocation3] sm:$0xff] %vm24_vm0, %v1570_v18 }
0x1982   :  { %1587 = vst.msk [vmem:[%s2677_s5] sm:$0xff] %vm279_vm4, %v1585_v20 }

</bundles_post_ra>
